<compile_context>
chip_gen: v7x
topology: tpu7x:2x2x1
jax: 0.10.0
libtpu: 0.0.40
codegen_flags: <defaults>
</compile_context>

<pallas_src>
import functools
import jax
import jax.numpy as jnp
from jax.experimental import pallas as pl
from jax.experimental.pallas import tpu as pltpu

# ----------------------------- model config ---------------------------------
B = 2          # batch
S = 8          # target sequence length
SM = 8         # memory (source) sequence length
D_MODEL = 32
N_HEAD = 4
D_HEAD = D_MODEL // N_HEAD
DIM_FF = 64
LN_EPS = 1e-5
LANE = 128

# bias / LayerNorm slab row indices
(R_BQ1, R_BK1, R_BV1, R_BO1,
 R_BQ2, R_BK2, R_BV2, R_BO2,
 R_B1, R_B2,
 R_G1, R_BE1, R_G2, R_BE2, R_G3, R_BE3) = range(16)
N_VEC_ROWS = 16


# ------------------------------- kernel --------------------------------------
def decoder_layer_kernel(dh, d_valid, tgt_ref, mem_ref, mask_ref, w_ref, vec_ref,
                         out_ref):
    s, dp = tgt_ref.shape                  # (S, D_padded)
    sm = mem_ref.shape[0]
    hp = dp // dh                          # padded head count (pad heads are all-zero)
    scale = 1.0 / jnp.sqrt(jnp.float32(dh))

    x = tgt_ref[...]                       # (S, DP)   padded lanes are 0
    mem = mem_ref[...]                     # (SM, DP)  padded lanes are 0
    mask = mask_ref[...]                   # (S, S) additive mask
    vecs = vec_ref[...]                    # (16, DP) biases + LN params

    def vrow(r):                           # static sublane slice -> (1, DP)
        return vecs[r:r + 1, :]

    # lane-validity mask for LayerNorm stats over the zero-padded feature dim
    lane = jax.lax.broadcasted_iota(jnp.int32, (1, dp), 1)
    lane_valid = lane < d_valid            # hoisted: shared by all 3 LayerNorms

    def layernorm(xv, g, bta):
        mean = jnp.sum(xv, axis=-1, keepdims=True) * (1.0 / d_valid)
        diff = jnp.where(lane_valid, xv - mean, 0.0)
        var = jnp.sum(diff * diff, axis=-1, keepdims=True) * (1.0 / d_valid)
        # gamma/beta are zero in padded lanes -> padded lanes stay exactly 0
        return diff * jax.lax.rsqrt(var + LN_EPS) * g + bta

    def attention(q, k, v, add_mask):
        # Fold heads into the batched-contraction axis (single pair of einsums).
        sq, skv = q.shape[0], k.shape[0]
        qf = q.reshape(sq, hp, dh)
        kf = k.reshape(skv, hp, dh)
        vf = v.reshape(skv, hp, dh)
        sc = jnp.einsum('qhd,khd->hqk', qf, kf,
                        preferred_element_type=jnp.float32)   # (Hp, Sq, Skv)
        if add_mask is not None:
            sc = sc + add_mask                                # one broadcast, all heads
        sc = sc - jnp.max(sc, axis=-1, keepdims=True)
        p = jnp.exp(sc)
        p = p * pl.reciprocal(jnp.sum(p, axis=-1, keepdims=True), approx=True)
        o = jnp.einsum('hqk,khd->qhd', p, vf,
                       preferred_element_type=jnp.float32)    # (Sq, Hp, dh)
        return o.reshape(sq, dp)

    # ---- self-attention (fused QKV GEMM) + residual + LN1 ----
    qkv = jnp.dot(x, w_ref[:, 0:3 * dp],
                  preferred_element_type=jnp.float32)          # (S, 3*DP)
    q1 = (qkv[:, 0:dp] + vrow(R_BQ1)) * scale                  # scale folded into Q once
    k1 = qkv[:, dp:2 * dp] + vrow(R_BK1)
    v1 = qkv[:, 2 * dp:3 * dp] + vrow(R_BV1)
    sa = attention(q1, k1, v1, mask)
    sa = jnp.dot(sa, w_ref[:, 3 * dp:4 * dp],
                 preferred_element_type=jnp.float32) + vrow(R_BO1)
    x1 = layernorm(x + sa, vrow(R_G1), vrow(R_BE1))

    # ---- cross-attention (Q GEMM + fused KV GEMM) + residual + LN2 ----
    q2 = (jnp.dot(x1, w_ref[:, 4 * dp:5 * dp],
                  preferred_element_type=jnp.float32) + vrow(R_BQ2)) * scale
    kv2 = jnp.dot(mem, w_ref[:, 5 * dp:7 * dp],
                  preferred_element_type=jnp.float32)          # (SM, 2*DP)
    k2 = kv2[:, 0:dp] + vrow(R_BK2)
    v2 = kv2[:, dp:2 * dp] + vrow(R_BV2)
    ca = attention(q2, k2, v2, None)
    ca = jnp.dot(ca, w_ref[:, 7 * dp:8 * dp],
                 preferred_element_type=jnp.float32) + vrow(R_BO2)
    x2 = layernorm(x1 + ca, vrow(R_G2), vrow(R_BE2))

    # ---- feed-forward + residual + LN3 ----
    h = jnp.dot(x2, w_ref[:, 8 * dp:9 * dp],
                preferred_element_type=jnp.float32) + vrow(R_B1)
    h = jnp.maximum(h, 0.0)
    ff = jnp.dot(h, w_ref[:, 9 * dp:10 * dp],
                 preferred_element_type=jnp.float32) + vrow(R_B2)
    x3 = layernorm(x2 + ff, vrow(R_G3), vrow(R_BE3))

    out_ref[...] = x3                     # lane-dense (S, DP) store


# ------------------------------- wrapper --------------------------------------
def decoder_layer(tgt, memory, trg_mask, params, n_head=N_HEAD):
    b, s, d = tgt.shape
    _, sm, _ = memory.shape
    dim_ff = params["w1"].shape[1]
    dh = d // n_head
    dp = LANE * pl.cdiv(d, LANE)          # lane-pad d_model to a multiple of 128
    fp = LANE * pl.cdiv(dim_ff, LANE)     # lane-pad dim_ff  to a multiple of 128
    # The single weight slab shares its dp-row layout with the dim_ff-input GEMM (w2).
    assert dp == fp, "padded d_model must equal padded dim_ff for the shared weight slab"
    # TODO(synk): if padded dims ever differ, move w2 into a second slab with fp rows.

    def padw(w, rows, cols):
        return jnp.zeros((rows, cols), jnp.float32).at[:w.shape[0], :w.shape[1]].set(w)

    def padv(v, cols):
        return jnp.zeros((1, cols), jnp.float32).at[:, :v.shape[1]].set(v)

    p = params
    # one (dp, 10*dp) weight slab -- every projection at a 128-aligned column offset
    wslab = jnp.concatenate([
        padw(p["wq1"], dp, dp), padw(p["wk1"], dp, dp), padw(p["wv1"], dp, dp),
        padw(p["wo1"], dp, dp),
        padw(p["wq2"], dp, dp), padw(p["wk2"], dp, dp), padw(p["wv2"], dp, dp),
        padw(p["wo2"], dp, dp),
        padw(p["w1"], dp, fp), padw(p["w2"], fp, dp),
    ], axis=1)

    # one (16, dp) slab with every bias and LN gamma/beta (zero in padded lanes)
    vecslab = jnp.concatenate([
        padv(p["bq1"], dp), padv(p["bk1"], dp), padv(p["bv1"], dp), padv(p["bo1"], dp),
        padv(p["bq2"], dp), padv(p["bk2"], dp), padv(p["bv2"], dp), padv(p["bo2"], dp),
        padv(p["b1"], fp), padv(p["b2"], dp),
        padv(p["g1"], dp), padv(p["be1"], dp),
        padv(p["g2"], dp), padv(p["be2"], dp),
        padv(p["g3"], dp), padv(p["be3"], dp),
    ], axis=0)

    # activations flattened + lane-padded in the wrapper (free XLA layout plumbing)
    tgt2d = jnp.pad(tgt.reshape(b * s, d), ((0, 0), (0, dp - d)))
    mem2d = jnp.pad(memory.reshape(b * sm, d), ((0, 0), (0, dp - d)))

    # advisory cost estimate for XLA scheduling (padded shapes)
    hp = dp // dh
    flops = 2 * b * (
        s * dp * 3 * dp + 2 * hp * s * s * dh + s * dp * dp      # self-attn
        + s * dp * dp + sm * dp * 2 * dp + 2 * hp * s * sm * dh  # cross-attn projections
        + s * dp * dp                                            # cross-attn out proj
        + s * dp * fp + s * fp * dp)                             # FFN
    transcendentals = b * hp * s * (s + sm) + 3 * b * s
    bytes_accessed = int(4 * (tgt2d.size + mem2d.size + trg_mask.size
                              + wslab.size + vecslab.size + b * s * dp))

    out2d = pl.pallas_call(
        functools.partial(decoder_layer_kernel, dh, d),
        out_shape=jax.ShapeDtypeStruct((b * s, dp), jnp.float32),
        grid=(b,),                                   # batch axis -> parallel on v7x's 2 TCs
        in_specs=[
            pl.BlockSpec((s, dp), lambda i: (i, 0)),            # tgt rows of batch i
            pl.BlockSpec((sm, dp), lambda i: (i, 0)),           # memory rows of batch i
            pl.BlockSpec((s, s), lambda i: (0, 0)),             # shared additive mask
            pl.BlockSpec((dp, 10 * dp), lambda i: (0, 0)),      # weight slab (resident)
            pl.BlockSpec((N_VEC_ROWS, dp), lambda i: (0, 0)),   # bias/LN slab (resident)
        ],
        out_specs=pl.BlockSpec((s, dp), lambda i: (i, 0)),
        compiler_params=pltpu.CompilerParams(
            dimension_semantics=("parallel",)),
        cost_estimate=pl.CostEstimate(flops=int(flops),
                                      transcendentals=int(transcendentals),
                                      bytes_accessed=bytes_accessed),
    )(tgt2d, mem2d, trg_mask, wslab, vecslab)

    return out2d[:, :d].reshape(b, s, d)


# --------------------------- pure-JAX reference -------------------------------
def _layernorm_ref(x, gamma, beta):
    mean = jnp.mean(x, axis=-1, keepdims=True)
    var = jnp.mean(jnp.square(x - mean), axis=-1, keepdims=True)
    return (x - mean) * jax.lax.rsqrt(var + LN_EPS) * gamma + beta


def _mha_ref(xq, xkv, wq, bq, wk, bk, wv, bv, wo, bo, n_head, mask):
    b, sq, d = xq.shape
    skv = xkv.shape[1]
    dh = d // n_head
    q = (xq @ wq + bq).reshape(b, sq, n_head, dh).transpose(0, 2, 1, 3)
    k = (xkv @ wk + bk).reshape(b, skv, n_head, dh).transpose(0, 2, 1, 3)
    v = (xkv @ wv + bv).reshape(b, skv, n_head, dh).transpose(0, 2, 1, 3)
    sc = (q @ jnp.swapaxes(k, -1, -2)) / jnp.sqrt(jnp.float32(dh))
    if mask is not None:
        sc = sc + mask
    p = jax.nn.softmax(sc, axis=-1)
    o = (p @ v).transpose(0, 2, 1, 3).reshape(b, sq, d)
    return o @ wo + bo


def decoder_layer_ref(tgt, memory, trg_mask, params):
    p = params
    sa = _mha_ref(tgt, tgt, p["wq1"], p["bq1"], p["wk1"], p["bk1"],
                  p["wv1"], p["bv1"], p["wo1"], p["bo1"], N_HEAD, trg_mask)
    x1 = _layernorm_ref(tgt + sa, p["g1"], p["be1"])
    ca = _mha_ref(x1, memory, p["wq2"], p["bq2"], p["wk2"], p["bk2"],
                  p["wv2"], p["bv2"], p["wo2"], p["bo2"], N_HEAD, None)
    x2 = _layernorm_ref(x1 + ca, p["g2"], p["be2"])
    h = jnp.maximum(x2 @ p["w1"] + p["b1"], 0.0)
    ff = h @ p["w2"] + p["b2"]
    return _layernorm_ref(x2 + ff, p["g3"], p["be3"])


# --------------------------------- main ---------------------------------------
if __name__ == "__main__":
    key = jax.random.PRNGKey(0)
    keys = jax.random.split(key, 32)
    ki = iter(keys)

    def lin(k, din, dout):
        # weight stored as (in, out)  (i.e. torch weight (out,in) pre-transposed)
        return jax.random.normal(k, (din, dout), jnp.float32) * (1.0 / jnp.sqrt(din))

    params = {}
    # self-attention
    for name in ("wq1", "wk1", "wv1", "wo1"):
        params[name] = lin(next(ki), D_MODEL, D_MODEL)
    for name in ("bq1", "bk1", "bv1", "bo1"):
        params[name] = jax.random.normal(next(ki), (1, D_MODEL), jnp.float32) * 0.02
    # cross-attention
    for name in ("wq2", "wk2", "wv2", "wo2"):
        params[name] = lin(next(ki), D_MODEL, D_MODEL)
    for name in ("bq2", "bk2", "bv2", "bo2"):
        params[name] = jax.random.normal(next(ki), (1, D_MODEL), jnp.float32) * 0.02
    # feed-forward
    params["w1"] = lin(next(ki), D_MODEL, DIM_FF)
    params["b1"] = jax.random.normal(next(ki), (1, DIM_FF), jnp.float32) * 0.02
    params["w2"] = lin(next(ki), DIM_FF, D_MODEL)
    params["b2"] = jax.random.normal(next(ki), (1, D_MODEL), jnp.float32) * 0.02
    # layer norms (gamma=1, beta=0 like torch init)
    for g, b_ in (("g1", "be1"), ("g2", "be2"), ("g3", "be3")):
        params[g] = jnp.ones((1, D_MODEL), jnp.float32)
        params[b_] = jnp.zeros((1, D_MODEL), jnp.float32)

    tgt = jax.random.normal(next(ki), (B, S, D_MODEL), jnp.float32)
    memory = jax.random.normal(next(ki), (B, SM, D_MODEL), jnp.float32)
    # causal additive mask (0 allowed, -1e9 disallowed)
    causal = jnp.tril(jnp.ones((S, S), jnp.float32))
    trg_mask = jnp.where(causal > 0, 0.0, -1e9).astype(jnp.float32)

    out = decoder_layer(tgt, memory, trg_mask, params)
    out = jax.block_until_ready(out)

    ref = decoder_layer_ref(tgt, memory, trg_mask, params)
    assert out.shape == (B, S, D_MODEL)
    # Tolerance sized for the EUP approx-reciprocal (~2^-12 relative error) used in
    # the in-kernel softmax denominator; all other math is exact f32.
    assert jnp.allclose(out, ref, atol=5e-3, rtol=5e-3), "mismatch vs JAX reference"

    print("KERNEL_OK")
</pallas_src>

<mosaic_0001>
module attributes {stable_mosaic.version = 11 : i64} {
  func.func @decoder_layer_kernel(%arg0: i32, %arg1: memref<8x128xf32, #tpu.memory_space<vmem>>, %arg2: memref<8x128xf32, #tpu.memory_space<vmem>>, %arg3: memref<8x8xf32, #tpu.memory_space<vmem>>, %arg4: memref<128x1280xf32, #tpu.memory_space<vmem>>, %arg5: memref<16x128xf32, #tpu.memory_space<vmem>>, %arg6: memref<8x128xf32, #tpu.memory_space<vmem>>) attributes {dimension_semantics = [#tpu.dimension_semantics<parallel>], iteration_bounds = array<i64: 2>, scalar_prefetch = 0 : i64, scratch_operands = 0 : i64, tpu.core_type = #tpu.core_type<tc>, window_params = [{transform_indices = @transform_0, window_bounds = array<i64: 8, 128>}, {transform_indices = @transform_1, window_bounds = array<i64: 8, 128>}, {pipeline_mode = #tpu.pipeline_mode<synchronous>, transform_indices = @transform_2, window_bounds = array<i64: 8, 8>}, {pipeline_mode = #tpu.pipeline_mode<synchronous>, transform_indices = @transform_3, window_bounds = array<i64: 128, 1280>}, {pipeline_mode = #tpu.pipeline_mode<synchronous>, transform_indices = @transform_4, window_bounds = array<i64: 16, 128>}, {transform_indices = @transform_5, window_bounds = array<i64: 8, 128>}]} {
    %cst = arith.constant 8.000000e+00 : f32
    %0 = math.sqrt %cst : f32
    %cst_0 = arith.constant 1.000000e+00 : f32
    %1 = arith.divf %cst_0, %0 : f32
    %c0 = arith.constant 0 : index
    %c0_1 = arith.constant 0 : index
    %2 = vector.load %arg1[%c0, %c0_1] : memref<8x128xf32, #tpu.memory_space<vmem>>, vector<8x128xf32>
    %c0_2 = arith.constant 0 : index
    %c0_3 = arith.constant 0 : index
    %3 = vector.load %arg2[%c0_2, %c0_3] : memref<8x128xf32, #tpu.memory_space<vmem>>, vector<8x128xf32>
    %c0_4 = arith.constant 0 : index
    %c0_5 = arith.constant 0 : index
    %4 = vector.load %arg3[%c0_4, %c0_5] : memref<8x8xf32, #tpu.memory_space<vmem>>, vector<8x8xf32>
    %c0_6 = arith.constant 0 : index
    %c0_7 = arith.constant 0 : index
    %5 = vector.load %arg5[%c0_6, %c0_7] : memref<16x128xf32, #tpu.memory_space<vmem>>, vector<16x128xf32>
    %6 = tpu.iota {dimensions = array<i32: 1>} : vector<1x128xi32>
    %c32_i32 = arith.constant 32 : i32
    %7 = vector.broadcast %c32_i32 : i32 to vector<1x128xi32>
    %8 = arith.cmpi slt, %6, %7 : vector<1x128xi32>
    %c0_8 = arith.constant 0 : index
    %c0_9 = arith.constant 0 : index
    %9 = vector.load %arg4[%c0_8, %c0_9] : memref<128x1280xf32, #tpu.memory_space<vmem>>, vector<128x384xf32>
    %cst_10 = arith.constant dense<0.000000e+00> : vector<8x384xf32>
    %10 = tpu.matmul %2, %9, %cst_10 {dimension_numbers = #tpu.dot_dimension_numbers<[1], [0], [0], [1], [0, 0, 1, 1], [], []>} : vector<8x128xf32>, vector<128x384xf32>, vector<8x384xf32> -> vector<8x384xf32>
    %11 = vector.extract_strided_slice %10 {offsets = [0, 0], sizes = [8, 128], strides = [1, 1]} : vector<8x384xf32> to vector<8x128xf32>
    %12 = vector.extract_strided_slice %5 {offsets = [0, 0], sizes = [1, 128], strides = [1, 1]} : vector<16x128xf32> to vector<1x128xf32>
    %13 = vector.broadcast %12 : vector<1x128xf32> to vector<8x128xf32>
    %14 = arith.addf %11, %13 : vector<8x128xf32>
    %15 = vector.broadcast %1 : f32 to vector<8x128xf32>
    %16 = arith.mulf %14, %15 : vector<8x128xf32>
    %17 = vector.extract_strided_slice %10 {offsets = [0, 128], sizes = [8, 128], strides = [1, 1]} : vector<8x384xf32> to vector<8x128xf32>
    %18 = vector.extract_strided_slice %5 {offsets = [1, 0], sizes = [1, 128], strides = [1, 1]} : vector<16x128xf32> to vector<1x128xf32>
    %19 = vector.broadcast %18 : vector<1x128xf32> to vector<8x128xf32>
    %20 = arith.addf %17, %19 : vector<8x128xf32>
    %21 = vector.extract_strided_slice %10 {offsets = [0, 256], sizes = [8, 128], strides = [1, 1]} : vector<8x384xf32> to vector<8x128xf32>
    %22 = vector.extract_strided_slice %5 {offsets = [2, 0], sizes = [1, 128], strides = [1, 1]} : vector<16x128xf32> to vector<1x128xf32>
    %23 = vector.broadcast %22 : vector<1x128xf32> to vector<8x128xf32>
    %24 = arith.addf %21, %23 : vector<8x128xf32>
    %25 = vector.shape_cast %16 : vector<8x128xf32> to vector<8x16x8xf32>
    %26 = vector.shape_cast %20 : vector<8x128xf32> to vector<8x16x8xf32>
    %27 = vector.shape_cast %24 : vector<8x128xf32> to vector<8x16x8xf32>
    "tpu.trace_start"() <{level = 10 : i32, message = "qhd,khd->hqk"}> : () -> ()
    %cst_11 = arith.constant dense<0.000000e+00> : vector<16x8x8xf32>
    %28 = tpu.matmul %25, %26, %cst_11 {dimension_numbers = #tpu.dot_dimension_numbers<[2], [2], [0], [0], [0, 1, 0, 0, 1, 0], [1], [1]>} : vector<8x16x8xf32>, vector<8x16x8xf32>, vector<16x8x8xf32> -> vector<16x8x8xf32>
    "tpu.trace_stop"() : () -> ()
    %29 = vector.shape_cast %4 : vector<8x8xf32> to vector<1x8x8xf32>
    %30 = vector.broadcast %29 : vector<1x8x8xf32> to vector<16x8x8xf32>
    %31 = arith.addf %28, %30 : vector<16x8x8xf32>
    %cst_12 = arith.constant dense<0xFF800000> : vector<16x8xf32>
    %32 = vector.multi_reduction <maximumf>, %31, %cst_12 [2] : vector<16x8x8xf32> to vector<16x8xf32>
    %33 = vector.shape_cast %32 : vector<16x8xf32> to vector<16x8x1xf32>
    %34 = vector.broadcast %33 : vector<16x8x1xf32> to vector<16x8x8xf32>
    %35 = arith.subf %31, %34 : vector<16x8x8xf32>
    %36 = math.exp %35 : vector<16x8x8xf32>
    %cst_13 = arith.constant dense<0.000000e+00> : vector<16x8xf32>
    %37 = vector.multi_reduction <add>, %36, %cst_13 [2] : vector<16x8x8xf32> to vector<16x8xf32>
    %38 = vector.shape_cast %37 : vector<16x8xf32> to vector<16x8x1xf32>
    %39 = tpu.reciprocal %38 {approx = true} : vector<16x8x1xf32> -> vector<16x8x1xf32>
    %40 = vector.broadcast %39 : vector<16x8x1xf32> to vector<16x8x8xf32>
    %41 = arith.mulf %36, %40 : vector<16x8x8xf32>
    "tpu.trace_start"() <{level = 10 : i32, message = "hqk,khd->qhd"}> : () -> ()
    %cst_14 = arith.constant dense<0.000000e+00> : vector<16x8x8xf32>
    %42 = tpu.matmul %27, %41, %cst_14 {dimension_numbers = #tpu.dot_dimension_numbers<[0], [2], [2], [1], [0, 1, 0, 2, 1, 1], [1], [0]>} : vector<8x16x8xf32>, vector<16x8x8xf32>, vector<16x8x8xf32> -> vector<16x8x8xf32>
    %43 = tpu.transpose %42, [2, 0, 1] : vector<16x8x8xf32> -> vector<8x16x8xf32>
    "tpu.trace_stop"() : () -> ()
    %44 = vector.shape_cast %43 : vector<8x16x8xf32> to vector<8x128xf32>
    %c0_15 = arith.constant 0 : index
    %c384 = arith.constant 384 : index
    %45 = vector.load %arg4[%c0_15, %c384] : memref<128x1280xf32, #tpu.memory_space<vmem>>, vector<128x128xf32>
    %cst_16 = arith.constant dense<0.000000e+00> : vector<8x128xf32>
    %46 = tpu.matmul %44, %45, %cst_16 {dimension_numbers = #tpu.dot_dimension_numbers<[1], [0], [0], [1], [0, 0, 1, 1], [], []>} : vector<8x128xf32>, vector<128x128xf32>, vector<8x128xf32> -> vector<8x128xf32>
    %47 = vector.extract_strided_slice %5 {offsets = [3, 0], sizes = [1, 128], strides = [1, 1]} : vector<16x128xf32> to vector<1x128xf32>
    %48 = vector.broadcast %47 : vector<1x128xf32> to vector<8x128xf32>
    %49 = arith.addf %46, %48 : vector<8x128xf32>
    %50 = arith.addf %2, %49 : vector<8x128xf32>
    %51 = vector.extract_strided_slice %5 {offsets = [10, 0], sizes = [1, 128], strides = [1, 1]} : vector<16x128xf32> to vector<1x128xf32>
    %52 = vector.extract_strided_slice %5 {offsets = [11, 0], sizes = [1, 128], strides = [1, 1]} : vector<16x128xf32> to vector<1x128xf32>
    %cst_17 = arith.constant dense<0.000000e+00> : vector<8xf32>
    %53 = vector.multi_reduction <add>, %50, %cst_17 [1] : vector<8x128xf32> to vector<8xf32>
    %54 = vector.shape_cast %53 : vector<8xf32> to vector<8x1xf32>
    %cst_18 = arith.constant 3.125000e-02 : f32
    %55 = vector.broadcast %cst_18 : f32 to vector<8x1xf32>
    %56 = arith.mulf %54, %55 : vector<8x1xf32>
    %57 = vector.broadcast %56 : vector<8x1xf32> to vector<8x128xf32>
    %58 = arith.subf %50, %57 : vector<8x128xf32>
    %cst_19 = arith.constant 0.000000e+00 : f32
    %59 = vector.shape_cast %8 : vector<1x128xi1> to vector<1x128xi1>
    %60 = vector.broadcast %59 : vector<1x128xi1> to vector<8x128xi1>
    %61 = vector.broadcast %cst_19 : f32 to vector<8x128xf32>
    %62 = arith.select %60, %58, %61 : vector<8x128xi1>, vector<8x128xf32>
    %63 = arith.mulf %62, %62 : vector<8x128xf32>
    %cst_20 = arith.constant dense<0.000000e+00> : vector<8xf32>
    %64 = vector.multi_reduction <add>, %63, %cst_20 [1] : vector<8x128xf32> to vector<8xf32>
    %65 = vector.shape_cast %64 : vector<8xf32> to vector<8x1xf32>
    %cst_21 = arith.constant 3.125000e-02 : f32
    %66 = vector.broadcast %cst_21 : f32 to vector<8x1xf32>
    %67 = arith.mulf %65, %66 : vector<8x1xf32>
    %cst_22 = arith.constant 9.99999974E-6 : f32
    %68 = vector.broadcast %cst_22 : f32 to vector<8x1xf32>
    %69 = arith.addf %67, %68 : vector<8x1xf32>
    %70 = math.rsqrt %69 : vector<8x1xf32>
    %71 = vector.broadcast %70 : vector<8x1xf32> to vector<8x128xf32>
    %72 = arith.mulf %62, %71 : vector<8x128xf32>
    %73 = vector.broadcast %51 : vector<1x128xf32> to vector<8x128xf32>
    %74 = arith.mulf %72, %73 : vector<8x128xf32>
    %75 = vector.broadcast %52 : vector<1x128xf32> to vector<8x128xf32>
    %76 = arith.addf %74, %75 : vector<8x128xf32>
    %c0_23 = arith.constant 0 : index
    %c512 = arith.constant 512 : index
    %77 = vector.load %arg4[%c0_23, %c512] : memref<128x1280xf32, #tpu.memory_space<vmem>>, vector<128x128xf32>
    %cst_24 = arith.constant dense<0.000000e+00> : vector<8x128xf32>
    %78 = tpu.matmul %76, %77, %cst_24 {dimension_numbers = #tpu.dot_dimension_numbers<[1], [0], [0], [1], [0, 0, 1, 1], [], []>} : vector<8x128xf32>, vector<128x128xf32>, vector<8x128xf32> -> vector<8x128xf32>
    %79 = vector.extract_strided_slice %5 {offsets = [4, 0], sizes = [1, 128], strides = [1, 1]} : vector<16x128xf32> to vector<1x128xf32>
    %80 = vector.broadcast %79 : vector<1x128xf32> to vector<8x128xf32>
    %81 = arith.addf %78, %80 : vector<8x128xf32>
    %82 = vector.broadcast %1 : f32 to vector<8x128xf32>
    %83 = arith.mulf %81, %82 : vector<8x128xf32>
    %c0_25 = arith.constant 0 : index
    %c640 = arith.constant 640 : index
    %84 = vector.load %arg4[%c0_25, %c640] : memref<128x1280xf32, #tpu.memory_space<vmem>>, vector<128x256xf32>
    %cst_26 = arith.constant dense<0.000000e+00> : vector<8x256xf32>
    %85 = tpu.matmul %3, %84, %cst_26 {dimension_numbers = #tpu.dot_dimension_numbers<[1], [0], [0], [1], [0, 0, 1, 1], [], []>} : vector<8x128xf32>, vector<128x256xf32>, vector<8x256xf32> -> vector<8x256xf32>
    %86 = vector.extract_strided_slice %85 {offsets = [0, 0], sizes = [8, 128], strides = [1, 1]} : vector<8x256xf32> to vector<8x128xf32>
    %87 = vector.extract_strided_slice %5 {offsets = [5, 0], sizes = [1, 128], strides = [1, 1]} : vector<16x128xf32> to vector<1x128xf32>
    %88 = vector.broadcast %87 : vector<1x128xf32> to vector<8x128xf32>
    %89 = arith.addf %86, %88 : vector<8x128xf32>
    %90 = vector.extract_strided_slice %85 {offsets = [0, 128], sizes = [8, 128], strides = [1, 1]} : vector<8x256xf32> to vector<8x128xf32>
    %91 = vector.extract_strided_slice %5 {offsets = [6, 0], sizes = [1, 128], strides = [1, 1]} : vector<16x128xf32> to vector<1x128xf32>
    %92 = vector.broadcast %91 : vector<1x128xf32> to vector<8x128xf32>
    %93 = arith.addf %90, %92 : vector<8x128xf32>
    %94 = vector.shape_cast %83 : vector<8x128xf32> to vector<8x16x8xf32>
    %95 = vector.shape_cast %89 : vector<8x128xf32> to vector<8x16x8xf32>
    %96 = vector.shape_cast %93 : vector<8x128xf32> to vector<8x16x8xf32>
    "tpu.trace_start"() <{level = 10 : i32, message = "qhd,khd->hqk"}> : () -> ()
    %cst_27 = arith.constant dense<0.000000e+00> : vector<16x8x8xf32>
    %97 = tpu.matmul %94, %95, %cst_27 {dimension_numbers = #tpu.dot_dimension_numbers<[2], [2], [0], [0], [0, 1, 0, 0, 1, 0], [1], [1]>} : vector<8x16x8xf32>, vector<8x16x8xf32>, vector<16x8x8xf32> -> vector<16x8x8xf32>
    "tpu.trace_stop"() : () -> ()
    %cst_28 = arith.constant dense<0xFF800000> : vector<16x8xf32>
    %98 = vector.multi_reduction <maximumf>, %97, %cst_28 [2] : vector<16x8x8xf32> to vector<16x8xf32>
    %99 = vector.shape_cast %98 : vector<16x8xf32> to vector<16x8x1xf32>
    %100 = vector.broadcast %99 : vector<16x8x1xf32> to vector<16x8x8xf32>
    %101 = arith.subf %97, %100 : vector<16x8x8xf32>
    %102 = math.exp %101 : vector<16x8x8xf32>
    %cst_29 = arith.constant dense<0.000000e+00> : vector<16x8xf32>
    %103 = vector.multi_reduction <add>, %102, %cst_29 [2] : vector<16x8x8xf32> to vector<16x8xf32>
    %104 = vector.shape_cast %103 : vector<16x8xf32> to vector<16x8x1xf32>
    %105 = tpu.reciprocal %104 {approx = true} : vector<16x8x1xf32> -> vector<16x8x1xf32>
    %106 = vector.broadcast %105 : vector<16x8x1xf32> to vector<16x8x8xf32>
    %107 = arith.mulf %102, %106 : vector<16x8x8xf32>
    "tpu.trace_start"() <{level = 10 : i32, message = "hqk,khd->qhd"}> : () -> ()
    %cst_30 = arith.constant dense<0.000000e+00> : vector<16x8x8xf32>
    %108 = tpu.matmul %96, %107, %cst_30 {dimension_numbers = #tpu.dot_dimension_numbers<[0], [2], [2], [1], [0, 1, 0, 2, 1, 1], [1], [0]>} : vector<8x16x8xf32>, vector<16x8x8xf32>, vector<16x8x8xf32> -> vector<16x8x8xf32>
    %109 = tpu.transpose %108, [2, 0, 1] : vector<16x8x8xf32> -> vector<8x16x8xf32>
    "tpu.trace_stop"() : () -> ()
    %110 = vector.shape_cast %109 : vector<8x16x8xf32> to vector<8x128xf32>
    %c0_31 = arith.constant 0 : index
    %c896 = arith.constant 896 : index
    %111 = vector.load %arg4[%c0_31, %c896] : memref<128x1280xf32, #tpu.memory_space<vmem>>, vector<128x128xf32>
    %cst_32 = arith.constant dense<0.000000e+00> : vector<8x128xf32>
    %112 = tpu.matmul %110, %111, %cst_32 {dimension_numbers = #tpu.dot_dimension_numbers<[1], [0], [0], [1], [0, 0, 1, 1], [], []>} : vector<8x128xf32>, vector<128x128xf32>, vector<8x128xf32> -> vector<8x128xf32>
    %113 = vector.extract_strided_slice %5 {offsets = [7, 0], sizes = [1, 128], strides = [1, 1]} : vector<16x128xf32> to vector<1x128xf32>
    %114 = vector.broadcast %113 : vector<1x128xf32> to vector<8x128xf32>
    %115 = arith.addf %112, %114 : vector<8x128xf32>
    %116 = arith.addf %76, %115 : vector<8x128xf32>
    %117 = vector.extract_strided_slice %5 {offsets = [12, 0], sizes = [1, 128], strides = [1, 1]} : vector<16x128xf32> to vector<1x128xf32>
    %118 = vector.extract_strided_slice %5 {offsets = [13, 0], sizes = [1, 128], strides = [1, 1]} : vector<16x128xf32> to vector<1x128xf32>
    %cst_33 = arith.constant dense<0.000000e+00> : vector<8xf32>
    %119 = vector.multi_reduction <add>, %116, %cst_33 [1] : vector<8x128xf32> to vector<8xf32>
    %120 = vector.shape_cast %119 : vector<8xf32> to vector<8x1xf32>
    %cst_34 = arith.constant 3.125000e-02 : f32
    %121 = vector.broadcast %cst_34 : f32 to vector<8x1xf32>
    %122 = arith.mulf %120, %121 : vector<8x1xf32>
    %123 = vector.broadcast %122 : vector<8x1xf32> to vector<8x128xf32>
    %124 = arith.subf %116, %123 : vector<8x128xf32>
    %cst_35 = arith.constant 0.000000e+00 : f32
    %125 = vector.shape_cast %8 : vector<1x128xi1> to vector<1x128xi1>
    %126 = vector.broadcast %125 : vector<1x128xi1> to vector<8x128xi1>
    %127 = vector.broadcast %cst_35 : f32 to vector<8x128xf32>
    %128 = arith.select %126, %124, %127 : vector<8x128xi1>, vector<8x128xf32>
    %129 = arith.mulf %128, %128 : vector<8x128xf32>
    %cst_36 = arith.constant dense<0.000000e+00> : vector<8xf32>
    %130 = vector.multi_reduction <add>, %129, %cst_36 [1] : vector<8x128xf32> to vector<8xf32>
    %131 = vector.shape_cast %130 : vector<8xf32> to vector<8x1xf32>
    %cst_37 = arith.constant 3.125000e-02 : f32
    %132 = vector.broadcast %cst_37 : f32 to vector<8x1xf32>
    %133 = arith.mulf %131, %132 : vector<8x1xf32>
    %cst_38 = arith.constant 9.99999974E-6 : f32
    %134 = vector.broadcast %cst_38 : f32 to vector<8x1xf32>
    %135 = arith.addf %133, %134 : vector<8x1xf32>
    %136 = math.rsqrt %135 : vector<8x1xf32>
    %137 = vector.broadcast %136 : vector<8x1xf32> to vector<8x128xf32>
    %138 = arith.mulf %128, %137 : vector<8x128xf32>
    %139 = vector.broadcast %117 : vector<1x128xf32> to vector<8x128xf32>
    %140 = arith.mulf %138, %139 : vector<8x128xf32>
    %141 = vector.broadcast %118 : vector<1x128xf32> to vector<8x128xf32>
    %142 = arith.addf %140, %141 : vector<8x128xf32>
    %c0_39 = arith.constant 0 : index
    %c1024 = arith.constant 1024 : index
    %143 = vector.load %arg4[%c0_39, %c1024] : memref<128x1280xf32, #tpu.memory_space<vmem>>, vector<128x128xf32>
    %cst_40 = arith.constant dense<0.000000e+00> : vector<8x128xf32>
    %144 = tpu.matmul %142, %143, %cst_40 {dimension_numbers = #tpu.dot_dimension_numbers<[1], [0], [0], [1], [0, 0, 1, 1], [], []>} : vector<8x128xf32>, vector<128x128xf32>, vector<8x128xf32> -> vector<8x128xf32>
    %145 = vector.extract_strided_slice %5 {offsets = [8, 0], sizes = [1, 128], strides = [1, 1]} : vector<16x128xf32> to vector<1x128xf32>
    %146 = vector.broadcast %145 : vector<1x128xf32> to vector<8x128xf32>
    %147 = arith.addf %144, %146 : vector<8x128xf32>
    %cst_41 = arith.constant 0.000000e+00 : f32
    %148 = vector.broadcast %cst_41 : f32 to vector<8x128xf32>
    %149 = arith.maximumf %147, %148 : vector<8x128xf32>
    %c0_42 = arith.constant 0 : index
    %c1152 = arith.constant 1152 : index
    %150 = vector.load %arg4[%c0_42, %c1152] : memref<128x1280xf32, #tpu.memory_space<vmem>>, vector<128x128xf32>
    %cst_43 = arith.constant dense<0.000000e+00> : vector<8x128xf32>
    %151 = tpu.matmul %149, %150, %cst_43 {dimension_numbers = #tpu.dot_dimension_numbers<[1], [0], [0], [1], [0, 0, 1, 1], [], []>} : vector<8x128xf32>, vector<128x128xf32>, vector<8x128xf32> -> vector<8x128xf32>
    %152 = vector.extract_strided_slice %5 {offsets = [9, 0], sizes = [1, 128], strides = [1, 1]} : vector<16x128xf32> to vector<1x128xf32>
    %153 = vector.broadcast %152 : vector<1x128xf32> to vector<8x128xf32>
    %154 = arith.addf %151, %153 : vector<8x128xf32>
    %155 = arith.addf %142, %154 : vector<8x128xf32>
    %156 = vector.extract_strided_slice %5 {offsets = [14, 0], sizes = [1, 128], strides = [1, 1]} : vector<16x128xf32> to vector<1x128xf32>
    %157 = vector.extract_strided_slice %5 {offsets = [15, 0], sizes = [1, 128], strides = [1, 1]} : vector<16x128xf32> to vector<1x128xf32>
    %cst_44 = arith.constant dense<0.000000e+00> : vector<8xf32>
    %158 = vector.multi_reduction <add>, %155, %cst_44 [1] : vector<8x128xf32> to vector<8xf32>
    %159 = vector.shape_cast %158 : vector<8xf32> to vector<8x1xf32>
    %cst_45 = arith.constant 3.125000e-02 : f32
    %160 = vector.broadcast %cst_45 : f32 to vector<8x1xf32>
    %161 = arith.mulf %159, %160 : vector<8x1xf32>
    %162 = vector.broadcast %161 : vector<8x1xf32> to vector<8x128xf32>
    %163 = arith.subf %155, %162 : vector<8x128xf32>
    %cst_46 = arith.constant 0.000000e+00 : f32
    %164 = vector.shape_cast %8 : vector<1x128xi1> to vector<1x128xi1>
    %165 = vector.broadcast %164 : vector<1x128xi1> to vector<8x128xi1>
    %166 = vector.broadcast %cst_46 : f32 to vector<8x128xf32>
    %167 = arith.select %165, %163, %166 : vector<8x128xi1>, vector<8x128xf32>
    %168 = arith.mulf %167, %167 : vector<8x128xf32>
    %cst_47 = arith.constant dense<0.000000e+00> : vector<8xf32>
    %169 = vector.multi_reduction <add>, %168, %cst_47 [1] : vector<8x128xf32> to vector<8xf32>
    %170 = vector.shape_cast %169 : vector<8xf32> to vector<8x1xf32>
    %cst_48 = arith.constant 3.125000e-02 : f32
    %171 = vector.broadcast %cst_48 : f32 to vector<8x1xf32>
    %172 = arith.mulf %170, %171 : vector<8x1xf32>
    %cst_49 = arith.constant 9.99999974E-6 : f32
    %173 = vector.broadcast %cst_49 : f32 to vector<8x1xf32>
    %174 = arith.addf %172, %173 : vector<8x1xf32>
    %175 = math.rsqrt %174 : vector<8x1xf32>
    %176 = vector.broadcast %175 : vector<8x1xf32> to vector<8x128xf32>
    %177 = arith.mulf %167, %176 : vector<8x128xf32>
    %178 = vector.broadcast %156 : vector<1x128xf32> to vector<8x128xf32>
    %179 = arith.mulf %177, %178 : vector<8x128xf32>
    %180 = vector.broadcast %157 : vector<1x128xf32> to vector<8x128xf32>
    %181 = arith.addf %179, %180 : vector<8x128xf32>
    %c0_50 = arith.constant 0 : index
    %c0_51 = arith.constant 0 : index
    %182 = vector.load %arg6[%c0_50, %c0_51] : memref<8x128xf32, #tpu.memory_space<vmem>>, vector<8x128xf32>
    tpu.vector_store %arg6[%c0_50, %c0_51], %181 {strides = array<i32>} : memref<8x128xf32, #tpu.memory_space<vmem>>, vector<8x128xf32>,
    return
  }
  func.func @transform_0(%arg0: i32) -> (i32, i32) {
    %c0_i32 = arith.constant 0 : i32
    %c0_i32_0 = arith.constant 0 : i32
    return %arg0, %c0_i32 : i32, i32
  }
  func.func @transform_1(%arg0: i32) -> (i32, i32) {
    %c0_i32 = arith.constant 0 : i32
    %c0_i32_0 = arith.constant 0 : i32
    return %arg0, %c0_i32 : i32, i32
  }
  func.func @transform_2(%arg0: i32) -> (i32, i32) {
    %c0_i32 = arith.constant 0 : i32
    %c0_i32_0 = arith.constant 0 : i32
    %c0_i32_1 = arith.constant 0 : i32
    return %c0_i32, %c0_i32_0 : i32, i32
  }
  func.func @transform_3(%arg0: i32) -> (i32, i32) {
    %c0_i32 = arith.constant 0 : i32
    %c0_i32_0 = arith.constant 0 : i32
    %c0_i32_1 = arith.constant 0 : i32
    return %c0_i32, %c0_i32_0 : i32, i32
  }
  func.func @transform_4(%arg0: i32) -> (i32, i32) {
    %c0_i32 = arith.constant 0 : i32
    %c0_i32_0 = arith.constant 0 : i32
    %c0_i32_1 = arith.constant 0 : i32
    return %c0_i32, %c0_i32_0 : i32, i32
  }
  func.func @transform_5(%arg0: i32) -> (i32, i32) {
    %c0_i32 = arith.constant 0 : i32
    %c0_i32_0 = arith.constant 0 : i32
    return %arg0, %c0_i32 : i32, i32
  }
}

</mosaic_0001>

<bundles_post_ra>
// kernel: tpu_custom_call.1
= control target key start
LH: loop header
LB: loop body
LE: loop exit
PB: predicated region body
PF: predicated region fallthrough
CT: control target
= control target key end

     0   :  { %s14204_s0 = inlined_call_operand.hbm [shape: f32[16,128], index: 0, kind: input, shape index: {}]   ;;  %s14205_s1 = inlined_call_operand.hbm [shape: f32[16,128], index: 1, kind: input, shape index: {}]   ;;  %s14206_s2 = inlined_call_operand.hbm [shape: f32[8,8], index: 2, kind: input, shape index: {}]   ;;  %s14207_s3 = inlined_call_operand.hbm [shape: f32[128,1280], index: 3, kind: input, shape index: {}]   ;;  %s14208_s4 = inlined_call_operand.hbm [shape: f32[16,128], index: 4, kind: input, shape index: {}]   ;;  %s14209_s5 = inlined_call_operand.hbm [shape: f32[16,128], index: 5, kind: output, shape index: {}]  }
   0x1   :  { %14218 = sst [smem:[#allocation17_spill]] %s14206_s2 }
   0x2   :  { %14219 = sst [smem:[#allocation18_spill]] %s14207_s3 }
   0x3   :  { %10 = vsyncpa [#allocation3], 0 }
   0x4   :  { %12 = vsyncpa [#allocation3 + $0x1], 0 }
   0x5   :  { %13 = vsyncpa [#allocation6], 0 }
   0x6   :  { %15 = vsyncpa [#allocation6 + $0x1], 0 }
   0x7   :  { %16 = vsyncpa [#allocation9], 0 }
   0x8   :  { %17 = vsyncpa [#allocation4], 0 }
   0x9   :  { %19 = vsyncpa [#allocation4 + $0x1], 0  ;;  %s12607_s18 = smov 0   ;;  %s12609_s19 = smov 0  }
   0xa   :  { %s12611_s20 = smov 0   ;;  %s12613_s21 = smov 0  }
   0xb LB: > { %s12628_s22 = sadd.s32 4294967295, %s12545_s21   ;;  %s10962_s23 = sadd.s32 4294967294, %s12545_s21   ;;  %s12545_s21 = sphi %s12613_s21, %s14245_s21   ;;  %s12541_s20 = sphi %s12611_s20, %s14244_s20   ;;  %s12537_s19 = sphi %s12609_s19, %s14243_s19   ;;  %s12533_s18 = sphi %s12607_s18, %s14242_s18  }
   0xc   : > { %p45_p0 = scmp.ne.s32.totalorder %s12537_s19, %s12533_s18  ;;  %p14210_p1 = scmp.eq.s32.totalorder %s12628_s22, 0 }
   0xd   : > { %p164_p3 = scmp.eq.s32.totalorder %s10962_s23, 1  ;;  %p10963_p5 = scmp.ge.s32.totalorder %s12545_s21, 1 }
   0xe   : > { %p12637_p4 = por %p14210_p1, %p45_p0  ;;  %p171_p7 = scmp.lt.s32.totalorder %s12545_s21, 3 }
   0xf   : > { %p12642_p6 = por %p164_p3, %p45_p0  ;;  %s12547_s27 = smov [#allocation7]  }
  0x10   : > { %s14220_s24 = scalar_select %p12637_p4, 1, 0 }
  0x11   : > { %s14221_s25 = scalar_select %p12642_p6, 1, 0 }
  0x12   : > { %p12647_p8 = pnand %p10963_p5, %p171_p7  ;;  %s184_s28 = sshll.u32 %s12547_s27, 4  ;;  %s185_s28 = int_to_ptr.vmem [resolvable:$true] %s184_s28 }
  0x13   : > { %s12548_s29 = smov [#allocation8]   ;;  %s12549_s7 = smov [#allocation10]  }
  0x14   : > { %s14222_s26 = scalar_select %p12647_p8, 1, 0 }
  0x15   : > { %p12097_p10 = pneg %p12647_p8  ;;  %s194_s30 = sshll.u32 %s12548_s29, 4  ;;  %s12660_s30 = int_to_ptr.vmem [resolvable:$true] %s194_s30 }
  0x16   : > { %s12662_s8 = sshll.u32 %s12549_s7, 4  ;;  %s14224_s2 = sld [smem:[#allocation17_spill]]  ;;  %s208_s8 = int_to_ptr.vmem [resolvable:$true] %s12662_s8 }
  0x17   : > { %p12656_p11 = pnand %p12097_p10, %p14210_p1 }
  0x19   : > { %p12672_p13 = pneg %p12656_p11 }
  0x1c   : > { %s12323_s11 = scalar_lea.hbm %s14224_s2, 128 }
  0x1d   : > { %p12324_p12 = scmp.ne.s32.totalorder %s14224_s2, %s12323_s11  ;;  %p12330_p5 = scmp.lt.u32.totalorder %s12323_s11, %s14224_s2 }
  0x1f   : > { %p12326_p0 = pnand %p12672_p13, %p12324_p12 }
  0x21   : > { %p12327_p3 = pneg %p12326_p0 }
  0x23   : > { %p12332_p7 = pnand %p12330_p5, %p12327_p3 }
  0x25   : > { %12335 = shalt.err (!%p12332_p7)
}
  0x26   : > { %s12336_s17 = scalar_lea.vmem %s185_s28, 128  ;;  %p12344_p2 = scmp.lt.s32.totalorder %s185_s28, %s185_s28 }
  0x27   : > { %p12337_p10 = scmp.ne.s32.totalorder %s185_s28, %s12336_s17  ;;  %p12345_p6 = scmp.lt.s32.totalorder %s12336_s17, %s12336_s17 }
  0x29   : > { %p12339_p9 = pnand %p12337_p10, %p12672_p13  ;;  %p12346_p4 = por %p12345_p6, %p12344_p2 }
  0x2b   : > { %p12340_p1 = pneg %p12339_p9 }
  0x2d   : > { %p12347_p8 = pnand %p12346_p4, %p12340_p1 }
  0x2f   : > { %12350 = shalt.err (!%p12347_p8)
}
  0x30   : > { %12100 = dma.hbm_to_vmem [thread:$0]  (!%p12656_p11), %s14224_s2, 128, %s185_s28, [#allocation6]  }
  0x31   : > { %s14226_s3 = sld [smem:[#allocation18_spill]] }
  0x37   : > { %s12351_s9 = scalar_lea.hbm %s14226_s3, 20480 }
  0x38   : > { %p12352_p9 = scmp.ne.s32.totalorder %s14226_s3, %s12351_s9  ;;  %p12358_p1 = scmp.lt.u32.totalorder %s12351_s9, %s14226_s3 }
  0x3a   : > { %p12354_p12 = pnand %p12352_p9, %p12672_p13 }
  0x3c   : > { %p12355_p2 = pneg %p12354_p12 }
  0x3e   : > { %p12360_p4 = pnand %p12358_p1, %p12355_p2 }
  0x40   : > { %12363 = shalt.err (!%p12360_p4)
}
  0x41   : > { %s12364_s28 = scalar_lea.vmem %s12660_s30, 20480  ;;  %p12372_p3 = scmp.lt.s32.totalorder %s12660_s30, %s12660_s30 }
  0x42   : > { %p12365_p6 = scmp.ne.s32.totalorder %s12660_s30, %s12364_s28  ;;  %p12373_p5 = scmp.lt.s32.totalorder %s12364_s28, %s12364_s28 }
  0x44   : > { %p12367_p8 = pnand %p12365_p6, %p12672_p13  ;;  %p12374_p7 = por %p12373_p5, %p12372_p3 }
  0x46   : > { %p12368_p0 = pneg %p12367_p8 }
  0x48   : > { %p12375_p10 = pnand %p12374_p7, %p12368_p0 }
  0x4a   : > { %12378 = shalt.err (!%p12375_p10)
}
  0x4b   : > { %s12550_s15 = smov 1280   ;;  %s12551_s16 = smov 80  }
  0x4c   : > { %12103 = dma.hbm_to_vmem [thread:$0]  (!%p12656_p11), %s14226_s3, 20480, %s12660_s30, [#allocation9], %s12550_s15, %s12550_s15, %s12551_s16  }
  0x4d   : > { %s12379_s7 = scalar_lea.hbm %s14208_s4, 256 }
  0x4e   : > { %p12380_p9 = scmp.ne.s32.totalorder %s14208_s4, %s12379_s7  ;;  %p12386_p1 = scmp.lt.u32.totalorder %s12379_s7, %s14208_s4 }
  0x50   : > { %p12382_p12 = pnand %p12380_p9, %p12672_p13 }
  0x52   : > { %p12383_p2 = pneg %p12382_p12 }
  0x54   : > { %p12388_p4 = pnand %p12386_p1, %p12383_p2 }
  0x56   : > { %12391 = shalt.err (!%p12388_p4)
}
  0x57   : > { %s12392_s13 = scalar_lea.vmem %s208_s8, 256  ;;  %p12400_p3 = scmp.lt.s32.totalorder %s208_s8, %s208_s8 }
  0x58   : > { %p12393_p6 = scmp.ne.s32.totalorder %s208_s8, %s12392_s13  ;;  %p12401_p5 = scmp.lt.s32.totalorder %s12392_s13, %s12392_s13 }
  0x5a   : > { %p12395_p8 = pnand %p12393_p6, %p12672_p13  ;;  %p12402_p7 = por %p12401_p5, %p12400_p3 }
  0x5c   : > { %p12396_p0 = pneg %p12395_p8 }
  0x5e   : > { %p12403_p10 = pnand %p12402_p7, %p12396_p0 }
  0x60   : > { %12406 = shalt.err (!%p12403_p10)
}
  0x61   : > { %s12552_s30 = smov 128   ;;  %s12553_s14 = smov 8  }
  0x62   : > { %12106 = dma.hbm_to_vmem [thread:$0]  (!%p12656_p11), %s14208_s4, 256, %s208_s8, [#allocation9], %s12552_s30, %s12552_s30, %s12553_s14  }
  0x63   : > { %s12731_s16 = sadd.s32 1, %s12545_s21   ;;  %s32_s23 = sadd.s32 1, %s12541_s20 }
  0x64   : > { %s29_s17 = ssub.s32 %s12545_s21, %s12731_s16  ;;  %p39_p9 = scmp.ne.s32.totalorder %s12541_s20, %s12537_s19 }
  0x65   : > { %p30_p13 = scmp.eq.s32.totalorder %s29_s17, 0  ;;  %p40_p12 = scmp.eq.s32.totalorder %s12545_s21, 0 }
  0x66   : > { %p12121_p2 = scmp.lt.s32.totalorder %s12545_s21, 2  ;;  %p14227_p4 = scmp.eq.s32.totalorder %s12628_s22, 1 }
  0x67   : > { %s12741_s27 = scalar_select %p30_p13, %s12541_s20, %s32_s23  }
  0x68   : > { %p41_p1 = por %p40_p12, %p39_p9  ;;  %p12745_p6 = por %p14227_p4, %p39_p9 }
  0x69   : > { %s221_s6 = sand.u32 1, %s12541_s20   ;;  %s10969_s7 = sshll.u32 %s12545_s21, 7 }
  0x6a   : > { %s14228_s29 = scalar_select %p12745_p6, 1, 0 }
  0x6b   : > { %s12751_s8 = sshll.u32 %s221_s6, 3  ;;  %s12756_s11 = scalar_lea.hbm %s14204_s0, %s10969_s7 }
  0x6c   : > { %s225_s12 = scalar_lea.vmem [#allocation2], %s12751_s8  ;;  %p12759_p11 = pnand %p12121_p2, %p41_p1 }
  0x6d   : > { %s232_s13 = sshll.u32 %s225_s12, 4  ;;  %s12768_s15 = scalar_lea.hbm %s14205_s1, %s10969_s7  ;;  %s12763_s13 = int_to_ptr.vmem [resolvable:$true] %s232_s13 }
  0x6e   : > { %s222_s17 = scalar_lea.sflag [#allocation3], %s221_s6  ;;  %s12407_s23 = scalar_lea.hbm %s12756_s11, 128 }
  0x6f   : > { %p12408_p8 = scmp.ne.s32.totalorder %s12756_s11, %s12407_s23  ;;  %p12409_p0 = pneg %p12759_p11 }
  0x70   : > { %s12412_s12 = scalar_lea.hbm %s14204_s0, 256  ;;  %p12413_p7 = scmp.lt.u32.totalorder %s12756_s11, %s14204_s0 }
  0x71   : > { %p12410_p3 = pnand %p12409_p0, %p12408_p8  ;;  %p12414_p10 = scmp.lt.u32.totalorder %s12412_s12, %s12407_s23 }
  0x72   : > { %p12416_p9 = scmp.lt.u32.totalorder %s12407_s23, %s12756_s11 }
  0x73   : > { %p12411_p5 = pneg %p12410_p3  ;;  %p12415_p13 = por %p12414_p10, %p12413_p7 }
  0x75   : > { %p12417_p12 = por %p12416_p9, %p12415_p13 }
  0x77   : > { %p12418_p2 = pnand %p12417_p12, %p12411_p5 }
  0x79   : > { %12421 = shalt.err (!%p12418_p2)
}
  0x7a   : > { %s12422_s6 = scalar_lea.vmem %s12763_s13, 128  ;;  %s12554_s7 = smov [#allocation2]  }
  0x7b   : > { %p12423_p1 = scmp.ne.s32.totalorder %s12763_s13, %s12422_s6  ;;  %s12427_s14 = sshll.u32 %s12554_s7, 4  ;;  %s12428_s14 = int_to_ptr.vmem [resolvable:$false] %s12427_s14 }
  0x7c   : > { %s12429_s2 = scalar_lea.vmem %s12428_s14, 256  ;;  %p12430_p3 = scmp.lt.s32.totalorder %s12763_s13, %s12428_s14 }
  0x7d   : > { %p12425_p4 = pnand %p12423_p1, %p12409_p0  ;;  %p12431_p7 = scmp.lt.s32.totalorder %s12429_s2, %s12422_s6 }
  0x7f   : > { %p12426_p8 = pneg %p12425_p4  ;;  %p12432_p10 = por %p12431_p7, %p12430_p3 }
  0x81   : > { %p12433_p13 = pnand %p12432_p10, %p12426_p8 }
  0x83   : > { %12436 = shalt.err (!%p12433_p13)
}
  0x84   : > { %12110 = dma.hbm_to_vmem [thread:$0]  (!%p12759_p11), %s12756_s11, 128, %s12763_s13, %s222_s17  }
  0x85   : > { %s239_s3 = sand.u32 1, %s12545_s21   ;;  %s243_s28 = scalar_lea.vmem [#allocation5], %s12751_s8 }
  0x86   : > { %s250_s23 = sshll.u32 %s243_s28, 4  ;;  %s240_s9 = scalar_lea.sflag [#allocation6], %s239_s3  ;;  %s251_s23 = int_to_ptr.vmem [resolvable:$true] %s250_s23 }
  0x87   : > { %s12437_s10 = scalar_lea.hbm %s12768_s15, 128  ;;  %s12442_s7 = scalar_lea.hbm %s14205_s1, 256 }
  0x88   : > { %p12438_p5 = scmp.ne.s32.totalorder %s12768_s15, %s12437_s10  ;;  %p12443_p2 = scmp.lt.u32.totalorder %s12768_s15, %s14205_s1 }
  0x89   : > { %p12444_p1 = scmp.lt.u32.totalorder %s12442_s7, %s12437_s10  ;;  %p12446_p8 = scmp.lt.u32.totalorder %s12437_s10, %s12768_s15 }
  0x8a   : > { %p12440_p9 = pnand %p12438_p5, %p12409_p0 }
  0x8b   : > { %p12445_p4 = por %p12444_p1, %p12443_p2 }
  0x8c   : > { %p12441_p12 = pneg %p12440_p9 }
  0x8d   : > { %p12447_p3 = por %p12446_p8, %p12445_p4 }
  0x8f   : > { %p12448_p7 = pnand %p12447_p3, %p12441_p12 }
  0x91   : > { %12451 = shalt.err (!%p12448_p7)
}
  0x92   : > { %s12452_s8 = scalar_lea.vmem %s251_s23, 128  ;;  %s12555_s11 = smov [#allocation5]  }
  0x93   : > { %p12453_p10 = scmp.ne.s32.totalorder %s251_s23, %s12452_s8  ;;  %s12457_s13 = sshll.u32 %s12555_s11, 4  ;;  %s12458_s13 = int_to_ptr.vmem [resolvable:$false] %s12457_s13 }
  0x94   : > { %s12459_s17 = scalar_lea.vmem %s12458_s13, 256  ;;  %p12460_p9 = scmp.lt.s32.totalorder %s251_s23, %s12458_s13 }
  0x95   : > { %p12455_p13 = pnand %p12453_p10, %p12409_p0  ;;  %p12461_p6 = scmp.lt.s32.totalorder %s12459_s17, %s12452_s8 }
  0x97   : > { %p12456_p5 = pneg %p12455_p13  ;;  %p12462_p1 = por %p12461_p6, %p12460_p9 }
  0x99   : > { %p12463_p2 = pnand %p12462_p1, %p12456_p5 }
  0x9b   : > { %12466 = shalt.err (!%p12463_p2)
}
  0x9c   : > { %12113 = dma.hbm_to_vmem [thread:$0]  (!%p12759_p11), %s12768_s15, 128, %s251_s23, %s240_s9  }
  0x9d   : > { %p14230_p12 = scmp.ne.s32.totalorder %s14222_s26, 0 }
  0x9e   : > { %s12819_s3 = sand.u32 (!%p14230_p12), 1, %s12537_s19   ;;  %p14231_p6 = scmp.ne.s32.totalorder (!%p14230_p12), %s14220_s24, 0 }
  0x9f   : > { %259 = sbr.rel (%p14230_p12) target bundleno = 5812 (0x16b4), region = 40  ;;  %s12822_s28 = sshll.u32 (!%p14230_p12), %s12819_s3, 3 }
  0xa0   : > { %s262_s10 = scalar_lea.sflag (!%p14230_p12), [#allocation3], %s12819_s3  ;;  %s14214_s12 = scalar_lea.vmem (!%p14230_p12), [#allocation2], %s12822_s28 }
  0xa6   : > { %12512 = dma.done.wait (%p14231_p6), %s262_s10, 128  }
  0xa7   : > { %12514 = vsyncadd (%p14231_p6), %s262_s10, 4294967168  ;;  %s270_s26 = sand.u32 1, %s12628_s22   ;;  %s274_s15 = scalar_lea.vmem [#allocation5], %s12822_s28 }
  0xa8   : > { %s271_s30 = scalar_lea.sflag [#allocation6], %s270_s26 }
  0xa9   : > { %12516 = dma.done.wait (%p14231_p6), %s271_s30, 128  }
  0xaa   : > { %12518 = vsyncadd (%p14231_p6), %s271_s30, 4294967168  ;;  %p14232_p11 = scmp.eq.s32.totalorder %s12628_s22, 0 }
  0xac   : > { %12520 = dma.done.wait (%p14232_p11), [#allocation6], 128   ;;  %p14233_p0 = pmov %p14232_p11 }
  0xae   : > { %12522 = vsyncadd (%p14233_p0), [#allocation6], 4294967168  ;;  %p14234_p4 = pmov %p14233_p0 }
  0xaf   : > { %p14235_p8 = pmov %p14233_p0 }
  0xb0   : > { %12524 = dma.done.wait (%p14234_p4), [#allocation9], 20736  }
  0xb1   : > { %12526 = vsyncadd (%p14235_p8), [#allocation9], 4294946560  ;;  %v12556_v0 = vmov 0.0   ;;  %v12557_v1 = vmov 0.0|0.0   ;;  %vm12558_vm0 = vmmov 0   ;;  %v327_v2 = vld [vmem:[#allocation8 + $0x8] sm:$0xff] }
  0xb2   : > { %438 = vmatprep.mubr.f32.mxu0 %v12556_v0  ;;  %11903 = vmatprep.subr.bf16.mxu1 %v12557_v1  ;;  %v330_v3 = vld [vmem:[#allocation8 + $0x58] sm:$0xff]  ;;  %v326_v4 = vld [vmem:[#allocation8] sm:$0xff]  ;;  %v329_v6 = vld [vmem:[#allocation8 + $0x50] sm:$0xff]  ;;  %s12559_s24 = smov 104   ;;  %s12560_s23 = smov 120   ;;  %vm1166_vm1 = vcmask 64512  }
  0xb3   : > { %11373 = vmatprep.mubr.msk.f32.mxu1 %vm12558_vm0, %v12556_v0  ;;  %v11871_v5 = vpack.c.bf16 %v330_v3, %v327_v2  ;;  %v333_v7 = vld [vmem:[#allocation8 + $0xa8] sm:$0xff]  ;;  %v336_v8 = vld [vmem:[#allocation8 + $0xf8] sm:$0xff]  ;;  %v11873_v9 = vpack.c.bf16 %v329_v6, %v326_v4  ;;  %v332_v11 = vld [vmem:[#allocation8 + $0xa0] sm:$0xff]  ;;  %s12561_s9 = smov 96   ;;  %s12562_s6 = smov 112   ;;  %vm5340_vm2 = vcmask 130048  }
  0xb4   : > { %v11875_v10 = vpack.c.bf16 %v336_v8, %v333_v7  ;;  %v335_v12 = vld [vmem:[#allocation8 + $0xf0] sm:$0xff]  ;;  %v339_v13 = vld [vmem:[#allocation8 + $0x148] sm:$0xff]  ;;  %v342_v14 = vld [vmem:[#allocation8 + $0x198] sm:$0xff]  ;;  %s12563_s7 = smov 80   ;;  %s12564_s14 = smov 88   ;;  %vm5342_vm3 = vcmask 195584  }
  0xb5   : > { %11872 = vmatprep.subr.bf16.mxu0 %v11871_v5  ;;  %v11877_v15 = vpack.c.bf16 %v335_v12, %v332_v11  ;;  %v11879_v16 = vpack.c.bf16 %v342_v14, %v339_v13  ;;  %v338_v17 = vld [vmem:[#allocation8 + $0x140] sm:$0xff]  ;;  %v341_v18 = vld [vmem:[#allocation8 + $0x190] sm:$0xff]  ;;  %v345_v19 = vld [vmem:[#allocation8 + $0x1e8] sm:$0xff]  ;;  %v323_v13 = vlaneseq  ;;  %s12565_s2 = smov 64   ;;  %s12566_s8 = smov 72   ;;  %vm5344_vm4 = vcmask 261120  }
  0xb6   : > { %11874 = vmatpush1.bf16.msra.mxu0 %v11873_v9  ;;  %v348_v20 = vld [vmem:[#allocation8 + $0x238] sm:$0xff]  ;;  %v11881_v21 = vpack.c.bf16 %v341_v18, %v338_v17  ;;  %v344_v23 = vld [vmem:[#allocation8 + $0x1e0] sm:$0xff]  ;;  %v347_v24 = vld [vmem:[#allocation8 + $0x230] sm:$0xff]  ;;  %s12567_s11 = smov 48   ;;  %s12568_s13 = smov 56   ;;  %vm5346_vm5 = vcmask 326656  }
  0xb7   : > { %11876 = vmatprep.subr.bf16.mxu0 %v11875_v10  ;;  %v11883_v22 = vpack.c.bf16 %v348_v20, %v345_v19  ;;  %v351_v25 = vld [vmem:[#allocation8 + $0x288] sm:$0xff]  ;;  %v354_v26 = vld [vmem:[#allocation8 + $0x2d8] sm:$0xff]  ;;  %v328_v27 = vld [vmem:[#allocation8 + $0x10] sm:$0xff]  ;;  %v11885_v30 = vpack.c.bf16 %v347_v24, %v344_v23  ;;  %v12864_v14 = vshrl.u32 %v323_v13, 7  ;;  %s12569_s17 = smov 24   ;;  %s12570_s10 = smov 40  }
  0xb8   : > { %v331_v28 = vld [vmem:[#allocation8 + $0x60] sm:$0xff]  ;;  %v334_v29 = vld [vmem:[#allocation8 + $0xb0] sm:$0xff]  ;;  %v11887_v33 = vpack.c.bf16 %v354_v26, %v351_v25  ;;  %v357_v36 = vld [vmem:[#allocation8 + $0x328] sm:$0xff]  ;;  %s12571_s26 = smov 16   ;;  %s12572_s30 = smov 32   ;;  %vm5348_vm6 = vcmask 392192  }
  0xb9   : > { %v11904_v31 = vpack.c.bf16 %v331_v28, %v328_v27  ;;  %v337_v32 = vld [vmem:[#allocation8 + $0x100] sm:$0xff]  ;;  %v353_v35 = vld [vmem:[#allocation8 + $0x2d0] sm:$0xff]  ;;  %v360_v37 = vld [vmem:[#allocation8 + $0x378] sm:$0xff]  ;;  %v517_v23 = vsub.s32 0, %v12864_v14  ;;  %v528_v27 = vsub.s32 2, %v12864_v14  ;;  %vm5350_vm7 = vcmask 457728  }
  0xba   : > { %11878 = vmatpush1.bf16.msra.mxu0 %v11877_v15  ;;  %v350_v34 = vld [vmem:[#allocation8 + $0x280] sm:$0xff]  ;;  %v11907_v38 = vpack.c.bf16 %v337_v32, %v334_v29  ;;  %v340_v39 = vld [vmem:[#allocation8 + $0x150] sm:$0xff]  ;;  %v11891_v42 = vpack.c.bf16 %v360_v37, %v357_v36  ;;  %v363_v45 = vld [vmem:[#allocation8 + $0x3c8] sm:$0xff]  ;;  %v523_v15 = vsub.s32 1, %v12864_v14  ;;  %vm5352_vm8 = vcmask 523264   ;;  %p14239_p7 = scmp.ne.s32.totalorder %s14228_s29, 0 }
  0xbb   : > { %11880 = vmatprep.subr.bf16.mxu0 %v11879_v16  ;;  %11905 = vmatpush3.bf16.msra.mxu1 %v11904_v31  ;;  %v343_v40 = vld [vmem:[#allocation8 + $0x1a0] sm:$0xff]  ;;  %v11889_v41 = vpack.c.bf16 %v353_v35, %v350_v34  ;;  %v359_v44 = vld [vmem:[#allocation8 + $0x370] sm:$0xff]  ;;  %v366_v46 = vld [vmem:[#allocation8 + $0x418] sm:$0xff]  ;;  %vm5354_vm9 = vcmask 588800   ;;  %vm5356_vm10 = vcmask 654336   ;;  %vm5358_vm11 = vcmask 719872  }
  0xbc   : > { %11906 = vmatprep.subr.bf16.mxu1 %v12557_v1  ;;  %v356_v43 = vld [vmem:[#allocation8 + $0x320] sm:$0xff]  ;;  %v11910_v47 = vpack.c.bf16 %v343_v40, %v340_v39  ;;  %v346_v48 = vld [vmem:[#allocation8 + $0x1f0] sm:$0xff]  ;;  %v11895_v51 = vpack.c.bf16 %v366_v46, %v363_v45  ;;  %v369_v54 = vld [vmem:[#allocation8 + $0x468] sm:$0xff]  ;;  %vm5360_vm12 = vcmask 785408   ;;  %vm5362_vm13 = vcmask 850944  }
  0xbd   : > { %v349_v49 = vld [vmem:[#allocation8 + $0x240] sm:$0xff]  ;;  %v11893_v50 = vpack.c.bf16 %v359_v44, %v356_v43  ;;  %v365_v53 = vld [vmem:[#allocation8 + $0x410] sm:$0xff]  ;;  %v372_v55 = vld [vmem:[#allocation8 + $0x4b8] sm:$0xff]  ;;  %vm5364_vm14 = vcmask 916480   ;;  %vm14217_vm15 = vcmask 982016  }
  0xbe   : > { %11882 = vmatpush1.bf16.msra.mxu0 %v11881_v21  ;;  %v362_v52 = vld [vmem:[#allocation8 + $0x3c0] sm:$0xff]  ;;  %v11913_v56 = vpack.c.bf16 %v349_v49, %v346_v48  ;;  %v352_v57 = vld [vmem:[#allocation8 + $0x290] sm:$0xff]  ;;  %v11899_v60 = vpack.c.bf16 %v372_v55, %v369_v54 }
  0xbf   : > { %11884 = vmatprep.subr.bf16.mxu0 %v11883_v22  ;;  %11908 = vmatpush3.bf16.msra.mxu1 %v11907_v38  ;;  %v355_v58 = vld [vmem:[#allocation8 + $0x2e0] sm:$0xff]  ;;  %v11897_v59 = vpack.c.bf16 %v365_v53, %v362_v52  ;;  %v371_v62 = vld [vmem:[#allocation8 + $0x4b0] sm:$0xff] }
  0xc0   : > { %11909 = vmatprep.subr.bf16.mxu1 %v12557_v1  ;;  %v368_v61 = vld [vmem:[#allocation8 + $0x460] sm:$0xff]  ;;  %v11916_v63 = vpack.c.bf16 %v355_v58, %v352_v57  ;;  %v358_v2 = vld [vmem:[#allocation8 + $0x330] sm:$0xff] }
  0xc1   : > { %v361_v3 = vld [vmem:[#allocation8 + $0x380] sm:$0xff]  ;;  %v11901_v4 = vpack.c.bf16 %v371_v62, %v368_v61  ;;  %v364_v6 = vld [vmem:[#allocation8 + $0x3d0] sm:$0xff] }
  0xc2   : > { %11886 = vmatpush1.bf16.msra.mxu0 %v11885_v30  ;;  %v11919_v5 = vpack.c.bf16 %v361_v3, %v358_v2  ;;  %v367_v7 = vld [vmem:[#allocation8 + $0x420] sm:$0xff]  ;;  %v370_v10 = vld [vmem:[#allocation8 + $0x470] sm:$0xff] }
  0xc3   : > { %11888 = vmatprep.subr.bf16.mxu0 %v11887_v33  ;;  %11911 = vmatpush3.bf16.msra.mxu1 %v11910_v47  ;;  %v318_v8 = vld [vmem:[%s14214_s12] sm:$0xff]  ;;  %v11922_v9 = vpack.c.bf16 %v367_v7, %v364_v6  ;;  %s14215_s12 = smov 8  }
  0xc4   : > { %11912 = vmatprep.subr.bf16.mxu1 %v12557_v1  ;;  %v373_v11 = vld [vmem:[#allocation8 + $0x4c0] sm:$0xff] }
  0xc5   : > { %v11925_v12 = vpack.c.bf16 %v373_v11, %v370_v10  ;;  %v321_v16 = vld [vmem:[#allocation10] sm:$0xff] }
  0xc6   : > { %11890 = vmatpush1.bf16.msra.mxu0 %v11889_v41  ;;  %v524_v17 = vrot.slane %v321_v16, %v523_v15  ;;  %v518_v24 = vrot.slane %v321_v16, %v517_v23  ;;  %v529_v28 = vrot.slane %v321_v16, %v528_v27 }
  0xc7   : > { %11892 = vmatprep.subr.bf16.mxu0 %v11891_v42  ;;  %11914 = vmatpush3.bf16.msra.mxu1 %v11913_v56 }
  0xc8   : > { %11915 = vmatprep.subr.bf16.mxu1 %v12557_v1 }
  0xca   : > { %11894 = vmatpush1.bf16.msra.mxu0 %v11893_v50 }
  0xcb   : > { %11896 = vmatprep.subr.bf16.mxu0 %v11895_v51  ;;  %11917 = vmatpush3.bf16.msra.mxu1 %v11916_v63 }
  0xcc   : > { %11918 = vmatprep.subr.bf16.mxu1 %v12557_v1 }
  0xce   : > { %11898 = vmatpush1.bf16.msra.mxu0 %v11897_v59 }
  0xcf   : > { %11900 = vmatprep.subr.bf16.mxu0 %v11899_v60  ;;  %11920 = vmatpush3.bf16.msra.mxu1 %v11919_v5 }
  0xd0   : > { %11921 = vmatprep.subr.bf16.mxu1 %v12557_v1 }
  0xd2   : > { %11902 = vmatpush1.bf16.msra.mxu0 %v11901_v4 }
  0xd3   : > { %11416 = vmatprep.subr.mxu0 %v12556_v0  ;;  %11923 = vmatpush3.bf16.msra.mxu1 %v11922_v9 }
  0xd4   : > { %11924 = vmatprep.subr.bf16.mxu1 %v12557_v1 }
  0xd5   : > { %439 = vmatmul.mubr.f32.vlgmr.msra.gmra.mrb[0].mxu0 %v318_v8 }
  0xd6   : > { %11418 = vmatprep.mubr.msk.f32.mxu0 %vm12558_vm0, %v12556_v0 }
  0xd7   : > { %11926 = vmatpush3.bf16.msra.mxu1 %v11925_v12 }
  0xd8   : > { %11376 = vmatprep.subr.mxu1 %v12556_v0 }
  0xda   : > { %11374 = vmatmul.mubr.f32.vlgmr.msra.gmra.mrb[0].mxu1 %v318_v8 }
  0xdb   : > { %11378 = vmatprep.mubr.msk.f32.mxu1 %vm12558_vm0, %v12556_v0 }
 0x1a8   : > { %v440_v18 = vpop.f32.mrb[0].mxu0 }
 0x1a9   : > { %v442_v19 = vpop.f32.mrb[1].mxu0  ;;  %v519_v25 = vadd.f32 %v518_v24, %v440_v18 }
 0x1aa   : > { %v525_v20 = vadd.f32 %v524_v17, %v442_v19 }
 0x1ab   : > { %v12886_v26 = vmul.f32 0.35355338, %v519_v25 }
 0x1ac   : > { %569 = vrot.lane.b32.xlu1 %v525_v20, %s12559_s24  ;;  %563 = vrot.lane.b32.xlu0 %v525_v20, %s12560_s23 }
 0x1ad   : > { %v511_v21 = vpop.f32.mrb[0].mxu1 }
 0x1ae   : > { %v11375_v22 = vpop.f32.mrb[1].mxu1  ;;  %v12912_v29 = vadd.f32 %v529_v28, %v511_v21 }
 0x1b0   : > { %572 = vrot.lane.b32.xlu1 %v525_v20, %s12561_s9  ;;  %566 = vrot.lane.b32.xlu0 %v525_v20, %s12562_s6 }
 0x1b4   : > { %578 = vrot.lane.b32.xlu1 %v525_v20, %s12563_s7  ;;  %575 = vrot.lane.b32.xlu0 %v525_v20, %s12564_s14 }
 0x1b8   : > { %584 = vrot.lane.b32.xlu1 %v525_v20, %s12565_s2  ;;  %581 = vrot.lane.b32.xlu0 %v525_v20, %s12566_s8 }
 0x1bc   : > { %590 = vrot.lane.b32.xlu1 %v525_v20, %s12567_s11  ;;  %587 = vrot.lane.b32.xlu0 %v525_v20, %s12568_s13 }
 0x1c0   : > { %599 = vrot.lane.b32.xlu1 %v525_v20, %s12569_s17  ;;  %593 = vrot.lane.b32.xlu0 %v525_v20, %s12570_s10 }
 0x1c4   : > { %602 = vrot.lane.b32.xlu1 %v525_v20, %s12571_s26  ;;  %596 = vrot.lane.b32.xlu0 %v525_v20, %s12572_s30 }
 0x1c8   : > { %532 = vrot.lane.b32.xlu1 %v12886_v26, %s12560_s23  ;;  %605 = vrot.lane.b32.xlu0 %v525_v20, %s14215_s12 }
 0x1cc   : > { %536 = vrot.lane.b32.xlu1 %v12886_v26, %s12559_s24 }
 0x1d0   : > { %540 = vrot.lane.b32.xlu1 %v12886_v26, %s12564_s14 }
 0x1d4   : > { %542 = vrot.lane.b32.xlu1 %v12886_v26, %s12563_s7 }
 0x1d8   : > { %546 = vrot.lane.b32.xlu1 %v12886_v26, %s12565_s2 }
 0x1dc   : > { %550 = vrot.lane.b32.xlu1 %v12886_v26, %s12567_s11 }
 0x1e0   : > { %552 = vrot.lane.b32.xlu1 %v12886_v26, %s12570_s10 }
 0x1e4   : > { %556 = vrot.lane.b32.xlu1 %v12886_v26, %s12569_s17 }
 0x1e6   : > { %654 = vxpose.xlu0.b32.start.end [1/1] (short) (narrow) %v525_v20, 8 }
 0x1e8   : > { %558 = vrot.lane.b32.xlu1 %v12886_v26, %s12571_s26 }
 0x1ec   : > { %560 = vrot.lane.b32.xlu1 %v12886_v26, %s14215_s12 }
 0x1f0   : > { %609 = vrot.lane.b32.xlu1 %v12912_v29, %s12560_s23 }
 0x1f4   : > { %615 = vrot.lane.b32.xlu1 %v12912_v29, %s12559_s24 }
 0x1f8   : > { %621 = vrot.lane.b32.xlu1 %v12912_v29, %s12564_s14 }
 0x1fc   : > { %627 = vrot.lane.b32.xlu1 %v12912_v29, %s12566_s8 }
 0x20f   : > { %534 = vrot.lane.b32.xlu0 %v12886_v26, %s12562_s6 }
 0x213   : > { %538 = vrot.lane.b32.xlu0 %v12886_v26, %s12561_s9 }
 0x217   : > { %544 = vrot.lane.b32.xlu0 %v12886_v26, %s12566_s8 }
 0x21b   : > { %548 = vrot.lane.b32.xlu0 %v12886_v26, %s12568_s13 }
 0x21e   : > { %v570_v30 = vpop.permute.xlu1 %569  ;;  %v564_v31 = vpop.permute.xlu0 %563 }
 0x21f   : > { %554 = vrot.lane.b32.xlu0 %v12886_v26, %s12572_s30 }
 0x222   : > { %v573_v32 = vpop.permute.xlu1 %572  ;;  %v567_v34 = vpop.permute.xlu0 %566 }
 0x225   : > { %686 = vxpose.xlu1.b32.start.end [1/1] (short) (narrow) %v564_v31, 8 }
 0x226   : > { %v579_v33 = vpop.permute.xlu1 %578  ;;  %v576_v40 = vpop.permute.xlu0 %575 }
 0x229   : > { %718 = vxpose.xlu1.b32.start.end [1/1] (short) (narrow) %v567_v34, 8 }
 0x22a   : > { %v585_v35 = vpop.permute.xlu1 %584  ;;  %v582_v43 = vpop.permute.xlu0 %581 }
 0x22d   : > { %782 = vxpose.xlu1.b32.start.end [1/1] (short) (narrow) %v573_v32, 8 }
 0x22e   : > { %v591_v36 = vpop.permute.xlu1 %590  ;;  %v588_v46 = vpop.permute.xlu0 %587 }
 0x231   : > { %846 = vxpose.xlu1.b32.start.end [1/1] (short) (narrow) %v579_v33, 8 }
 0x232   : > { %v600_v37 = vpop.permute.xlu1 %599  ;;  %v594_v48 = vpop.permute.xlu0 %593 }
 0x236   : > { %v603_v38 = vpop.permute.xlu1 %602  ;;  %v597_v51 = vpop.permute.xlu0 %596 }
 0x23a   : > { %v533_v39 = vpop.permute.xlu1 %532  ;;  %v12948_v54 = vpop.permute.xlu0 %605 }
 0x23d   : > { %750 = vxpose.xlu0.b32.start.end [1/1] (short) (narrow) %v570_v30, 8 }
 0x23e   : > { %v537_v41 = vpop.permute.xlu1 %536 }
 0x241   : > { %814 = vxpose.xlu0.b32.start.end [1/1] (short) (narrow) %v576_v40, 8 }
 0x242   : > { %v12932_v42 = vpop.permute.xlu1 %540 }
 0x245   : > { %878 = vxpose.xlu0.b32.start.end [1/1] (short) (narrow) %v582_v43, 8 }
 0x246   : > { %v12934_v44 = vpop.permute.xlu1 %542 }
 0x249   : > { %910 = vxpose.xlu0.b32.start.end [1/1] (short) (narrow) %v585_v35, 8 }
 0x24a   : > { %v12936_v45 = vpop.permute.xlu1 %546 }
 0x24d   : > { %942 = vxpose.xlu0.b32.start.end [1/1] (short) (narrow) %v588_v46, 8 }
 0x24e   : > { %v12938_v47 = vpop.permute.xlu1 %550 }
 0x251   : > { %974 = vxpose.xlu0.b32.start.end [1/1] (short) (narrow) %v591_v36, 8 }
 0x252   : > { %v12940_v49 = vpop.permute.xlu1 %552 }
 0x255   : > { %1006 = vxpose.xlu0.b32.start.end [1/1] (short) (narrow) %v594_v48, 8 }
 0x256   : > { %v12942_v50 = vpop.permute.xlu1 %556 }
 0x259   : > { %1038 = vxpose.xlu0.b32.start.end [1/1] (short) (narrow) %v597_v51, 8 }
 0x25a   : > { %v12944_v52 = vpop.permute.xlu1 %558 }
 0x25d   : > { %1070 = vxpose.xlu0.b32.start.end [1/1] (short) (narrow) %v600_v37, 8 }
 0x25e   : > { %v12946_v53 = vpop.permute.xlu1 %560 }
 0x261   : > { %1102 = vxpose.xlu0.b32.start.end [1/1] (short) (narrow) %v603_v38, 8 }
 0x262   : > { %v610_v55 = vpop.permute.xlu1 %609 }
 0x263   : > { %2527 = vxpose.xlu1.b32.start.end [1/1] (short) (narrow) %v610_v55, 8 }
 0x266   : > { %v670_v56 = vpop.trf.xlu0  ;;  %v12961_v57 = vpop.permute.xlu1 %615 }
 0x267   : > { %11377 = vmatpush3.msra.mxu1 %v670_v56 }
 0x268   : > { %11379 = vmatmul.mubr.msk.f32.vlgmr.msra.gmra.mrb[2].mxu1 %vm1166_vm1, %v12886_v26  ;;  %11381 = vmatprep.subr.mxu1 %v12556_v0  ;;  %v13039_v26 = vld [vmem:[#allocation7] sm:$0xff] }
 0x269   : > { %11383 = vmatprep.mubr.msk.f32.mxu1 %vm12558_vm0, %v12556_v0 }
 0x26a   : > { %v12963_v58 = vpop.permute.xlu1 %621 }
 0x26e   : > { %v12965_v60 = vpop.permute.xlu1 %627 }
 0x281   : > { %v535_v59 = vpop.permute.xlu0 %534 }
 0x285   : > { %v539_v62 = vpop.permute.xlu0 %538 }
 0x289   : > { %v545_v2 = vpop.permute.xlu0 %544 }
 0x28a   : > { %612 = vrot.lane.b32.xlu0 %v12912_v29, %s12562_s6 }
 0x28d   : > { %v549_v3 = vpop.permute.xlu0 %548 }
 0x28e   : > { %618 = vrot.lane.b32.xlu0 %v12912_v29, %s12561_s9 }
 0x291   : > { %v555_v4 = vpop.permute.xlu0 %554 }
 0x292   : > { %624 = vrot.lane.b32.xlu0 %v12912_v29, %s12563_s7 }
 0x2a5   : > { %v702_v61 = vpop.trf.xlu1 }
 0x2a6   : > { %11382 = vmatpush3.msra.mxu1 %v702_v61 }
 0x2a7   : > { %11384 = vmatmul.mubr.msk.f32.vlgmr.msra.gmra.mrb[4].mxu1 %vm1166_vm1, %v533_v39  ;;  %11386 = vmatprep.subr.mxu1 %v12556_v0 }
 0x2a8   : > { %11388 = vmatprep.mubr.msk.f32.mxu1 %vm12558_vm0, %v12556_v0 }
 0x2a9   : > { %v734_v63 = vpop.trf.xlu1 }
 0x2aa   : > { %11387 = vmatpush3.msra.mxu1 %v734_v63 }
 0x2ab   : > { %11389 = vmatmul.mubr.msk.f32.vlgmr.msra.gmra.mrb[6].mxu1 %vm1166_vm1, %v535_v59  ;;  %11391 = vmatprep.subr.mxu1 %v12556_v0 }
 0x2ac   : > { %11393 = vmatprep.mubr.msk.f32.mxu1 %vm12558_vm0, %v12556_v0 }
 0x2ad   : > { %v798_v6 = vpop.trf.xlu1 }
 0x2b0   : > { %2495 = vxpose.xlu0.b32.start.end [1/1] (short) (narrow) %v12912_v29, 8 }
 0x2b1   : > { %v862_v9 = vpop.trf.xlu1 }
 0x2bd   : > { %v766_v5 = vpop.trf.xlu0 }
 0x2be   : > { %11392 = vmatpush3.msra.mxu1 %v766_v5 }
 0x2bf   : > { %11394 = vmatmul.mubr.msk.f32.vlgmr.msra.gmra.mrb[8].mxu1 %vm1166_vm1, %v537_v41  ;;  %11396 = vmatprep.subr.mxu1 %v12556_v0 }
 0x2c0   : > { %11397 = vmatpush3.msra.mxu1 %v798_v6  ;;  %11398 = vmatprep.mubr.msk.f32.mxu1 %vm12558_vm0, %v12556_v0 }
 0x2c1   : > { %v830_v7 = vpop.trf.xlu0  ;;  %11401 = vmatprep.subr.mxu1 %v12556_v0 }
 0x2c3   : > { %11399 = vmatmul.mubr.msk.f32.vlgmr.msra.gmra.mrb[10].mxu1 %vm1166_vm1, %v539_v62 }
 0x2c4   : > { %11402 = vmatpush3.msra.mxu1 %v830_v7  ;;  %11403 = vmatprep.mubr.msk.f32.mxu1 %vm12558_vm0, %v12556_v0 }
 0x2c5   : > { %v894_v8 = vpop.trf.xlu0  ;;  %11406 = vmatprep.subr.mxu1 %v12556_v0 }
 0x2c7   : > { %11404 = vmatmul.mubr.msk.f32.vlgmr.msra.gmra.mrb[12].mxu1 %vm1166_vm1, %v12932_v42 }
 0x2c8   : > { %11407 = vmatpush3.msra.mxu1 %v862_v9  ;;  %11408 = vmatprep.mubr.msk.f32.mxu1 %vm12558_vm0, %v12556_v0 }
 0x2c9   : > { %v926_v10 = vpop.trf.xlu0  ;;  %11411 = vmatprep.subr.mxu1 %v12556_v0 }
 0x2ca   : > { %11417 = vmatpush3.msra.mxu0 %v926_v10 }
 0x2cb   : > { %11409 = vmatmul.mubr.msk.f32.vlgmr.msra.gmra.mrb[14].mxu1 %vm1166_vm1, %v12934_v44  ;;  %11419 = vmatmul.mubr.msk.f32.vlgmr.msra.gmra.mrb[2].mxu0 %vm1166_vm1, %v12936_v45 }
 0x2cc   : > { %11412 = vmatpush3.msra.mxu1 %v894_v8  ;;  %11413 = vmatprep.mubr.msk.f32.mxu1 %vm12558_vm0, %v12556_v0 }
 0x2cd   : > { %v958_v11 = vpop.trf.xlu0  ;;  %11421 = vmatprep.subr.mxu1 %v12556_v0  ;;  %11426 = vmatprep.subr.mxu0 %v12556_v0 }
 0x2ce   : > { %11428 = vmatprep.mubr.msk.f32.mxu0 %vm12558_vm0, %v12556_v0 }
 0x2cf   : > { %11414 = vmatmul.mubr.msk.f32.vlgmr.msra.gmra.mrb[16].mxu1 %vm1166_vm1, %v545_v2 }
 0x2d0   : > { %11422 = vmatpush3.msra.mxu1 %v958_v11  ;;  %11423 = vmatprep.mubr.msk.f32.mxu1 %vm12558_vm0, %v12556_v0 }
 0x2d1   : > { %v990_v12 = vpop.trf.xlu0  ;;  %11431 = vmatprep.subr.mxu1 %v12556_v0 }
 0x2d2   : > { %11427 = vmatpush3.msra.mxu0 %v990_v12 }
 0x2d3   : > { %11424 = vmatmul.mubr.msk.f32.vlgmr.msra.gmra.mrb[18].mxu1 %vm1166_vm1, %v549_v3  ;;  %11429 = vmatmul.mubr.msk.f32.vlgmr.msra.gmra.mrb[4].mxu0 %vm1166_vm1, %v12938_v47 }
 0x2d4   : > { %11433 = vmatprep.mubr.msk.f32.mxu1 %vm12558_vm0, %v12556_v0  ;;  %11436 = vmatprep.subr.mxu0 %v12556_v0 }
 0x2d5   : > { %v1022_v16 = vpop.trf.xlu0  ;;  %11438 = vmatprep.mubr.msk.f32.mxu0 %vm12558_vm0, %v12556_v0 }
 0x2d6   : > { %11432 = vmatpush3.msra.mxu1 %v1022_v16 }
 0x2d7   : > { %11434 = vmatmul.mubr.msk.f32.vlgmr.msra.gmra.mrb[20].mxu1 %vm1166_vm1, %v12940_v49  ;;  %11441 = vmatprep.subr.mxu1 %v12556_v0 }
 0x2d8   : > { %11443 = vmatprep.mubr.msk.f32.mxu1 %vm12558_vm0, %v12556_v0 }
 0x2d9   : > { %v1054_v17 = vpop.trf.xlu0 }
 0x2da   : > { %11437 = vmatpush3.msra.mxu0 %v1054_v17 }
 0x2db   : > { %11439 = vmatmul.mubr.msk.f32.vlgmr.msra.gmra.mrb[6].mxu0 %vm1166_vm1, %v555_v4  ;;  %11446 = vmatprep.subr.mxu0 %v12556_v0 }
 0x2dc   : > { %11448 = vmatprep.mubr.msk.f32.mxu0 %vm12558_vm0, %v12556_v0 }
 0x2dd   : > { %v1086_v18 = vpop.trf.xlu0 }
 0x2de   : > { %11442 = vmatpush3.msra.mxu1 %v1086_v18 }
 0x2df   : > { %11444 = vmatmul.mubr.msk.f32.vlgmr.msra.gmra.mrb[22].mxu1 %vm1166_vm1, %v12942_v50  ;;  %11451 = vmatprep.subr.mxu1 %v12556_v0 }
 0x2e0   : > { %11453 = vmatprep.mubr.msk.f32.mxu1 %vm12558_vm0, %v12556_v0 }
 0x2e1   : > { %v1118_v19 = vpop.trf.xlu0 }
 0x2e2   : > { %11447 = vmatpush3.msra.mxu0 %v1118_v19 }
 0x2e3   : > { %11449 = vmatmul.mubr.msk.f32.vlgmr.msra.gmra.mrb[8].mxu0 %vm1166_vm1, %v12944_v52  ;;  %11456 = vmatprep.subr.mxu0 %v12556_v0  ;;  %v13049_v34 = vpop.trf.xlu1 }
 0x2e4   : > { %11458 = vmatprep.mubr.msk.f32.mxu0 %vm12558_vm0, %v12556_v0 }
 0x2fc   : > { %v613_v20 = vpop.permute.xlu0 %612 }
 0x2fd   : > { %2559 = vxpose.xlu0.b32.start.end [1/1] (short) (narrow) %v613_v20, 8 }
 0x300   : > { %v619_v21 = vpop.permute.xlu0 %618 }
 0x301   : > { %2591 = vxpose.xlu0.b32.start.end [1/1] (short) (narrow) %v12961_v57, 8  ;;  %2623 = vxpose.xlu1.b32.start.end [1/1] (short) (narrow) %v619_v21, 8 }
 0x304   : > { %v625_v22 = vpop.permute.xlu0 %624 }
 0x305   : > { %2655 = vxpose.xlu0.b32.start.end [1/1] (short) (narrow) %v12963_v58, 8  ;;  %2687 = vxpose.xlu1.b32.start.end [1/1] (short) (narrow) %v625_v22, 8 }
 0x309   : > { %2719 = vxpose.xlu0.b32.start.end [1/1] (short) (narrow) %v12965_v60, 8  ;;  %1134 = vxpose.xlu1.b32.start.end [1/1] (short) (narrow) %v12948_v54, 8 }
 0x332   : > { %630 = vrot.lane.b32.xlu0 %v12912_v29, %s12565_s2 }
 0x336   : > { %636 = vrot.lane.b32.xlu0 %v12912_v29, %s12567_s11 }
 0x33b   : > { %v1235_v24 = vpop.f32.mrb[2].mxu1 }
 0x33c   : > { %v11380_v25 = vpop.f32.mrb[3].mxu1  ;;  %v13042_v28 = vadd.f32 %v1235_v24, %v13039_v26 }
 0x33e   : > { %v2319_v30 = vsel %vm1166_vm1, %v13042_v28, -inf }
 0x355   : > { %2320 = vmax.xlane.f32.xlu0 %v2319_v30 }
 0x37a   : > { %v1307_v31 = vpop.f32.mrb[4].mxu1 }
 0x37b   : > { %v13047_v32 = vadd.f32 %v1307_v31, %v13039_v26  ;;  %v11385_v33 = vpop.f32.mrb[5].mxu1 }
 0x37d   : > { %v2322_v35 = vsel %vm1166_vm1, %v13047_v32, -inf }
 0x37e   : > { %v1379_v36 = vpop.f32.mrb[6].mxu1  ;;  %2323 = vmax.xlane.f32.xlu1 %v2322_v35 }
 0x37f   : > { %v11390_v37 = vpop.f32.mrb[7].mxu1  ;;  %v13076_v56 = vadd.f32 %v1379_v36, %v13039_v26 }
 0x381   : > { %v13053_v38 = vpop.trf.xlu1  ;;  %v2325_v62 = vsel %vm1166_vm1, %v13076_v56, -inf }
 0x385   : > { %v13055_v39 = vpop.trf.xlu1 }
 0x389   : > { %v1150_v40 = vpop.trf.xlu1 }
 0x38a   : > { %11452 = vmatpush3.msra.mxu1 %v1150_v40 }
 0x38b   : > { %11454 = vmatmul.mubr.msk.f32.vlgmr.msra.gmra.mrb[24].mxu1 %vm1166_vm1, %v12946_v53  ;;  %11461 = vmatprep.subr.mxu1 %v12556_v0 }
 0x38c   : > { %11463 = vmatprep.mubr.msk.f32.mxu1 %vm12558_vm0, %v12556_v0 }
 0x392   : > { %v1451_v41 = vpop.f32.mrb[8].mxu1 }
 0x393   : > { %v13063_v42 = vadd.f32 %v1451_v41, %v13039_v26  ;;  %v11395_v43 = vpop.f32.mrb[9].mxu1  ;;  %v13121_v41 = vpop.trf.xlu0 }
 0x395   : > { %v2328_v44 = vsel %vm1166_vm1, %v13063_v42, -inf }
 0x396   : > { %v1523_v45 = vpop.f32.mrb[10].mxu1  ;;  %2329 = vmax.xlane.f32.xlu0 %v2328_v44 }
 0x397   : > { %v11400_v46 = vpop.f32.mrb[11].mxu1  ;;  %v1524_v19 = vadd.f32 %v1523_v45, %v13039_v26  ;;  %v13123_v43 = vpop.trf.xlu0 }
 0x399   : > { %v2331_v30 = vsel %vm1166_vm1, %v1524_v19, -inf }
 0x39a   : > { %v1595_v47 = vpop.f32.mrb[12].mxu1 }
 0x39b   : > { %v13068_v48 = vadd.f32 %v1595_v47, %v13039_v26  ;;  %v11405_v49 = vpop.f32.mrb[13].mxu1  ;;  %v13125_v44 = vpop.trf.xlu0 }
 0x39d   : > { %v2334_v50 = vsel %vm1166_vm1, %v13068_v48, -inf }
 0x39e   : > { %v1667_v51 = vpop.f32.mrb[14].mxu1  ;;  %v1811_v52 = vpop.f32.mrb[2].mxu0  ;;  %2335 = vmax.xlane.f32.xlu0 %v2334_v50 }
 0x39f   : > { %v13073_v53 = vadd.f32 %v1811_v52, %v13039_v26  ;;  %v11410_v54 = vpop.f32.mrb[15].mxu1  ;;  %v11420_v55 = vpop.f32.mrb[3].mxu0  ;;  %v13116_v36 = vadd.f32 %v1667_v51, %v13039_v26 }
 0x3a0   : > { %v13127_v45 = vpop.trf.xlu0 }
 0x3a1   : > { %v2343_v57 = vsel %vm1166_vm1, %v13073_v53, -inf  ;;  %v2337_v40 = vsel %vm1166_vm1, %v13116_v36, -inf }
 0x3a2   : > { %v1739_v58 = vpop.f32.mrb[16].mxu1  ;;  %2344 = vmax.xlane.f32.xlu1 %v2343_v57 }
 0x3a3   : > { %v13081_v59 = vadd.f32 %v1739_v58, %v13039_v26  ;;  %v11415_v60 = vpop.f32.mrb[17].mxu1 }
 0x3a4   : > { %v13129_v46 = vpop.trf.xlu0 }
 0x3a5   : > { %v2340_v61 = vsel %vm1166_vm1, %v13081_v59, -inf }
 0x3a6   : > { %v1883_v63 = vpop.f32.mrb[18].mxu1  ;;  %v1955_v2 = vpop.f32.mrb[4].mxu0  ;;  %2341 = vmax.xlane.f32.xlu0 %v2340_v61  ;;  %2326 = vmax.xlane.f32.xlu1 %v2325_v62 }
 0x3a7   : > { %v13088_v3 = vadd.f32 %v1883_v63, %v13039_v26  ;;  %v13091_v4 = vadd.f32 %v1955_v2, %v13039_v26  ;;  %v11425_v5 = vpop.f32.mrb[19].mxu1  ;;  %v11430_v6 = vpop.f32.mrb[5].mxu0 }
 0x3a8   : > { %v631_v47 = vpop.permute.xlu0 %630 }
 0x3a9   : > { %v2346_v7 = vsel %vm1166_vm1, %v13088_v3, -inf  ;;  %v2349_v8 = vsel %vm1166_vm1, %v13091_v4, -inf }
 0x3aa   : > { %v2027_v9 = vpop.f32.mrb[20].mxu1  ;;  %2347 = vmax.xlane.f32.xlu0 %v2346_v7  ;;  %2350 = vmax.xlane.f32.xlu1 %v2349_v8 }
 0x3ab   : > { %v13098_v10 = vadd.f32 %v2027_v9, %v13039_v26  ;;  %v11435_v11 = vpop.f32.mrb[21].mxu1 }
 0x3ac   : > { %v637_v49 = vpop.permute.xlu0 %636 }
 0x3ad   : > { %v2352_v12 = vsel %vm1166_vm1, %v13098_v10, -inf }
 0x3ae   : > { %v2099_v16 = vpop.f32.mrb[6].mxu0  ;;  %2353 = vmax.xlane.f32.xlu0 %v2352_v12 }
 0x3af   : > { %v13103_v17 = vadd.f32 %v2099_v16, %v13039_v26  ;;  %v11440_v18 = vpop.f32.mrb[7].mxu0 }
 0x3b1   : > { %v2355_v20 = vsel %vm1166_vm1, %v13103_v17, -inf }
 0x3b2   : > { %v2171_v21 = vpop.f32.mrb[22].mxu1  ;;  %2356 = vmax.xlane.f32.xlu1 %v2355_v20 }
 0x3b3   : > { %v13109_v22 = vadd.f32 %v2171_v21, %v13039_v26  ;;  %v11445_v24 = vpop.f32.mrb[23].mxu1 }
 0x3b5   : > { %v2358_v25 = vsel %vm1166_vm1, %v13109_v22, -inf }
 0x3b6   : > { %v2243_v31 = vpop.f32.mrb[8].mxu0  ;;  %2359 = vmax.xlane.f32.xlu0 %v2358_v25  ;;  %2332 = vmax.xlane.f32.xlu1 %v2331_v30 }
 0x3b7   : > { %v2244_v33 = vadd.f32 %v2243_v31, %v13039_v26  ;;  %v11450_v35 = vpop.f32.mrb[9].mxu0 }
 0x3b9   : > { %v2361_v37 = vsel %vm1166_vm1, %v2244_v33, -inf }
 0x3ba   : > { %2362 = vmax.xlane.f32.xlu1 %v2361_v37 }
 0x3be   : > { %2338 = vmax.xlane.f32.xlu1 %v2337_v40 }
 0x3e2   : > { %v2321_v50 = vpop.xlane.xlu0 %2320 }
 0x3e3   : > { %v2367_v51 = vsub.f32 %v13042_v28, %v2321_v50 }
 0x3e5   : > { %v2383_v52 = vmul.f32 1.442695, %v2367_v51 }
 0x3e7   : > { %12185 = vpow2.f32 %v2383_v52 }
 0x3f1   : > { %2751 = vxpose.xlu1.b32.start.end [1/1] (short) (narrow) %v631_v47, 8  ;;  %v13134_v55 = vpop.eup %12185 }
 0x3f2   : > { %v2415_v58 = vsel %vm1166_vm1, %v13134_v55, 0.0 }
 0x40b   : > { %v2324_v54 = vpop.xlane.xlu1 %2323 }
 0x40f   : > { %633 = vrot.lane.b32.xlu1 %v12912_v29, %s12568_s13 }
 0x423   : > { %v2330_v20 = vpop.xlane.xlu0 %2329 }
 0x424   : > { %v2370_v24 = vsub.f32 %v13063_v42, %v2330_v20 }
 0x426   : > { %v2389_v30 = vmul.f32 1.442695, %v2370_v24 }
 0x42f   : > { %v13136_v57 = vpop.xlane.xlu1 %2344 }
 0x433   : > { %v2327_v60 = vpop.xlane.xlu1 %2326  ;;  %2416 = vadd.xlane.f32.xlu1 %v2415_v58 }
 0x434   : > { %v2369_v61 = vsub.f32 %v13076_v56, %v2327_v60 }
 0x436   : > { %v2387_v62 = vmul.f32 1.442695, %v2369_v61 }
 0x437   : > { %v13141_v63 = vpop.xlane.xlu1 %2350 }
 0x438   : > { %12187 = vpow2.f32 %v2387_v62 }
 0x43f   : > { %v13143_v2 = vpop.xlane.xlu1 %2356 }
 0x442   : > { %v13145_v28 = vpop.eup %12187 }
 0x443   : > { %v2333_v5 = vpop.xlane.xlu1 %2332  ;;  %v2421_v6 = vsel %vm1166_vm1, %v13145_v28, 0.0 }
 0x444   : > { %v2371_v7 = vsub.f32 %v1524_v19, %v2333_v5  ;;  %2422 = vadd.xlane.f32.xlu1 %v2421_v6  ;;  %v2368_v19 = vsub.f32 %v13047_v32, %v2324_v54 }
 0x446   : > { %v2391_v8 = vmul.f32 1.442695, %v2371_v7  ;;  %v2385_v21 = vmul.f32 1.442695, %v2368_v19 }
 0x447   : > { %v2363_v25 = vpop.xlane.xlu1 %2362 }
 0x448   : > { %12189 = vpow2.f32 %v2391_v8  ;;  %v2381_v31 = vsub.f32 %v2244_v33, %v2363_v25 }
 0x449   : > { %12191 = vpow2.f32 %v2385_v21 }
 0x44a   : > { %12193 = vpow2.f32 %v2389_v30  ;;  %v2411_v40 = vmul.f32 1.442695, %v2381_v31 }
 0x44b   : > { %v2339_v32 = vpop.xlane.xlu1 %2338 }
 0x44c   : > { %12195 = vpow2.f32 %v2411_v40  ;;  %v2373_v42 = vsub.f32 %v13116_v36, %v2339_v32 }
 0x44e   : > { %v2395_v60 = vmul.f32 1.442695, %v2373_v42 }
 0x452   : > { %v13149_v9 = vpop.eup %12189 }
 0x453   : > { %v2427_v56 = vsel %vm1166_vm1, %v13149_v9, 0.0 }
 0x454   : > { %2428 = vadd.xlane.f32.xlu1 %v2427_v56 }
 0x45e   : > { %v2315_v11 = vpop.f32.mrb[24].mxu1 }
 0x45f   : > { %v13154_v12 = vadd.f32 %v2315_v11, %v13039_v26  ;;  %v11455_v16 = vpop.f32.mrb[25].mxu1  ;;  %v2336_v26 = vpop.xlane.xlu0 %2335 }
 0x460   : > { %v2372_v37 = vsub.f32 %v13068_v48, %v2336_v26 }
 0x461   : > { %v2364_v18 = vsel %vm1166_vm1, %v13154_v12, -inf }
 0x462   : > { %2365 = vmax.xlane.f32.xlu0 %v2364_v18  ;;  %v2393_v50 = vmul.f32 1.442695, %v2372_v37 }
 0x463   : > { %v2342_v35 = vpop.xlane.xlu0 %2341 }
 0x464   : > { %v2374_v51 = vsub.f32 %v13081_v59, %v2342_v35  ;;  %12197 = vpow2.f32 %v2393_v50 }
 0x466   : > { %v2397_v52 = vmul.f32 1.442695, %v2374_v51 }
 0x467   : > { %v2348_v47 = vpop.xlane.xlu0 %2347 }
 0x468   : > { %v2376_v54 = vsub.f32 %v13088_v3, %v2348_v47  ;;  %12199 = vpow2.f32 %v2397_v52  ;;  %v2375_v47 = vsub.f32 %v13073_v53, %v13136_v57 }
 0x469   : > { %12201 = vpow2.f32 %v2395_v60 }
 0x46a   : > { %v2401_v59 = vmul.f32 1.442695, %v2376_v54  ;;  %v2399_v50 = vmul.f32 1.442695, %v2375_v47 }
 0x46b   : > { %v2354_v33 = vpop.xlane.xlu0 %2353 }
 0x46c   : > { %v2378_v61 = vsub.f32 %v13098_v10, %v2354_v33  ;;  %12203 = vpow2.f32 %v2401_v59 }
 0x46e   : > { %v2405_v3 = vmul.f32 1.442695, %v2378_v61 }
 0x46f   : > { %v2360_v62 = vpop.xlane.xlu0 %2359 }
 0x470   : > { %v2380_v6 = vsub.f32 %v13109_v22, %v2360_v62  ;;  %12205 = vpow2.f32 %v2405_v3 }
 0x471   : > { %v13204_v25 = vpop.trf.xlu1 }
 0x472   : > { %v2409_v10 = vmul.f32 1.442695, %v2380_v6  ;;  %v2379_v6 = vsub.f32 %v13103_v17, %v13143_v2 }
 0x474   : > { %12207 = vpow2.f32 %v2409_v10 }
 0x478   : > { %642 = vrot.lane.b32.xlu0 %v12912_v29, %s12572_s30 }
 0x47c   : > { %648 = vrot.lane.b32.xlu0 %v12912_v29, %s12571_s26 }
 0x481   : > { %v634_v31 = vpop.permute.xlu1 %633 }
 0x487   : > { %2815 = vxpose.xlu1.b32.start.end [1/1] (short) (narrow) %v637_v49, 8  ;;  %v13166_v49 = vpop.eup %12191 }
 0x488   : > { %v2418_v58 = vsel %vm1166_vm1, %v13166_v49, 0.0  ;;  %v13172_v48 = vpop.eup %12193 }
 0x489   : > { %v2424_v36 = vsel %vm1166_vm1, %v13172_v48, 0.0  ;;  %v13177_v5 = vpop.eup %12195 }
 0x48a   : > { %v2457_v7 = vsel %vm1166_vm1, %v13177_v5, 0.0  ;;  %v13182_v8 = vpop.eup %12197 }
 0x48b   : > { %v2430_v56 = vsel %vm1166_vm1, %v13182_v8, 0.0  ;;  %v13186_v11 = vpop.eup %12199 }
 0x48c   : > { %v13188_v16 = vpop.eup %12201  ;;  %v2436_v22 = vsel %vm1166_vm1, %v13186_v11, 0.0 }
 0x48d   : > { %v13192_v18 = vpop.eup %12203  ;;  %v2433_v19 = vsel %vm1166_vm1, %v13188_v16, 0.0 }
 0x48e   : > { %v2442_v20 = vsel %vm1166_vm1, %v13192_v18, 0.0  ;;  %v13198_v21 = vpop.eup %12205 }
 0x48f   : > { %v2448_v24 = vsel %vm1166_vm1, %v13198_v21, 0.0  ;;  %v13202_v26 = vpop.eup %12207 }
 0x490   : > { %v2454_v30 = vsel %vm1166_vm1, %v13202_v26, 0.0 }
 0x49b   : > { %2419 = vadd.xlane.f32.xlu0 %v2418_v58 }
 0x49f   : > { %2425 = vadd.xlane.f32.xlu0 %v2424_v36 }
 0x4a3   : > { %2458 = vadd.xlane.f32.xlu0 %v2457_v7 }
 0x4a7   : > { %2431 = vadd.xlane.f32.xlu0 %v2430_v56 }
 0x4ab   : > { %2437 = vadd.xlane.f32.xlu0 %v2436_v22 }
 0x4ae   : > { %2434 = vadd.xlane.f32.xlu1 %v2433_v19 }
 0x4af   : > { %2443 = vadd.xlane.f32.xlu0 %v2442_v20 }
 0x4b3   : > { %2449 = vadd.xlane.f32.xlu0 %v2448_v24 }
 0x4b7   : > { %2455 = vadd.xlane.f32.xlu0 %v2454_v30 }
 0x4bf   : > { %639 = vrot.lane.b32.xlu1 %v12912_v29, %s12570_s10 }
 0x4c0   : > { %v2417_v35 = vpop.xlane.xlu1 %2416 }
 0x4c1   : > { %12209 = vrcp.f32 %v2417_v35 }
 0x4cb   : > { %v12210_v37 = vpop.eup %12209 }
 0x4cc   : > { %v2479_v40 = vmul.f32 %v12210_v37, %v13134_v55 }
 0x4ce   : > { %11457 = vmatpush3.xpose.msk.msra.mxu0 %vm1166_vm1, %v2479_v40 }
 0x4cf   : > { %11466 = vmatprep.subr.mxu0 %v12556_v0 }
 0x4d1   : > { %11459 = vmatmul.mubr.msk.f32.vlgmr.msra.gmra.mrb[10].mxu0 %vm1166_vm1, %v13121_v41  ;;  %v2423_v51 = vpop.xlane.xlu1 %2422 }
 0x4d2   : > { %12211 = vrcp.f32 %v2423_v51  ;;  %11468 = vmatprep.mubr.msk.f32.mxu0 %vm12558_vm0, %v12556_v0 }
 0x4d3   : > { %12213 = vpow2.f32 %v2399_v50 }
 0x4dc   : > { %v12212_v32 = vpop.eup %12211 }
 0x4dd   : > { %v2481_v55 = vmul.f32 %v12212_v32, %v13145_v28  ;;  %v13220_v42 = vpop.eup %12213 }
 0x4de   : > { %v2439_v41 = vsel %vm1166_vm1, %v13220_v42, 0.0 }
 0x4df   : > { %11467 = vmatpush3.xpose.msk.msra.mxu0 %vm1166_vm1, %v2481_v55 }
 0x4e0   : > { %11476 = vmatprep.subr.mxu0 %v12556_v0 }
 0x4e1   : > { %v2429_v53 = vpop.xlane.xlu1 %2428 }
 0x4e2   : > { %12215 = vrcp.f32 %v2429_v53  ;;  %11469 = vmatmul.mubr.msk.f32.vlgmr.msra.gmra.mrb[12].mxu0 %vm1166_vm1, %v13123_v43  ;;  %v2377_v43 = vsub.f32 %v13091_v4, %v13141_v63 }
 0x4e3   : > { %2440 = vadd.xlane.f32.xlu1 %v2439_v41  ;;  %11478 = vmatprep.mubr.msk.f32.mxu0 %vm12558_vm0, %v12556_v0 }
 0x4e4   : > { %2783 = vxpose.xlu0.b32.start.end [1/1] (short) (narrow) %v634_v31, 8  ;;  %v2403_v52 = vmul.f32 1.442695, %v2377_v43 }
 0x4e6   : > { %12217 = vpow2.f32 %v2403_v52 }
 0x4ec   : > { %v12216_v57 = vpop.eup %12215 }
 0x4ed   : > { %v2483_v28 = vmul.f32 %v12216_v57, %v13149_v9 }
 0x4ef   : > { %11477 = vmatpush3.xpose.msk.msra.mxu0 %vm1166_vm1, %v2483_v28  ;;  %v2366_v33 = vpop.xlane.xlu0 %2365 }
 0x4f0   : > { %11486 = vmatprep.subr.mxu0 %v12556_v0  ;;  %v13241_v54 = vpop.eup %12217  ;;  %v2382_v10 = vsub.f32 %v13154_v12, %v2366_v33 }
 0x4f1   : > { %v2445_v9 = vsel %vm1166_vm1, %v13241_v54, 0.0 }
 0x4f2   : > { %11479 = vmatmul.mubr.msk.f32.vlgmr.msra.gmra.mrb[14].mxu0 %vm1166_vm1, %v13053_v38  ;;  %v2413_v2 = vmul.f32 1.442695, %v2382_v10 }
 0x4f3   : > { %11488 = vmatprep.mubr.msk.f32.mxu0 %vm12558_vm0, %v12556_v0  ;;  %v13245_v58 = vpop.permute.xlu0 %642 }
 0x4f4   : > { %645 = vrot.lane.b32.xlu1 %v12912_v29, %s12569_s17 }
 0x4f7   : > { %v13247_v38 = vpop.permute.xlu0 %648 }
 0x507   : > { %v13254_v36 = vpop.trf.xlu1 }
 0x518   : > { %2446 = vadd.xlane.f32.xlu1 %v2445_v9 }
 0x528   : > { %v2420_v60 = vpop.xlane.xlu0 %2419 }
 0x529   : > { %12219 = vrcp.f32 %v2420_v60  ;;  %651 = vrot.lane.b32.xlu1 %v12912_v29, %s14215_s12 }
 0x52c   : > { %v2426_v59 = vpop.xlane.xlu0 %2425 }
 0x52d   : > { %12221 = vrcp.f32 %v2426_v59 }
 0x530   : > { %v13251_v4 = vpop.xlane.xlu0 %2458 }
 0x533   : > { %v12220_v63 = vpop.eup %12219 }
 0x534   : > { %v2432_v61 = vpop.xlane.xlu0 %2431  ;;  %v2480_v62 = vmul.f32 %v12220_v63, %v13166_v49  ;;  %v2407_v49 = vmul.f32 1.442695, %v2379_v6 }
 0x535   : > { %12223 = vrcp.f32 %v2432_v61 }
 0x536   : > { %11462 = vmatpush3.xpose.msk.msra.mxu1 %vm1166_vm1, %v2480_v62 }
 0x537   : > { %v12222_v3 = vpop.eup %12221  ;;  %11471 = vmatprep.subr.mxu1 %v12556_v0 }
 0x538   : > { %v2438_v29 = vpop.xlane.xlu0 %2437  ;;  %v2482_v7 = vmul.f32 %v12222_v3, %v13172_v48 }
 0x539   : > { %12225 = vrcp.f32 %v2438_v29  ;;  %11464 = vmatmul.mubr.msk.f32.vlgmr.msra.gmra.mrb[26].mxu1 %vm1166_vm1, %v13049_v34 }
 0x53a   : > { %11472 = vmatpush3.xpose.msk.msra.mxu1 %vm1166_vm1, %v2482_v7  ;;  %11473 = vmatprep.mubr.msk.f32.mxu1 %vm12558_vm0, %v12556_v0 }
 0x53b   : > { %v2435_v56 = vpop.xlane.xlu1 %2434  ;;  %11481 = vmatprep.subr.mxu1 %v12556_v0 }
 0x53c   : > { %12227 = vrcp.f32 %v2435_v56  ;;  %v2444_v17 = vpop.xlane.xlu0 %2443 }
 0x53d   : > { %12229 = vrcp.f32 %v2444_v17  ;;  %11474 = vmatmul.mubr.msk.f32.vlgmr.msra.gmra.mrb[28].mxu1 %vm1166_vm1, %v13125_v44 }
 0x53e   : > { %11483 = vmatprep.mubr.msk.f32.mxu1 %vm12558_vm0, %v12556_v0  ;;  %12231 = vpow2.f32 %v2407_v49 }
 0x53f   : > { %v12224_v34 = vpop.eup %12223  ;;  %v640_v48 = vpop.permute.xlu1 %639  ;;  %12233 = vpow2.f32 %v2413_v2 }
 0x540   : > { %2847 = vxpose.xlu0.b32.start.end [1/1] (short) (narrow) %v640_v48, 8  ;;  %v2484_v22 = vmul.f32 %v12224_v34, %v13182_v8 }
 0x542   : > { %11482 = vmatpush3.xpose.msk.msra.mxu1 %vm1166_vm1, %v2484_v22 }
 0x543   : > { %v12226_v12 = vpop.eup %12225  ;;  %11491 = vmatprep.subr.mxu1 %v12556_v0 }
 0x544   : > { %v2486_v19 = vmul.f32 %v12226_v12, %v13186_v11 }
 0x545   : > { %11484 = vmatmul.mubr.msk.f32.vlgmr.msra.gmra.mrb[30].mxu1 %vm1166_vm1, %v13127_v45 }
 0x546   : > { %v12228_v44 = vpop.eup %12227  ;;  %11492 = vmatpush3.xpose.msk.msra.mxu1 %vm1166_vm1, %v2486_v19  ;;  %11493 = vmatprep.mubr.msk.f32.mxu1 %vm12558_vm0, %v12556_v0 }
 0x547   : > { %v12230_v20 = vpop.eup %12229  ;;  %v2485_v8 = vmul.f32 %v12228_v44, %v13188_v16  ;;  %11501 = vmatprep.subr.mxu1 %v12556_v0  ;;  %v2450_v16 = vpop.xlane.xlu0 %2449 }
 0x548   : > { %v2488_v24 = vmul.f32 %v12230_v20, %v13192_v18  ;;  %v13284_v30 = vpop.eup %12231  ;;  %12235 = vrcp.f32 %v2450_v16 }
 0x549   : > { %11487 = vmatpush3.xpose.msk.msra.mxu0 %vm1166_vm1, %v2485_v8  ;;  %11494 = vmatmul.mubr.msk.f32.vlgmr.msra.gmra.mrb[32].mxu1 %vm1166_vm1, %v13129_v46  ;;  %v2451_v45 = vsel %vm1166_vm1, %v13284_v30, 0.0  ;;  %v13298_v11 = vpop.eup %12233 }
 0x54a   : > { %11502 = vmatpush3.xpose.msk.msra.mxu1 %vm1166_vm1, %v2488_v24  ;;  %11503 = vmatprep.mubr.msk.f32.mxu1 %vm12558_vm0, %v12556_v0  ;;  %v2460_v46 = vsel %vm1166_vm1, %v13298_v11, 0.0 }
 0x54b   : > { %11511 = vmatprep.subr.mxu1 %v12556_v0  ;;  %11496 = vmatprep.subr.mxu0 %v12556_v0  ;;  %v2456_v18 = vpop.xlane.xlu0 %2455 }
 0x54c   : > { %11489 = vmatmul.mubr.msk.f32.vlgmr.msra.gmra.mrb[16].mxu0 %vm1166_vm1, %v13055_v39 }
 0x54d   : > { %2452 = vadd.xlane.f32.xlu1 %v2451_v45  ;;  %11498 = vmatprep.mubr.msk.f32.mxu0 %vm12558_vm0, %v12556_v0 }
 0x551   : > { %2461 = vadd.xlane.f32.xlu1 %v2460_v46  ;;  %v12574_v46 = vmov 1983009808  }
 0x552   : > { %v12236_v31 = vpop.eup %12235  ;;  %v4738_v16 = vunpack.c.l.s4 %v12574_v46 }
 0x553   : > { %v2490_v39 = vmul.f32 %v12236_v31, %v13198_v21 }
 0x564   : > { %v2799_v35 = vpop.trf.xlu0 }
 0x565   : > { %11504 = vmatmul.mubr.msk.f32.vlgmr.msra.gmra.mrb[34].mxu1 %vm1166_vm1, %v2799_v35 }
 0x566   : > { %11512 = vmatpush3.xpose.msk.msra.mxu1 %vm1166_vm1, %v2490_v39  ;;  %11513 = vmatprep.mubr.msk.f32.mxu1 %vm12558_vm0, %v12556_v0 }
 0x567   : > { %11521 = vmatprep.subr.mxu1 %v12556_v0 }
 0x570   : > { %v2441_v37 = vpop.xlane.xlu1 %2440 }
 0x571   : > { %12237 = vrcp.f32 %v2441_v37  ;;  %v12575_v37 = vmov 1934713408  }
 0x574   : > { %v646_v40 = vpop.permute.xlu1 %645 }
 0x575   : > { %2911 = vxpose.xlu0.b32.start.end [1/1] (short) (narrow) %v646_v40, 8  ;;  %v4802_v40 = vunpack.c.l.s4 %v12575_v37 }
 0x57b   : > { %v12238_v47 = vpop.eup %12237 }
 0x57c   : > { %v2487_v50 = vmul.f32 %v12238_v47, %v13220_v42 }
 0x57e   : > { %11497 = vmatpush3.xpose.msk.msra.mxu0 %vm1166_vm1, %v2487_v50 }
 0x57f   : > { %11506 = vmatprep.subr.mxu0 %v12556_v0 }
 0x581   : > { %11499 = vmatmul.mubr.msk.f32.vlgmr.msra.gmra.mrb[18].mxu0 %vm1166_vm1, %v13204_v25 }
 0x582   : > { %11508 = vmatprep.mubr.msk.f32.mxu0 %vm12558_vm0, %v12556_v0 }
 0x584   : > { %2879 = vxpose.xlu1.b32.start.end [1/1] (short) (narrow) %v13245_v58, 8 }
 0x588   : > { %2943 = vxpose.xlu1.b32.start.end [1/1] (short) (narrow) %v13247_v38, 8 }
 0x5a4   : > { %v3079_v21 = vpop.f32.mrb[10].mxu0 }
 0x5a5   : > { %v11460_v51 = vpop.f32.mrb[11].mxu0  ;;  %v2447_v32 = vpop.xlane.xlu1 %2446  ;;  %4223 = vxpose.xlu1.b32.start.end [1/1] (short) (narrow) %v3079_v21, 8 }
 0x5a6   : > { %12239 = vrcp.f32 %v2447_v32 }
 0x5a7   : > { %12241 = vrcp.f32 %v2456_v18  ;;  %v4739_v18 = vunpack.c.0.s8 %v4738_v16 }
 0x5a9   : > { %v652_v55 = vpop.permute.xlu1 %651  ;;  %v13355_v39 = vsub.s32 %v4739_v18, %v12864_v14 }
 0x5aa   : > { %2975 = vxpose.xlu0.b32.start.end [1/1] (short) (narrow) %v652_v55, 8 }
 0x5b0   : > { %v12240_v42 = vpop.eup %12239 }
 0x5b1   : > { %v2489_v53 = vmul.f32 %v12240_v42, %v13241_v54  ;;  %v12242_v57 = vpop.eup %12241 }
 0x5b2   : > { %v2492_v43 = vmul.f32 %v12242_v57, %v13202_v26 }
 0x5b3   : > { %11507 = vmatpush3.xpose.msk.msra.mxu0 %vm1166_vm1, %v2489_v53  ;;  %v4803_v53 = vunpack.c.0.s8 %v4802_v40 }
 0x5b4   : > { %11516 = vmatprep.subr.mxu0 %v12556_v0 }
 0x5b5   : > { %v3231_v25 = vpop.f32.mrb[12].mxu0 }
 0x5b6   : > { %v11470_v41 = vpop.f32.mrb[13].mxu0  ;;  %11509 = vmatmul.mubr.msk.f32.vlgmr.msra.gmra.mrb[20].mxu0 %vm1166_vm1, %v13254_v36  ;;  %4287 = vxpose.xlu1.b32.start.end [1/1] (short) (narrow) %v3231_v25, 8 }
 0x5b7   : > { %11518 = vmatprep.mubr.msk.f32.mxu0 %vm12558_vm0, %v12556_v0 }
 0x5c0   : > { %v2863_v28 = vpop.trf.xlu0 }
 0x5c1   : > { %11514 = vmatmul.mubr.msk.f32.vlgmr.msra.gmra.mrb[36].mxu1 %vm1166_vm1, %v2863_v28 }
 0x5c2   : > { %11522 = vmatpush3.xpose.msk.msra.mxu1 %vm1166_vm1, %v2492_v43  ;;  %11523 = vmatprep.mubr.msk.f32.mxu1 %vm12558_vm0, %v12556_v0 }
 0x5c3   : > { %11531 = vmatprep.subr.mxu1 %v12556_v0 }
 0x5c5   : > { %v3383_v52 = vpop.f32.mrb[14].mxu0 }
 0x5c6   : > { %v11480_v54 = vpop.f32.mrb[15].mxu0  ;;  %4351 = vxpose.xlu1.b32.start.end [1/1] (short) (narrow) %v3383_v52, 8 }
 0x5da   : > { %v2453_v9 = vpop.xlane.xlu1 %2452 }
 0x5db   : > { %12243 = vrcp.f32 %v2453_v9 }
 0x5de   : > { %v2462_v58 = vpop.xlane.xlu1 %2461 }
 0x5df   : > { %12245 = vrcp.f32 %v2462_v58 }
 0x5e0   : > { %12247 = vrcp.f32 %v13251_v4 }
 0x5e5   : > { %v12244_v33 = vpop.eup %12243 }
 0x5e6   : > { %v2491_v38 = vmul.f32 %v12244_v33, %v13284_v30  ;;  %v13362_v33 = vsub.s32 %v4803_v53, %v12864_v14 }
 0x5e8   : > { %11517 = vmatpush3.xpose.msk.msra.mxu0 %vm1166_vm1, %v2491_v38 }
 0x5e9   : > { %11526 = vmatprep.subr.mxu0 %v12556_v0  ;;  %v12246_v26 = vpop.eup %12245 }
 0x5ea   : > { %v2494_v59 = vmul.f32 %v12246_v26, %v13298_v11  ;;  %v12248_v63 = vpop.eup %12247 }
 0x5eb   : > { %v2493_v62 = vmul.f32 %v12248_v63, %v13177_v5 }
 0x5f5   : > { %v2927_v60 = vpop.trf.xlu0 }
 0x5f6   : > { %11524 = vmatmul.mubr.msk.f32.vlgmr.msra.gmra.mrb[38].mxu1 %vm1166_vm1, %v2927_v60 }
 0x5f7   : > { %11532 = vmatpush3.xpose.msk.msra.mxu1 %vm1166_vm1, %v2494_v59  ;;  %11533 = vmatprep.mubr.msk.f32.mxu1 %vm12558_vm0, %v12556_v0 }
 0x5f8   : > { %11951 = vmatprep.subr.bf16.mxu1 %v12557_v1 }
 0x604   : > { %v2895_v61 = vpop.trf.xlu1 }
 0x605   : > { %11519 = vmatmul.mubr.msk.f32.vlgmr.msra.gmra.mrb[22].mxu0 %vm1166_vm1, %v2895_v61 }
 0x606   : > { %11527 = vmatpush3.xpose.msk.msra.mxu0 %vm1166_vm1, %v2493_v62  ;;  %11528 = vmatprep.mubr.msk.f32.mxu0 %vm12558_vm0, %v12556_v0 }
 0x607   : > { %11927 = vmatprep.subr.bf16.mxu0 %v12557_v1 }
 0x608   : > { %v2959_v4 = vpop.trf.xlu1 }
 0x609   : > { %11529 = vmatmul.mubr.msk.f32.vlgmr.msra.gmra.mrb[24].mxu0 %vm1166_vm1, %v2959_v4 }
 0x60a   : > { %11568 = vmatprep.mubr.msk.f32.mxu0 %vm12558_vm0, %v12556_v0 }
 0x60c   : > { %v3155_v36 = vpop.f32.mrb[26].mxu1 }
 0x60d   : > { %4255 = vxpose.xlu0.b32.start.end [1/1] (short) (narrow) %v3155_v36, 8  ;;  %v11465_v3 = vpop.f32.mrb[27].mxu1 }
 0x610   : > { %v3307_v6 = vpop.f32.mrb[28].mxu1 }
 0x611   : > { %4319 = vxpose.xlu0.b32.start.end [1/1] (short) (narrow) %v3307_v6, 8  ;;  %v11475_v5 = vpop.f32.mrb[29].mxu1 }
 0x618   : > { %v3459_v29 = vpop.f32.mrb[30].mxu1 }
 0x619   : > { %4383 = vxpose.xlu0.b32.start.end [1/1] (short) (narrow) %v3459_v29, 8  ;;  %v11485_v7 = vpop.f32.mrb[31].mxu1 }
 0x61c   : > { %v3611_v49 = vpop.f32.mrb[32].mxu1 }
 0x61d   : > { %4447 = vxpose.xlu0.b32.start.end [1/1] (short) (narrow) %v3611_v49, 8  ;;  %v11495_v10 = vpop.f32.mrb[33].mxu1 }
 0x61f   : > { %v3535_v56 = vpop.f32.mrb[16].mxu0 }
 0x620   : > { %v11490_v17 = vpop.f32.mrb[17].mxu0  ;;  %4415 = vxpose.xlu1.b32.start.end [1/1] (short) (narrow) %v3535_v56, 8 }
 0x625   : > { %v4239_v11 = vpop.trf.xlu1 }
 0x62a   : > { %v2991_v34 = vpop.trf.xlu0 }
 0x62b   : > { %11534 = vmatmul.mubr.msk.f32.vlgmr.msra.gmra.mrb[40].mxu1 %vm1166_vm1, %v2991_v34 }
 0x62c   : > { %11603 = vmatprep.mubr.msk.f32.mxu1 %vm12558_vm0, %v12556_v0 }
 0x636   : > { %v4303_v35 = vpop.trf.xlu1 }
 0x637   : > { %v4735_v50 = vcombine.low %v4239_v11, %v4303_v35  ;;  %v4736_v21 = vcombine.high %v4239_v11, %v4303_v35 }
 0x638   : > { %v3763_v2 = vpop.f32.mrb[34].mxu1 }
 0x639   : > { %4511 = vxpose.xlu0.b32.start.end [1/1] (short) (narrow) %v3763_v2, 8  ;;  %v11505_v48 = vpop.f32.mrb[35].mxu1  ;;  %v4743_v41 = vrot.slane %v4735_v50, %v13355_v39  ;;  %v4750_v57 = vrot.slane %v4736_v21, %v13355_v39 }
 0x646   : > { %v4367_v55 = vpop.trf.xlu1 }
 0x654   : > { %v3687_v22 = vpop.f32.mrb[18].mxu0 }
 0x655   : > { %v11500_v12 = vpop.f32.mrb[19].mxu0  ;;  %4479 = vxpose.xlu1.b32.start.end [1/1] (short) (narrow) %v3687_v22, 8 }
 0x689   : > { %v3839_v19 = vpop.f32.mrb[20].mxu0 }
 0x68a   : > { %v11510_v44 = vpop.f32.mrb[21].mxu0  ;;  %4543 = vxpose.xlu1.b32.start.end [1/1] (short) (narrow) %v3839_v19, 8 }
 0x68d   : > { %v4271_v45 = vpop.trf.xlu0 }
 0x691   : > { %v4335_v31 = vpop.trf.xlu0 }
 0x692   : > { %v4751_v51 = vcombine.low %v4271_v45, %v4335_v31  ;;  %v4752_v32 = vcombine.high %v4271_v45, %v4335_v31 }
 0x694   : > { %v3915_v20 = vpop.f32.mrb[36].mxu1  ;;  %v4759_v28 = vrot.slane %v4751_v51, %v13355_v39  ;;  %v4766_v43 = vrot.slane %v4752_v32, %v13355_v39 }
 0x695   : > { %4575 = vxpose.xlu0.b32.start.end [1/1] (short) (narrow) %v3915_v20, 8  ;;  %v11515_v8 = vpop.f32.mrb[37].mxu1 }
 0x696   : > { %v4799_v38 = vcombine.low %v4743_v41, %v4759_v28  ;;  %v4800_v26 = vcombine.high %v4743_v41, %v4759_v28  ;;  %v4815_v60 = vcombine.low %v4750_v57, %v4766_v43  ;;  %v4816_v59 = vcombine.high %v4750_v57, %v4766_v43 }
 0x698   : > { %v4807_v36 = vrot.slane %v4799_v38, %v13362_v33  ;;  %v4814_v3 = vrot.slane %v4800_v26, %v13362_v33  ;;  %v4823_v6 = vrot.slane %v4815_v60, %v13362_v33  ;;  %v4830_v5 = vrot.slane %v4816_v59, %v13362_v33 }
 0x699   : > { %v4399_v47 = vpop.trf.xlu0 }
 0x69a   : > { %v11027_v56 = vcombine.low %v4807_v36, %v4814_v3  ;;  %v11029_v17 = vcombine.high %v4807_v36, %v4814_v3  ;;  %v11031_v34 = vcombine.low %v4823_v6, %v4830_v5  ;;  %v11033_v2 = vcombine.high %v4823_v6, %v4830_v5 }
 0x69c   : > { %v5015_v44 = vrot.slane %v11027_v56, %v13355_v39  ;;  %v5031_v20 = vrot.slane %v11029_v17, %v13355_v39  ;;  %v5047_v8 = vrot.slane %v11031_v34, %v13355_v39 }
 0x69d   : > { %v4463_v52 = vpop.trf.xlu0 }
 0x69e   : > { %v4783_v62 = vcombine.low %v4399_v47, %v4463_v52  ;;  %v4784_v4 = vcombine.high %v4399_v47, %v4463_v52  ;;  %v5071_v16 = vcombine.low %v5015_v44, %v5031_v20  ;;  %v5072_v21 = vcombine.high %v5015_v44, %v5031_v20 }
 0x6a0   : > { %v4431_v9 = vpop.trf.xlu1  ;;  %v4791_v49 = vrot.slane %v4783_v62, %v13355_v39  ;;  %v4798_v10 = vrot.slane %v4784_v4, %v13355_v39  ;;  %v13381_v47 = vrot.slane %v5071_v16, %v13362_v33 }
 0x6a1   : > { %v4767_v63 = vcombine.low %v4367_v55, %v4431_v9  ;;  %v4768_v61 = vcombine.high %v4367_v55, %v4431_v9 }
 0x6a3   : > { %v4775_v29 = vrot.slane %v4767_v63, %v13355_v39  ;;  %v4782_v7 = vrot.slane %v4768_v61, %v13355_v39 }
 0x6a5   : > { %v4831_v48 = vcombine.low %v4775_v29, %v4791_v49  ;;  %v4832_v22 = vcombine.high %v4775_v29, %v4791_v49  ;;  %v4847_v12 = vcombine.low %v4782_v7, %v4798_v10  ;;  %v4848_v19 = vcombine.high %v4782_v7, %v4798_v10 }
 0x6a7   : > { %v4846_v45 = vrot.slane %v4832_v22, %v13362_v33  ;;  %v4855_v11 = vrot.slane %v4847_v12, %v13362_v33  ;;  %v4862_v46 = vrot.slane %v4848_v19, %v13362_v33 }
 0x6a9   : > { %v11032_v37 = vcombine.low %v4855_v11, %v4862_v46  ;;  %v11034_v40 = vcombine.high %v4855_v11, %v4862_v46 }
 0x6ab   : > { %v5070_v53 = vrot.slane %v11034_v40, %v13355_v39 }
 0x6b9   : > { %v4527_v3 = vpop.trf.xlu0 }
 0x6c9   : > { %v4067_v24 = vpop.f32.mrb[38].mxu1 }
 0x6ca   : > { %4639 = vxpose.xlu0.b32.start.end [1/1] (short) (narrow) %v4067_v24, 8  ;;  %v11525_v30 = vpop.f32.mrb[39].mxu1  ;;  %v5063_v24 = vrot.slane %v11033_v2, %v13355_v39 }
 0x6cb   : > { %v4839_v30 = vrot.slane %v4831_v48, %v13362_v33 }
 0x6cc   : > { %v5103_v18 = vcombine.low %v5047_v8, %v5063_v24  ;;  %v5104_v51 = vcombine.high %v5047_v8, %v5063_v24 }
 0x6cd   : > { %v11028_v31 = vcombine.low %v4839_v30, %v4846_v45  ;;  %v11030_v35 = vcombine.high %v4839_v30, %v4846_v45 }
 0x6ce   : > { %v13384_v50 = vrot.slane %v5103_v18, %v13362_v33  ;;  %v5118_v57 = vrot.slane %v5104_v51, %v13362_v33 }
 0x6cf   : > { %v5022_v32 = vrot.slane %v11028_v31, %v13355_v39  ;;  %v5038_v55 = vrot.slane %v11030_v35, %v13355_v39 }
 0x6d0   : > { %v5136_v41 = vcombine.high %v13381_v47, %v13384_v50 }
 0x6d1   : > { %v5087_v28 = vcombine.low %v5022_v32, %v5038_v55  ;;  %v5088_v60 = vcombine.high %v5022_v32, %v5038_v55 }
 0x6d3   : > { %v5102_v61 = vrot.slane %v5088_v60, %v13362_v33  ;;  %v5372_v60 = vld [vmem:[#allocation8 + $0x158] sm:$0xff] }
 0x6d5   : > { %v4495_v36 = vpop.trf.xlu1 }
 0x6d8   : > { %v3991_v42 = vpop.f32.mrb[22].mxu0 }
 0x6d9   : > { %4607 = vxpose.xlu1.b32.start.end [1/1] (short) (narrow) %v3991_v42, 8  ;;  %v11520_v25 = vpop.f32.mrb[23].mxu0  ;;  %v5054_v42 = vrot.slane %v11032_v37, %v13355_v39 }
 0x6da   : > { %v5086_v25 = vrot.slane %v5072_v21, %v13362_v33 }
 0x6db   : > { %v5119_v43 = vcombine.low %v5054_v42, %v5070_v53  ;;  %v5120_v59 = vcombine.high %v5054_v42, %v5070_v53 }
 0x6dc   : > { %v4143_v54 = vpop.f32.mrb[24].mxu0  ;;  %v5138_v52 = vcombine.high %v5086_v25, %v5118_v57  ;;  %v5137_v32 = vcombine.low %v5086_v25, %v5118_v57  ;;  %v5371_v25 = vld [vmem:[#allocation8 + $0x108] sm:$0xff] }
 0x6dd   : > { %4671 = vxpose.xlu1.b32.start.end [1/1] (short) (narrow) %v4143_v54, 8  ;;  %v11530_v58 = vpop.f32.mrb[25].mxu0  ;;  %v5095_v54 = vrot.slane %v5087_v28, %v13362_v33  ;;  %v5127_v9 = vrot.slane %v5119_v43, %v13362_v33  ;;  %v5134_v62 = vrot.slane %v5120_v59, %v13362_v33  ;;  %v5373_v59 = vld [vmem:[#allocation8 + $0x1a8] sm:$0xff] }
 0x6df   : > { %v5139_v26 = vcombine.low %v5095_v54, %v5127_v9  ;;  %v5140_v63 = vcombine.high %v5095_v54, %v5127_v9  ;;  %v5142_v4 = vcombine.high %v5102_v61, %v5134_v62  ;;  %v5141_v43 = vcombine.low %v5102_v61, %v5134_v62  ;;  %v5368_v54 = vld [vmem:[#allocation8 + $0x18] sm:$0xff]  ;;  %v5369_v9 = vld [vmem:[#allocation8 + $0x68] sm:$0xff] }
 0x6e0   : > { %v5374_v62 = vld [vmem:[#allocation8 + $0x1f8] sm:$0xff] }
 0x6fb   : > { %5280 = vrot.lane.b32.xlu1 %v5136_v41, %s14215_s12  ;;  %s14236_s12 = scalar_lea.vmem [#allocation2], %s12822_s28 }
 0x6fe   : > { %v4219_v58 = vpop.f32.mrb[40].mxu1 }
 0x6ff   : > { %4703 = vxpose.xlu0.b32.start.end [1/1] (short) (narrow) %v4219_v58, 8  ;;  %v11535_v38 = vpop.f32.mrb[41].mxu1  ;;  %5288 = vrot.lane.b32.xlu1 %v5138_v52, %s12569_s17  ;;  %v5370_v58 = vld [vmem:[#allocation8 + $0xb8] sm:$0xff] }
 0x700   : > { %v11928_v38 = vpack.c.bf16 %v5369_v9, %v5368_v54  ;;  %v11931_v57 = vpack.c.bf16 %v5371_v25, %v5370_v58  ;;  %v5575_v9 = vld [vmem:[#allocation8 + $0x30] sm:$0xff]  ;;  %v5577_v58 = vld [vmem:[#allocation8 + $0x80] sm:$0xff] }
 0x702   : > { %11929 = vmatpush3.bf16.msra.mxu0 %v11928_v38 }
 0x703   : > { %5292 = vrot.lane.b32.xlu1 %v5139_v26, %s12572_s30  ;;  %11930 = vmatprep.subr.bf16.mxu0 %v12557_v1 }
 0x706   : > { %11932 = vmatpush3.bf16.msra.mxu0 %v11931_v57 }
 0x707   : > { %5296 = vrot.lane.b32.xlu1 %v5140_v63, %s12570_s10  ;;  %v11934_v63 = vpack.c.bf16 %v5373_v59, %v5372_v60  ;;  %11933 = vmatprep.subr.bf16.mxu0 %v12557_v1  ;;  %v11975_v60 = vpack.c.bf16 %v5577_v58, %v5575_v9  ;;  %v5585_v9 = vld [vmem:[#allocation8 + $0x1c0] sm:$0xff] }
 0x70a   : > { %v4559_v6 = vpop.trf.xlu1  ;;  %11935 = vmatpush3.bf16.msra.mxu0 %v11934_v63 }
 0x70b   : > { %5304 = vrot.lane.b32.xlu1 %v5142_v4, %s12568_s13  ;;  %v4871_v5 = vcombine.low %v4495_v36, %v4559_v6  ;;  %v4872_v29 = vcombine.high %v4495_v36, %v4559_v6  ;;  %v5375_v4 = vld [vmem:[#allocation8 + $0x248] sm:$0xff]  ;;  %11936 = vmatprep.subr.bf16.mxu0 %v12557_v1 }
 0x70c   : > { %v11937_v36 = vpack.c.bf16 %v5375_v4, %v5374_v62  ;;  %v5377_v6 = vld [vmem:[#allocation8 + $0x2e8] sm:$0xff] }
 0x70d   : > { %v4879_v49 = vrot.slane %v4871_v5, %v13355_v39  ;;  %v4886_v10 = vrot.slane %v4872_v29, %v13355_v39  ;;  %v5378_v29 = vld [vmem:[#allocation8 + $0x338] sm:$0xff] }
 0x70e   : > { %11938 = vmatpush3.bf16.msra.mxu0 %v11937_v36 }
 0x70f   : > { %11939 = vmatprep.subr.bf16.mxu0 %v12557_v1 }
 0x715   : > { %v4591_v7 = vpop.trf.xlu0 }
 0x716   : > { %v4887_v56 = vcombine.low %v4527_v3, %v4591_v7  ;;  %v4888_v17 = vcombine.high %v4527_v3, %v4591_v7  ;;  %v5376_v3 = vld [vmem:[#allocation8 + $0x298] sm:$0xff]  ;;  %v5379_v7 = vld [vmem:[#allocation8 + $0x388] sm:$0xff] }
 0x717   : > { %v11940_v5 = vpack.c.bf16 %v5377_v6, %v5376_v3 }
 0x718   : > { %v4895_v34 = vrot.slane %v4887_v56, %v13355_v39  ;;  %v4902_v2 = vrot.slane %v4888_v17, %v13355_v39  ;;  %v5381_v56 = vld [vmem:[#allocation8 + $0x428] sm:$0xff] }
 0x719   : > { %11941 = vmatpush3.bf16.msra.mxu0 %v11940_v5 }
 0x71a   : > { %v4935_v48 = vcombine.low %v4879_v49, %v4895_v34  ;;  %v4936_v22 = vcombine.high %v4879_v49, %v4895_v34  ;;  %v4951_v12 = vcombine.low %v4886_v10, %v4902_v2  ;;  %v4952_v19 = vcombine.high %v4886_v10, %v4902_v2  ;;  %11942 = vmatprep.subr.bf16.mxu0 %v12557_v1  ;;  %v5380_v10 = vld [vmem:[#allocation8 + $0x3d8] sm:$0xff] }
 0x71b   : > { %v11943_v49 = vpack.c.bf16 %v5379_v7, %v5378_v29  ;;  %v11946_v17 = vpack.c.bf16 %v5381_v56, %v5380_v10  ;;  %v5135_v7 = vcombine.low %v13381_v47, %v13384_v50 }
 0x71c   : > { %v4943_v44 = vrot.slane %v4935_v48, %v13362_v33  ;;  %v4950_v20 = vrot.slane %v4936_v22, %v13362_v33  ;;  %v4959_v8 = vrot.slane %v4951_v12, %v13362_v33  ;;  %v4966_v24 = vrot.slane %v4952_v19, %v13362_v33 }
 0x71d   : > { %11944 = vmatpush3.bf16.msra.mxu0 %v11943_v49 }
 0x71e   : > { %v11035_v30 = vcombine.low %v4943_v44, %v4950_v20  ;;  %v11037_v45 = vcombine.high %v4943_v44, %v4950_v20  ;;  %v11039_v11 = vcombine.low %v4959_v8, %v4966_v24  ;;  %v11041_v46 = vcombine.high %v4959_v8, %v4966_v24  ;;  %11945 = vmatprep.subr.bf16.mxu0 %v12557_v1 }
 0x720   : > { %v5151_v16 = vrot.slane %v11035_v30, %v13355_v39  ;;  %v5167_v18 = vrot.slane %v11037_v45, %v13355_v39  ;;  %v5183_v31 = vrot.slane %v11039_v11, %v13355_v39  ;;  %v5199_v35 = vrot.slane %v11041_v46, %v13355_v39 }
 0x721   : > { %11947 = vmatpush3.bf16.msra.mxu0 %v11946_v17 }
 0x722   : > { %v5207_v37 = vcombine.low %v5151_v16, %v5167_v18  ;;  %v5239_v40 = vcombine.low %v5183_v31, %v5199_v35  ;;  %v5208_v21 = vcombine.high %v5151_v16, %v5167_v18  ;;  %v5240_v51 = vcombine.high %v5183_v31, %v5199_v35  ;;  %11948 = vmatprep.subr.bf16.mxu0 %v12557_v1  ;;  %v5382_v31 = vld [vmem:[#allocation8 + $0x478] sm:$0xff]  ;;  %v5383_v35 = vld [vmem:[#allocation8 + $0x4c8] sm:$0xff] }
 0x724   : > { %v5215_v55 = vrot.slane %v5207_v37, %v13362_v33  ;;  %v5247_v42 = vrot.slane %v5239_v40, %v13362_v33  ;;  %v5222_v53 = vrot.slane %v5208_v21, %v13362_v33  ;;  %v5254_v41 = vrot.slane %v5240_v51, %v13362_v33 }
 0x726   : > { %v5272_v28 = vcombine.high %v5215_v55, %v5247_v42  ;;  %v5274_v52 = vcombine.high %v5222_v53, %v5254_v41  ;;  %v5271_v26 = vcombine.low %v5215_v55, %v5247_v42  ;;  %v5273_v61 = vcombine.low %v5222_v53, %v5254_v41 }
 0x728   : > { %5284 = vrot.lane.b32.xlu0 %v5137_v32, %s12571_s26  ;;  %5312 = vrot.lane.b32.xlu1 %v5272_v28, %s12566_s8  ;;  %v11949_v32 = vpack.c.bf16 %v5383_v35, %v5382_v31  ;;  %v5574_v35 = vld [vmem:[#allocation8 + $0x28] sm:$0xff] }
 0x72a   : > { %11950 = vmatpush3.bf16.msra.mxu0 %v11949_v32 }
 0x72b   : > { %11976 = vmatprep.subr.bf16.mxu0 %v11975_v60  ;;  %v5589_v60 = vld [vmem:[#allocation8 + $0x260] sm:$0xff] }
 0x72c   : > { %5300 = vrot.lane.b32.xlu0 %v5141_v43, %s12567_s11  ;;  %5320 = vrot.lane.b32.xlu1 %v5274_v52, %s12564_s14 }
 0x730   : > { %5308 = vrot.lane.b32.xlu0 %v5271_v26, %s12565_s2 }
 0x734   : > { %5316 = vrot.lane.b32.xlu0 %v5273_v61, %s12563_s7 }
 0x74a   : > { %v4655_v2 = vpop.trf.xlu0 }
 0x759   : > { %v4623_v34 = vpop.trf.xlu1 }
 0x75d   : > { %v4687_v48 = vpop.trf.xlu1 }
 0x75e   : > { %v4903_v22 = vcombine.low %v4623_v34, %v4687_v48  ;;  %v4904_v12 = vcombine.high %v4623_v34, %v4687_v48 }
 0x760   : > { %v4911_v8 = vrot.slane %v4903_v22, %v13355_v39  ;;  %v4918_v24 = vrot.slane %v4904_v12, %v13355_v39 }
 0x76d   : > { %v5281_v5 = vpop.permute.xlu1 %5280 }
 0x76e   : > { %v5339_v56 = vsel %vm1166_vm1, %v5135_v7, %v5281_v5  ;;  %v5590_v5 = vld [vmem:[#allocation8 + $0x2a8] sm:$0xff]  ;;  %v5595_v7 = vld [vmem:[#allocation8 + $0x350] sm:$0xff] }
 0x771   : > { %v5289_v29 = vpop.permute.xlu1 %5288 }
 0x775   : > { %v5293_v49 = vpop.permute.xlu1 %5292 }
 0x779   : > { %v5297_v34 = vpop.permute.xlu1 %5296 }
 0x77d   : > { %v5305_v12 = vpop.permute.xlu1 %5304 }
 0x77f   : > { %v4719_v19 = vpop.trf.xlu0 }
 0x780   : > { %v4919_v44 = vcombine.low %v4655_v2, %v4719_v19  ;;  %v4920_v20 = vcombine.high %v4655_v2, %v4719_v19 }
 0x782   : > { %v4927_v30 = vrot.slane %v4919_v44, %v13355_v39  ;;  %v4934_v45 = vrot.slane %v4920_v20, %v13355_v39 }
 0x784   : > { %v4967_v11 = vcombine.low %v4911_v8, %v4927_v30  ;;  %v4968_v46 = vcombine.high %v4911_v8, %v4927_v30  ;;  %v4983_v16 = vcombine.low %v4918_v24, %v4934_v45  ;;  %v4984_v18 = vcombine.high %v4918_v24, %v4934_v45 }
 0x786   : > { %v4975_v37 = vrot.slane %v4967_v11, %v13362_v33  ;;  %v4982_v40 = vrot.slane %v4968_v46, %v13362_v33  ;;  %v4991_v21 = vrot.slane %v4983_v16, %v13362_v33  ;;  %v4998_v51 = vrot.slane %v4984_v18, %v13362_v33 }
 0x788   : > { %v11036_v55 = vcombine.low %v4975_v37, %v4982_v40  ;;  %v11038_v42 = vcombine.high %v4975_v37, %v4982_v40  ;;  %v11040_v53 = vcombine.low %v4991_v21, %v4998_v51  ;;  %v11042_v41 = vcombine.high %v4991_v21, %v4998_v51  ;;  %v5576_v37 = vld [vmem:[#allocation8 + $0x78] sm:$0xff]  ;;  %v5579_v40 = vld [vmem:[#allocation8 + $0xd0] sm:$0xff]  ;;  %v5581_v21 = vld [vmem:[#allocation8 + $0x120] sm:$0xff] }
 0x78a   : > { %v5158_v28 = vrot.slane %v11036_v55, %v13355_v39  ;;  %v5174_v43 = vrot.slane %v11038_v42, %v13355_v39  ;;  %v5190_v52 = vrot.slane %v11040_v53, %v13355_v39  ;;  %v5206_v54 = vrot.slane %v11042_v41, %v13355_v39 }
 0x78b   : > { %v11977_v42 = vpack.c.bf16 %v5576_v37, %v5574_v35  ;;  %v11979_v41 = vpack.c.bf16 %v5581_v21, %v5579_v40  ;;  %v12320_v40 = vld [vmem:[%s14236_s12] sm:$0xff]  ;;  %s14237_s12 = smov 8  }
 0x78c   : > { %v5223_v38 = vcombine.low %v5158_v28, %v5174_v43  ;;  %v5255_v25 = vcombine.low %v5190_v52, %v5206_v54  ;;  %v5224_v57 = vcombine.high %v5158_v28, %v5174_v43  ;;  %v5256_v26 = vcombine.high %v5190_v52, %v5206_v54  ;;  %v5578_v28 = vld [vmem:[#allocation8 + $0xc8] sm:$0xff]  ;;  %v5580_v43 = vld [vmem:[#allocation8 + $0x118] sm:$0xff]  ;;  %v5583_v54 = vld [vmem:[#allocation8 + $0x170] sm:$0xff] }
 0x78d   : > { %v11981_v58 = vpack.c.bf16 %v5580_v43, %v5578_v28  ;;  %v5485_v28 = vld [vmem:[#allocation8 + $0xc0] sm:$0xff] }
 0x78e   : > { %v5231_v59 = vrot.slane %v5223_v38, %v13362_v33  ;;  %v5263_v63 = vrot.slane %v5255_v25, %v13362_v33  ;;  %v5238_v4 = vrot.slane %v5224_v57, %v13362_v33  ;;  %v5270_v36 = vrot.slane %v5256_v26, %v13362_v33  ;;  %v5582_v25 = vld [vmem:[#allocation8 + $0x168] sm:$0xff]  ;;  %v5584_v57 = vld [vmem:[#allocation8 + $0x1b8] sm:$0xff]  ;;  %v5587_v26 = vld [vmem:[#allocation8 + $0x210] sm:$0xff] }
 0x78f   : > { %v11983_v38 = vpack.c.bf16 %v5585_v9, %v5583_v54  ;;  %v5487_v9 = vld [vmem:[#allocation8 + $0x160] sm:$0xff] }
 0x790   : > { %v5276_v61 = vcombine.high %v5231_v59, %v5263_v63  ;;  %v5275_v62 = vcombine.low %v5231_v59, %v5263_v63  ;;  %v5278_v3 = vcombine.high %v5238_v4, %v5270_v36  ;;  %v5277_v6 = vcombine.low %v5238_v4, %v5270_v36  ;;  %v5591_v4 = vld [vmem:[#allocation8 + $0x2b0] sm:$0xff]  ;;  %v5593_v36 = vld [vmem:[#allocation8 + $0x300] sm:$0xff] }
 0x791   : > { %v11985_v59 = vpack.c.bf16 %v5584_v57, %v5582_v25  ;;  %v11987_v63 = vpack.c.bf16 %v5589_v60, %v5587_v26  ;;  %v13508_v25 = vand.u32 127, %v323_v13 }
 0x792   : > { %5328 = vrot.lane.b32.xlu1 %v5276_v61, %s12559_s24  ;;  %5324 = vrot.lane.b32.xlu0 %v5275_v62, %s12561_s9  ;;  %v5586_v61 = vld [vmem:[#allocation8 + $0x208] sm:$0xff]  ;;  %v5588_v62 = vld [vmem:[#allocation8 + $0x258] sm:$0xff] }
 0x796   : > { %5336 = vrot.lane.b32.xlu1 %v5278_v3, %s12560_s23  ;;  %5332 = vrot.lane.b32.xlu0 %v5277_v6, %s12562_s6  ;;  %v11989_v3 = vpack.c.bf16 %v5588_v62, %v5586_v61  ;;  %v11991_v6 = vpack.c.bf16 %v5593_v36, %v5591_v4  ;;  %v5489_v62 = vld [vmem:[#allocation8 + $0x200] sm:$0xff]  ;;  %v5490_v4 = vld [vmem:[#allocation8 + $0x250] sm:$0xff] }
 0x797   : > { %v11961_v36 = vpack.c.bf16 %v5490_v4, %v5489_v62 }
 0x79a   : > { %v5285_v10 = vpop.permute.xlu0 %5284  ;;  %v5313_v44 = vpop.permute.xlu1 %5312 }
 0x79b   : > { %v5341_v17 = vsel %vm5340_vm2, %v5339_v56, %v5285_v10 }
 0x79c   : > { %v5343_v2 = vsel %vm5342_vm3, %v5341_v17, %v5289_v29  ;;  %v5592_v29 = vld [vmem:[#allocation8 + $0x2f8] sm:$0xff]  ;;  %v5594_v17 = vld [vmem:[#allocation8 + $0x348] sm:$0xff] }
 0x79d   : > { %v5345_v22 = vsel %vm5344_vm4, %v5343_v2, %v5293_v49  ;;  %v5597_v49 = vld [vmem:[#allocation8 + $0x3a0] sm:$0xff]  ;;  %v11993_v10 = vpack.c.bf16 %v5592_v29, %v5590_v5  ;;  %v5599_v2 = vld [vmem:[#allocation8 + $0x3f0] sm:$0xff] }
 0x79e   : > { %v5301_v48 = vpop.permute.xlu0 %5300  ;;  %v5347_v19 = vsel %vm5346_vm5, %v5345_v22, %v5297_v34  ;;  %v5321_v45 = vpop.permute.xlu1 %5320  ;;  %v11995_v56 = vpack.c.bf16 %v5597_v49, %v5595_v7  ;;  %v5596_v34 = vld [vmem:[#allocation8 + $0x398] sm:$0xff]  ;;  %v5493_v29 = vld [vmem:[#allocation8 + $0x340] sm:$0xff]  ;;  %v5494_v7 = vld [vmem:[#allocation8 + $0x390] sm:$0xff] }
 0x79f   : > { %v5349_v50 = vsel %vm5348_vm6, %v5347_v19, %v5301_v48  ;;  %v5601_v48 = vld [vmem:[#allocation8 + $0x440] sm:$0xff]  ;;  %v11997_v22 = vpack.c.bf16 %v5596_v34, %v5594_v17  ;;  %v5598_v19 = vld [vmem:[#allocation8 + $0x3e8] sm:$0xff]  ;;  %v5496_v17 = vld [vmem:[#allocation8 + $0x430] sm:$0xff] }
 0x7a0   : > { %v5351_v20 = vsel %vm5350_vm7, %v5349_v50, %v5305_v12  ;;  %v11999_v12 = vpack.c.bf16 %v5601_v48, %v5599_v2  ;;  %v5603_v50 = vld [vmem:[#allocation8 + $0x490] sm:$0xff]  ;;  %v5497_v48 = vld [vmem:[#allocation8 + $0x480] sm:$0xff] }
 0x7a2   : > { %v5309_v47 = vpop.permute.xlu0 %5308 }
 0x7a3   : > { %v5353_v8 = vsel %vm5352_vm8, %v5351_v20, %v5309_v47  ;;  %v5600_v47 = vld [vmem:[#allocation8 + $0x438] sm:$0xff] }
 0x7a4   : > { %v5355_v30 = vsel %vm5354_vm9, %v5353_v8, %v5313_v44  ;;  %v5605_v44 = vld [vmem:[#allocation8 + $0x4e0] sm:$0xff]  ;;  %v12001_v20 = vpack.c.bf16 %v5600_v47, %v5598_v19 }
 0x7a5   : > { %v12003_v8 = vpack.c.bf16 %v5605_v44, %v5603_v50 }
 0x7a6   : > { %v5317_v24 = vpop.permute.xlu0 %5316 }
 0x7a7   : > { %v5357_v11 = vsel %vm5356_vm10, %v5355_v30, %v5317_v24  ;;  %v5602_v24 = vld [vmem:[#allocation8 + $0x488] sm:$0xff]  ;;  %v5604_v30 = vld [vmem:[#allocation8 + $0x4d8] sm:$0xff] }
 0x7a8   : > { %v5359_v46 = vsel %vm5358_vm11, %v5357_v11, %v5321_v45  ;;  %v12005_v45 = vpack.c.bf16 %v5604_v30, %v5602_v24  ;;  %v319_v11 = vld [vmem:[%s274_s15] sm:$0xff]  ;;  %s11108_s15 = sshll.u32 %s12628_s22, 7  ;;  %s12576_s22 = smov [#allocation11]  }
 0x7a9   : > { %v322_v30 = vld [vmem:[#allocation10 + $0x8] sm:$0xff] }
 0x804   : > { %v5329_v16 = vpop.permute.xlu1 %5328  ;;  %v5325_v18 = vpop.permute.xlu0 %5324 }
 0x805   : > { %v5361_v31 = vsel %vm5360_vm12, %v5359_v46, %v5325_v18  ;;  %v5386_v46 = vsub.s32 3, %v12864_v14 }
 0x806   : > { %v5363_v32 = vsel %vm5362_vm13, %v5361_v31, %v5329_v16  ;;  %v13476_v16 = vld [vmem:[#allocation10] sm:$0xff] }
 0x807   : > { %v5387_v18 = vrot.slane %v13476_v16, %v5386_v46 }
 0x808   : > { %v5337_v51 = vpop.permute.xlu1 %5336  ;;  %v5333_v55 = vpop.permute.xlu0 %5332 }
 0x809   : > { %v5365_v53 = vsel %vm5364_vm14, %v5363_v32, %v5333_v55 }
 0x80a   : > { %v5367_v52 = vsel %vm14217_vm15, %v5365_v53, %v5337_v51  ;;  %v5679_v51 = vsub.s32 5, %v12864_v14  ;;  %v5483_v53 = vld [vmem:[#allocation8 + $0x20] sm:$0xff]  ;;  %vm325_vm15 = vcmp.lt.s32.totalorder %v13508_v25, 32 }
 0x80b   : > { %11569 = vmatmul.mubr.f32.vlgmr.msra.gmra.mrb[26].mxu0 %v5367_v52  ;;  %v5486_v52 = vld [vmem:[#allocation8 + $0x110] sm:$0xff] }
 0x80c   : > { %11978 = vmatpush1.bf16.msra.mxu0 %v11977_v42  ;;  %5670 = vmatprep.mubr.f32.mxu0 %v12556_v0  ;;  %v5680_v32 = vrot.slane %v13476_v16, %v5679_v51  ;;  %v11955_v54 = vpack.c.bf16 %v5486_v52, %v5485_v28  ;;  %v5501_v52 = vsub.s32 4, %v12864_v14 }
 0x80d   : > { %11980 = vmatprep.subr.bf16.mxu0 %v11979_v41  ;;  %v5484_v41 = vld [vmem:[#allocation8 + $0x70] sm:$0xff] }
 0x80e   : > { %v11952_v43 = vpack.c.bf16 %v5484_v41, %v5483_v53 }
 0x810   : > { %11982 = vmatpush1.bf16.msra.mxu0 %v11981_v58  ;;  %11953 = vmatpush3.bf16.msra.mxu1 %v11952_v43  ;;  %v5488_v58 = vld [vmem:[#allocation8 + $0x1b0] sm:$0xff] }
 0x811   : > { %11984 = vmatprep.subr.bf16.mxu0 %v11983_v38  ;;  %11954 = vmatprep.subr.bf16.mxu1 %v12557_v1  ;;  %v11958_v38 = vpack.c.bf16 %v5488_v58, %v5487_v9 }
 0x814   : > { %11986 = vmatpush1.bf16.msra.mxu0 %v11985_v59  ;;  %11956 = vmatpush3.bf16.msra.mxu1 %v11955_v54  ;;  %v5502_v54 = vrot.slane %v13476_v16, %v5501_v52 }
 0x815   : > { %11988 = vmatprep.subr.bf16.mxu0 %v11987_v63  ;;  %11957 = vmatprep.subr.bf16.mxu1 %v12557_v1 }
 0x818   : > { %11990 = vmatpush1.bf16.msra.mxu0 %v11989_v3  ;;  %11959 = vmatpush3.bf16.msra.mxu1 %v11958_v38  ;;  %v5491_v3 = vld [vmem:[#allocation8 + $0x2a0] sm:$0xff] }
 0x819   : > { %11992 = vmatprep.subr.bf16.mxu0 %v11991_v6  ;;  %11960 = vmatprep.subr.bf16.mxu1 %v12557_v1  ;;  %v5492_v6 = vld [vmem:[#allocation8 + $0x2f0] sm:$0xff] }
 0x81a   : > { %v11964_v5 = vpack.c.bf16 %v5492_v6, %v5491_v3 }
 0x81c   : > { %11994 = vmatpush1.bf16.msra.mxu0 %v11993_v10  ;;  %11962 = vmatpush3.bf16.msra.mxu1 %v11961_v36  ;;  %v11967_v10 = vpack.c.bf16 %v5494_v7, %v5493_v29 }
 0x81d   : > { %11996 = vmatprep.subr.bf16.mxu0 %v11995_v56  ;;  %11963 = vmatprep.subr.bf16.mxu1 %v12557_v1  ;;  %v5495_v56 = vld [vmem:[#allocation8 + $0x3e0] sm:$0xff] }
 0x81e   : > { %v11970_v2 = vpack.c.bf16 %v5496_v17, %v5495_v56 }
 0x820   : > { %11998 = vmatpush1.bf16.msra.mxu0 %v11997_v22  ;;  %11965 = vmatpush3.bf16.msra.mxu1 %v11964_v5  ;;  %v5498_v22 = vld [vmem:[#allocation8 + $0x4d0] sm:$0xff] }
 0x821   : > { %12000 = vmatprep.subr.bf16.mxu0 %v11999_v12  ;;  %11966 = vmatprep.subr.bf16.mxu1 %v12557_v1  ;;  %v11973_v12 = vpack.c.bf16 %v5498_v22, %v5497_v48 }
 0x824   : > { %12002 = vmatpush1.bf16.msra.mxu0 %v12001_v20  ;;  %11968 = vmatpush3.bf16.msra.mxu1 %v11967_v10 }
 0x825   : > { %12004 = vmatprep.subr.bf16.mxu0 %v12003_v8  ;;  %11969 = vmatprep.subr.bf16.mxu1 %v12557_v1 }
 0x828   : > { %12006 = vmatpush1.bf16.msra.mxu0 %v12005_v45  ;;  %11971 = vmatpush3.bf16.msra.mxu1 %v11970_v2 }
 0x829   : > { %11646 = vmatprep.subr.mxu0 %v12556_v0  ;;  %11972 = vmatprep.subr.bf16.mxu1 %v12557_v1 }
 0x82b   : > { %5671 = vmatmul.mubr.f32.vlgmr.msra.gmra.mrb[28].mxu0 %v319_v11 }
 0x82c   : > { %11648 = vmatprep.mubr.msk.f32.mxu0 %vm12558_vm0, %v12556_v0  ;;  %11974 = vmatpush3.bf16.msra.mxu1 %v11973_v12 }
 0x82d   : > { %11606 = vmatprep.subr.mxu1 %v12556_v0 }
 0x8de   : > { %v5454_v31 = vpop.f32.mrb[26].mxu0 }
 0x8df   : > { %v5455_v35 = vadd.f32 %v5454_v31, %v5387_v18  ;;  %v11570_v37 = vpop.f32.mrb[27].mxu0  ;;  %v5476_v18 = vrot.slane %v322_v30, %v528_v27 }
 0x8e1   : > { %v5458_v21 = vadd.f32 %v12320_v40, %v5455_v35  ;;  %v5481_v35 = vrot.slane %v322_v30, %v5386_v46 }
 0x8e3   : > { %5459 = vadd.xlane.f32.xlu0 %v5458_v21 }
 0x8fe   : > { %v5672_v55 = vpop.f32.mrb[28].mxu0 }
 0x8ff   : > { %v13487_v42 = vadd.f32 %v5680_v32, %v5672_v55  ;;  %v5674_v19 = vpop.f32.mrb[29].mxu0 }
 0x901   : > { %5719 = vrot.lane.b32.xlu0 %v13487_v42, %s12560_s23 }
 0x905   : > { %5725 = vrot.lane.b32.xlu0 %v13487_v42, %s12559_s24 }
 0x909   : > { %5731 = vrot.lane.b32.xlu0 %v13487_v42, %s12564_s14 }
 0x90d   : > { %5737 = vrot.lane.b32.xlu0 %v13487_v42, %s12566_s8 }
 0x911   : > { %5743 = vrot.lane.b32.xlu0 %v13487_v42, %s12568_s13 }
 0x915   : > { %5749 = vrot.lane.b32.xlu0 %v13487_v42, %s12570_s10 }
 0x919   : > { %5752 = vrot.lane.b32.xlu0 %v13487_v42, %s12572_s30 }
 0x937   : > { %5810 = vxpose.xlu0.b32.start.end [1/1] (short) (narrow) %v13487_v42, 8 }
 0x970   : > { %v5460_v57 = vpop.xlane.xlu0 %5459 }
 0x971   : > { %v5461_v26 = vmul.f32 0.03125, %v5460_v57  ;;  %v5684_v57 = vsub.s32 6, %v12864_v14 }
 0x973   : > { %v5462_v60 = vsub.f32 %v5458_v21, %v5461_v26  ;;  %v5685_v26 = vrot.slane %v13476_v16, %v5684_v57 }
 0x974   : > { %v13513_v61 = vpop.permute.xlu0 %5719 }
 0x975   : > { %v5465_v59 = vsel %vm325_vm15, %v5462_v60, 0.0  ;;  %v13589_v60 = vadd.f32 %v5685_v26, %v5674_v19 }
 0x976   : > { %v5466_v63 = vmul.f32 %v5465_v59, %v5465_v59 }
 0x978   : > { %5467 = vadd.xlane.f32.xlu1 %v5466_v63  ;;  %v5726_v13 = vpop.permute.xlu0 %5725 }
 0x979   : > { %5906 = vxpose.xlu0.b32.start.end [1/1] (short) (narrow) %v5726_v13, 8 }
 0x97c   : > { %v5732_v49 = vpop.permute.xlu0 %5731 }
 0x97d   : > { %5970 = vxpose.xlu0.b32.start.end [1/1] (short) (narrow) %v5732_v49, 8 }
 0x980   : > { %v5738_v34 = vpop.permute.xlu0 %5737 }
 0x981   : > { %6034 = vxpose.xlu0.b32.start.end [1/1] (short) (narrow) %v5738_v34, 8 }
 0x984   : > { %v5744_v24 = vpop.permute.xlu0 %5743 }
 0x988   : > { %v5750_v11 = vpop.permute.xlu0 %5749 }
 0x989   : > { %5722 = vrot.lane.b32.xlu1 %v13487_v42, %s12562_s6 }
 0x98c   : > { %v5753_v32 = vpop.permute.xlu0 %5752 }
 0x98d   : > { %5728 = vrot.lane.b32.xlu1 %v13487_v42, %s12561_s9 }
 0x991   : > { %5734 = vrot.lane.b32.xlu1 %v13487_v42, %s12563_s7 }
 0x995   : > { %5740 = vrot.lane.b32.xlu1 %v13487_v42, %s12565_s2 }
 0x999   : > { %5746 = vrot.lane.b32.xlu1 %v13487_v42, %s12567_s11 }
 0x99d   : > { %5755 = vrot.lane.b32.xlu1 %v13487_v42, %s12569_s17 }
 0x9a1   : > { %5758 = vrot.lane.b32.xlu1 %v13487_v42, %s12571_s26 }
 0x9b7   : > { %v5826_v41 = vpop.trf.xlu0 }
 0x9f9   : > { %v13550_v27 = vpop.trf.xlu0 }
 0x9fd   : > { %v13552_v46 = vpop.trf.xlu0 }
 0xa01   : > { %v13554_v28 = vpop.trf.xlu0 }
 0xa05   : > { %v5468_v47 = vpop.xlane.xlu1 %5467 }
 0xa06   : > { %v5469_v50 = vmul.f32 0.03125, %v5468_v47 }
 0xa08   : > { %v5470_v44 = vadd.f32 1e-05, %v5469_v50 }
 0xa09   : > { %v13534_v20 = vpop.permute.xlu1 %5722 }
 0xa0a   : > { %12249 = vrsqrt.f32 %v5470_v44 }
 0xa0d   : > { %v13536_v8 = vpop.permute.xlu1 %5728 }
 0xa11   : > { %v5735_v45 = vpop.permute.xlu1 %5734 }
 0xa14   : > { %v12250_v31 = vpop.eup %12249 }
 0xa15   : > { %v5741_v37 = vpop.permute.xlu1 %5740  ;;  %v5472_v40 = vmul.f32 %v12250_v31, %v5465_v59 }
 0xa16   : > { %6066 = vxpose.xlu0.b32.start.end [1/1] (short) (narrow) %v5741_v37, 8 }
 0xa17   : > { %v5477_v21 = vmul.f32 %v5476_v18, %v5472_v40 }
 0xa19   : > { %v13542_v55 = vadd.f32 %v5481_v35, %v5477_v21  ;;  %v5747_v53 = vpop.permute.xlu1 %5746 }
 0xa1a   : > { %6098 = vxpose.xlu0.b32.start.end [1/1] (short) (narrow) %v5744_v24, 8 }
 0xa1b   : > { %11604 = vmatmul.mubr.f32.vlgmr.msra.gmra.mrb[42].mxu1 %v13542_v55 }
 0xa1c   : > { %11607 = vmatpush3.msra.mxu1 %v5826_v41  ;;  %11608 = vmatprep.mubr.msk.f32.mxu1 %vm12558_vm0, %v12556_v0 }
 0xa1d   : > { %11611 = vmatprep.subr.mxu1 %v12556_v0  ;;  %v5756_v59 = vpop.permute.xlu1 %5755 }
 0xa1e   : > { %6130 = vxpose.xlu0.b32.start.end [1/1] (short) (narrow) %v5747_v53, 8 }
 0xa21   : > { %v5759_v13 = vpop.permute.xlu1 %5758 }
 0xa22   : > { %6162 = vxpose.xlu0.b32.start.end [1/1] (short) (narrow) %v5750_v11, 8 }
 0xa26   : > { %6194 = vxpose.xlu0.b32.start.end [1/1] (short) (narrow) %v5753_v32, 8 }
 0xa4f   : > { %5761 = vrot.lane.b32.xlu0 %v13487_v42, %s14237_s12 }
 0xa96   : > { %v6082_v43 = vpop.trf.xlu0 }
 0xa97   : > { %11647 = vmatpush3.msra.mxu0 %v6082_v43 }
 0xa98   : > { %11656 = vmatprep.subr.mxu0 %v12556_v0 }
 0xa9a   : > { %v13597_v63 = vpop.trf.xlu0 }
 0xa9e   : > { %v6146_v62 = vpop.trf.xlu0 }
 0xaa2   : > { %v13604_v16 = vpop.trf.xlu0 }
 0xaa6   : > { %v6210_v4 = vpop.trf.xlu0 }
 0xac1   : > { %v5762_v36 = vpop.permute.xlu0 %5761 }
 0xaee   : > { %v5569_v9 = vpop.f32.mrb[42].mxu1 }
 0xaef   : > { %v5570_v58 = vadd.f32 %v5569_v9, %v5502_v54  ;;  %v11605_v38 = vpop.f32.mrb[43].mxu1 }
 0xaf1   : > { %v13561_v42 = vmul.f32 0.35355338, %v5570_v58 }
 0xaf3   : > { %5688 = vrot.lane.b32.xlu1 %v13561_v42, %s12560_s23  ;;  %5690 = vrot.lane.b32.xlu0 %v13561_v42, %s12562_s6 }
 0xaf4   : > { %11609 = vmatmul.mubr.msk.f32.vlgmr.msra.gmra.mrb[44].mxu1 %vm1166_vm1, %v13561_v42 }
 0xaf5   : > { %11613 = vmatprep.mubr.msk.f32.mxu1 %vm12558_vm0, %v12556_v0 }
 0xaf7   : > { %5692 = vrot.lane.b32.xlu1 %v13561_v42, %s12559_s24  ;;  %5694 = vrot.lane.b32.xlu0 %v13561_v42, %s12561_s9 }
 0xafb   : > { %5696 = vrot.lane.b32.xlu1 %v13561_v42, %s12564_s14 }
 0xaff   : > { %5698 = vrot.lane.b32.xlu1 %v13561_v42, %s12563_s7 }
 0xb03   : > { %5702 = vrot.lane.b32.xlu1 %v13561_v42, %s12565_s2 }
 0xb07   : > { %5706 = vrot.lane.b32.xlu1 %v13561_v42, %s12567_s11 }
 0xb0b   : > { %5708 = vrot.lane.b32.xlu1 %v13561_v42, %s12570_s10 }
 0xb0f   : > { %5765 = vrot.lane.b32.xlu1 %v13589_v60, %s12560_s23 }
 0xb13   : > { %5771 = vrot.lane.b32.xlu1 %v13589_v60, %s12559_s24 }
 0xb15   : > { %6226 = vxpose.xlu0.b32.start.end [1/1] (short) (narrow) %v5756_v59, 8 }
 0xb17   : > { %5777 = vrot.lane.b32.xlu1 %v13589_v60, %s12564_s14 }
 0xb3e   : > { %5700 = vrot.lane.b32.xlu0 %v13561_v42, %s12566_s8 }
 0xb40   : > { %5842 = vxpose.xlu1.b32.start.end [1/1] (short) (narrow) %v13513_v61, 8 }
 0xb42   : > { %5704 = vrot.lane.b32.xlu0 %v13561_v42, %s12568_s13 }
 0xb44   : > { %5874 = vxpose.xlu1.b32.start.end [1/1] (short) (narrow) %v13534_v20, 8 }
 0xb46   : > { %5710 = vrot.lane.b32.xlu0 %v13561_v42, %s12572_s30 }
 0xb48   : > { %5938 = vxpose.xlu1.b32.start.end [1/1] (short) (narrow) %v13536_v8, 8 }
 0xb4c   : > { %6002 = vxpose.xlu1.b32.start.end [1/1] (short) (narrow) %v5735_v45, 8 }
 0xb50   : > { %6290 = vxpose.xlu1.b32.start.end [1/1] (short) (narrow) %v5762_v36, 8 }
 0xb64   : > { %6258 = vxpose.xlu0.b32.start.end [1/1] (short) (narrow) %v5759_v13, 8 }
 0xb65   : > { %v5689_v3 = vpop.permute.xlu1 %5688  ;;  %v5691_v56 = vpop.permute.xlu0 %5690 }
 0xb69   : > { %v5693_v61 = vpop.permute.xlu1 %5692  ;;  %v5695_v17 = vpop.permute.xlu0 %5694 }
 0xb6d   : > { %v5697_v6 = vpop.permute.xlu1 %5696 }
 0xb71   : > { %v5699_v5 = vpop.permute.xlu1 %5698 }
 0xb75   : > { %v5703_v29 = vpop.permute.xlu1 %5702 }
 0xb76   : > { %11649 = vmatmul.mubr.msk.f32.vlgmr.msra.gmra.mrb[30].mxu0 %vm1166_vm1, %v5703_v29 }
 0xb77   : > { %11657 = vmatpush3.msra.mxu0 %v6146_v62  ;;  %11658 = vmatprep.mubr.msk.f32.mxu0 %vm12558_vm0, %v12556_v0 }
 0xb78   : > { %11666 = vmatprep.subr.mxu0 %v12556_v0 }
 0xb79   : > { %v5707_v7 = vpop.permute.xlu1 %5706 }
 0xb7a   : > { %11659 = vmatmul.mubr.msk.f32.vlgmr.msra.gmra.mrb[32].mxu0 %vm1166_vm1, %v5707_v7 }
 0xb7b   : > { %11667 = vmatpush3.msra.mxu0 %v6210_v4  ;;  %11668 = vmatprep.mubr.msk.f32.mxu0 %vm12558_vm0, %v12556_v0 }
 0xb7c   : > { %11676 = vmatprep.subr.mxu0 %v12556_v0 }
 0xb7d   : > { %v5709_v49 = vpop.permute.xlu1 %5708 }
 0xb81   : > { %v5766_v10 = vpop.permute.xlu1 %5765 }
 0xb82   : > { %7682 = vxpose.xlu1.b32.start.end [1/1] (short) (narrow) %v5766_v10, 8 }
 0xb85   : > { %v5772_v22 = vpop.permute.xlu1 %5771 }
 0xb89   : > { %v5778_v19 = vpop.permute.xlu1 %5777 }
 0xb8d   : > { %5768 = vrot.lane.b32.xlu0 %v13589_v60, %s12562_s6 }
 0xb91   : > { %5774 = vrot.lane.b32.xlu0 %v13589_v60, %s12561_s9 }
 0xb95   : > { %5780 = vrot.lane.b32.xlu0 %v13589_v60, %s12563_s7  ;;  %v6242_v34 = vpop.trf.xlu0 }
 0xbb0   : > { %v5701_v2 = vpop.permute.xlu0 %5700 }
 0xbb3   : > { %7650 = vxpose.xlu0.b32.start.end [1/1] (short) (narrow) %v13589_v60, 8 }
 0xbb4   : > { %v5705_v48 = vpop.permute.xlu0 %5704 }
 0xbb8   : > { %v5711_v12 = vpop.permute.xlu0 %5710 }
 0xbb9   : > { %11669 = vmatmul.mubr.msk.f32.vlgmr.msra.gmra.mrb[34].mxu0 %vm1166_vm1, %v5711_v12 }
 0xbba   : > { %11678 = vmatprep.mubr.msk.f32.mxu0 %vm12558_vm0, %v12556_v0 }
 0xbc0   : > { %v5858_v47 = vpop.trf.xlu1 }
 0xbc1   : > { %11612 = vmatpush3.msra.mxu1 %v5858_v47 }
 0xbc2   : > { %11614 = vmatmul.mubr.msk.f32.vlgmr.msra.gmra.mrb[46].mxu1 %vm1166_vm1, %v5689_v3  ;;  %11616 = vmatprep.subr.mxu1 %v12556_v0 }
 0xbc3   : > { %11618 = vmatprep.mubr.msk.f32.mxu1 %vm12558_vm0, %v12556_v0 }
 0xbc4   : > { %v5890_v50 = vpop.trf.xlu1 }
 0xbc5   : > { %11617 = vmatpush3.msra.mxu1 %v5890_v50 }
 0xbc6   : > { %11619 = vmatmul.mubr.msk.f32.vlgmr.msra.gmra.mrb[48].mxu1 %vm1166_vm1, %v5691_v56  ;;  %11621 = vmatprep.subr.mxu1 %v12556_v0 }
 0xbc7   : > { %v13634_v44 = vpop.f32.mrb[44].mxu1  ;;  %11622 = vmatpush3.msra.mxu1 %v13550_v27  ;;  %11623 = vmatprep.mubr.msk.f32.mxu1 %vm12558_vm0, %v12556_v0 }
 0xbc8   : > { %v11610_v20 = vpop.f32.mrb[45].mxu1  ;;  %11626 = vmatprep.subr.mxu1 %v12556_v0  ;;  %v5954_v8 = vpop.trf.xlu1 }
 0xbca   : > { %11624 = vmatmul.mubr.msk.f32.vlgmr.msra.gmra.mrb[50].mxu1 %vm1166_vm1, %v5693_v61 }
 0xbcb   : > { %11627 = vmatpush3.msra.mxu1 %v5954_v8  ;;  %11628 = vmatprep.mubr.msk.f32.mxu1 %vm12558_vm0, %v12556_v0 }
 0xbcc   : > { %11631 = vmatprep.subr.mxu1 %v12556_v0  ;;  %v6018_v24 = vpop.trf.xlu1 }
 0xbce   : > { %11629 = vmatmul.mubr.msk.f32.vlgmr.msra.gmra.mrb[52].mxu1 %vm1166_vm1, %v5695_v17 }
 0xbcf   : > { %11632 = vmatpush3.msra.mxu1 %v13552_v46  ;;  %11633 = vmatprep.mubr.msk.f32.mxu1 %vm12558_vm0, %v12556_v0 }
 0xbd0   : > { %11636 = vmatprep.subr.mxu1 %v12556_v0  ;;  %v6306_v21 = vpop.trf.xlu1 }
 0xbd2   : > { %11634 = vmatmul.mubr.msk.f32.vlgmr.msra.gmra.mrb[54].mxu1 %vm1166_vm1, %v5697_v6 }
 0xbd3   : > { %11637 = vmatpush3.msra.mxu1 %v6018_v24  ;;  %11638 = vmatprep.mubr.msk.f32.mxu1 %vm12558_vm0, %v12556_v0 }
 0xbd4   : > { %11641 = vmatprep.subr.mxu1 %v12556_v0 }
 0xbd6   : > { %11639 = vmatmul.mubr.msk.f32.vlgmr.msra.gmra.mrb[56].mxu1 %vm1166_vm1, %v5699_v5 }
 0xbd7   : > { %11642 = vmatpush3.msra.mxu1 %v13554_v28  ;;  %11643 = vmatprep.mubr.msk.f32.mxu1 %vm12558_vm0, %v12556_v0 }
 0xbd8   : > { %11651 = vmatprep.subr.mxu1 %v12556_v0 }
 0xbda   : > { %11644 = vmatmul.mubr.msk.f32.vlgmr.msra.gmra.mrb[58].mxu1 %vm1166_vm1, %v5701_v2 }
 0xbdb   : > { %11652 = vmatpush3.msra.mxu1 %v13597_v63  ;;  %11653 = vmatprep.mubr.msk.f32.mxu1 %vm12558_vm0, %v12556_v0 }
 0xbdc   : > { %11661 = vmatprep.subr.mxu1 %v12556_v0 }
 0xbde   : > { %11654 = vmatmul.mubr.msk.f32.vlgmr.msra.gmra.mrb[60].mxu1 %vm1166_vm1, %v5705_v48 }
 0xbdf   : > { %11662 = vmatpush3.msra.mxu1 %v13604_v16  ;;  %11663 = vmatprep.mubr.msk.f32.mxu1 %vm12558_vm0, %v12556_v0 }
 0xbe0   : > { %11671 = vmatprep.subr.mxu1 %v12556_v0 }
 0xbe2   : > { %11664 = vmatmul.mubr.msk.f32.vlgmr.msra.gmra.mrb[62].mxu1 %vm1166_vm1, %v5709_v49 }
 0xbe3   : > { %11672 = vmatpush3.msra.mxu1 %v6242_v34  ;;  %11673 = vmatprep.mubr.msk.f32.mxu1 %vm12558_vm0, %v12556_v0 }
 0xbe4   : > { %v6274_v30 = vpop.trf.xlu0  ;;  %11681 = vmatprep.subr.mxu1 %v12556_v0 }
 0xbe5   : > { %11677 = vmatpush3.msra.mxu0 %v6274_v30 }
 0xbe6   : > { %11686 = vmatprep.subr.mxu0 %v12556_v0 }
 0xbff   : > { %v5769_v45 = vpop.permute.xlu0 %5768 }
 0xc00   : > { %7714 = vxpose.xlu0.b32.start.end [1/1] (short) (narrow) %v5769_v45, 8 }
 0xc02   : > { %v13685_v32 = vpop.trf.xlu1 }
 0xc03   : > { %v5775_v11 = vpop.permute.xlu0 %5774 }
 0xc04   : > { %7778 = vxpose.xlu1.b32.start.end [1/1] (short) (narrow) %v5775_v11, 8  ;;  %7746 = vxpose.xlu0.b32.start.end [1/1] (short) (narrow) %v5772_v22, 8  ;;  %v7474_v22 = vsel %vm1166_vm1, %v13634_v44, -inf }
 0xc07   : > { %v5781_v18 = vpop.permute.xlu0 %5780 }
 0xc08   : > { %7842 = vxpose.xlu1.b32.start.end [1/1] (short) (narrow) %v5781_v18, 8  ;;  %7810 = vxpose.xlu0.b32.start.end [1/1] (short) (narrow) %v5778_v19, 8 }
 0xc26   : > { %5783 = vrot.lane.b32.xlu1 %v13589_v60, %s12566_s8 }
 0xc2a   : > { %5712 = vrot.lane.b32.xlu1 %v13561_v42, %s12569_s17 }
 0xc2e   : > { %5714 = vrot.lane.b32.xlu1 %v13561_v42, %s12571_s26 }
 0xc32   : > { %5716 = vrot.lane.b32.xlu1 %v13561_v42, %s14237_s12 }
 0xc49   : > { %v13681_v31 = vpop.f32.mrb[30].mxu0 }
 0xc4a   : > { %v11650_v35 = vpop.f32.mrb[31].mxu0  ;;  %v7498_v42 = vsel %vm1166_vm1, %v13681_v31, -inf }
 0xc4d   : > { %v13683_v37 = vpop.f32.mrb[32].mxu0 }
 0xc4e   : > { %v11660_v40 = vpop.f32.mrb[33].mxu0  ;;  %v7504_v13 = vsel %vm1166_vm1, %v13683_v37, -inf }
 0xc84   : > { %v13689_v41 = vpop.trf.xlu1 }
 0xc88   : > { %v13691_v46 = vpop.trf.xlu1 }
 0xc8c   : > { %v13687_v53 = vpop.f32.mrb[34].mxu0 }
 0xc8d   : > { %v11670_v27 = vpop.f32.mrb[35].mxu0  ;;  %v7510_v5 = vsel %vm1166_vm1, %v13687_v53, -inf }
 0xc95   : > { %v13693_v28 = vpop.f32.mrb[46].mxu1 }
 0xc96   : > { %v11615_v43 = vpop.f32.mrb[47].mxu1  ;;  %v7477_v54 = vsel %vm1166_vm1, %v13693_v28, -inf }
 0xc97   : > { %7478 = vmax.xlane.f32.xlu1 %v7477_v54 }
 0xc98   : > { %v5784_v9 = vpop.permute.xlu1 %5783 }
 0xc99   : > { %v13697_v58 = vpop.f32.mrb[48].mxu1  ;;  %7874 = vxpose.xlu0.b32.start.end [1/1] (short) (narrow) %v5784_v9, 8 }
 0xc9a   : > { %v11620_v38 = vpop.f32.mrb[49].mxu1  ;;  %v7480_v62 = vsel %vm1166_vm1, %v13697_v58, -inf }
 0xc9b   : > { %7499 = vmax.xlane.f32.xlu1 %v7498_v42 }
 0xc9c   : > { %v5713_v26 = vpop.permute.xlu1 %5712 }
 0xc9d   : > { %v13701_v59 = vpop.f32.mrb[50].mxu1  ;;  %11674 = vmatmul.mubr.msk.f32.vlgmr.msra.gmra.mrb[64].mxu1 %vm1166_vm1, %v5713_v26 }
 0xc9e   : > { %11682 = vmatpush3.msra.mxu1 %v6306_v21  ;;  %v11625_v63 = vpop.f32.mrb[51].mxu1  ;;  %11683 = vmatprep.mubr.msk.f32.mxu1 %vm12558_vm0, %v12556_v0  ;;  %v7483_v12 = vsel %vm1166_vm1, %v13701_v59, -inf  ;;  %v13761_v21 = vpop.trf.xlu0 }
 0xc9f   : > { %7481 = vmax.xlane.f32.xlu1 %v7480_v62  ;;  %11691 = vmatprep.subr.mxu1 %v12556_v0 }
 0xca0   : > { %v5715_v16 = vpop.permute.xlu1 %5714 }
 0xca1   : > { %v13709_v4 = vpop.f32.mrb[52].mxu1  ;;  %11679 = vmatmul.mubr.msk.f32.vlgmr.msra.gmra.mrb[36].mxu0 %vm1166_vm1, %v5715_v16 }
 0xca2   : > { %v11630_v36 = vpop.f32.mrb[53].mxu1  ;;  %11688 = vmatprep.mubr.msk.f32.mxu0 %vm12558_vm0, %v12556_v0  ;;  %v7486_v49 = vsel %vm1166_vm1, %v13709_v4, -inf  ;;  %v13771_v26 = vpop.trf.xlu0 }
 0xca3   : > { %7505 = vmax.xlane.f32.xlu1 %v7504_v13 }
 0xca4   : > { %v5717_v3 = vpop.permute.xlu1 %5716 }
 0xca5   : > { %v13716_v61 = vpop.f32.mrb[54].mxu1  ;;  %11684 = vmatmul.mubr.msk.f32.vlgmr.msra.gmra.mrb[66].mxu1 %vm1166_vm1, %v5717_v3 }
 0xca6   : > { %v11635_v6 = vpop.f32.mrb[55].mxu1  ;;  %11693 = vmatprep.mubr.msk.f32.mxu1 %vm12558_vm0, %v12556_v0  ;;  %v7489_v19 = vsel %vm1166_vm1, %v13716_v61, -inf  ;;  %v13779_v13 = vpop.trf.xlu0 }
 0xca7   : > { %7511 = vmax.xlane.f32.xlu1 %v7510_v5 }
 0xca9   : > { %v13723_v29 = vpop.f32.mrb[56].mxu1 }
 0xcaa   : > { %v11640_v7 = vpop.f32.mrb[57].mxu1  ;;  %v7492_v16 = vsel %vm1166_vm1, %v13723_v29, -inf  ;;  %v13781_v3 = vpop.trf.xlu0 }
 0xcab   : > { %7487 = vmax.xlane.f32.xlu1 %v7486_v49 }
 0xcad   : > { %v13727_v10 = vpop.f32.mrb[58].mxu1 }
 0xcae   : > { %v11645_v56 = vpop.f32.mrb[59].mxu1  ;;  %v7495_v47 = vsel %vm1166_vm1, %v13727_v10, -inf }
 0xcb1   : > { %v13729_v17 = vpop.f32.mrb[60].mxu1 }
 0xcb2   : > { %v11655_v34 = vpop.f32.mrb[61].mxu1  ;;  %v7501_v50 = vsel %vm1166_vm1, %v13729_v17, -inf }
 0xcb5   : > { %v13731_v2 = vpop.f32.mrb[62].mxu1 }
 0xcb6   : > { %v11665_v48 = vpop.f32.mrb[63].mxu1  ;;  %v7507_v20 = vsel %vm1166_vm1, %v13731_v2, -inf }
 0xcc2   : > { %5786 = vrot.lane.b32.xlu0 %v13589_v60, %s12565_s2 }
 0xcc6   : > { %5792 = vrot.lane.b32.xlu0 %v13589_v60, %s12567_s11 }
 0xce5   : > { %7475 = vmax.xlane.f32.xlu0 %v7474_v22 }
 0xce9   : > { %7484 = vmax.xlane.f32.xlu0 %v7483_v12 }
 0xced   : > { %7490 = vmax.xlane.f32.xlu0 %v7489_v19 }
 0xcf1   : > { %7496 = vmax.xlane.f32.xlu0 %v7495_v47 }
 0xcf5   : > { %7502 = vmax.xlane.f32.xlu0 %v7501_v50 }
 0xcf9   : > { %7508 = vmax.xlane.f32.xlu0 %v7507_v20 }
 0xd19   : > { %v13783_v6 = vpop.trf.xlu0 }
 0xd24   : > { %v7479_v8 = vpop.xlane.xlu1 %7478 }
 0xd25   : > { %v7523_v56 = vsub.f32 %v13693_v28, %v7479_v8 }
 0xd27   : > { %v7540_v48 = vmul.f32 1.442695, %v7523_v56 }
 0xd28   : > { %v13749_v24 = vpop.xlane.xlu1 %7499 }
 0xd29   : > { %v7530_v30 = vsub.f32 %v13681_v31, %v13749_v24  ;;  %12251 = vpow2.f32 %v7540_v48 }
 0xd2c   : > { %v7482_v45 = vpop.xlane.xlu1 %7481 }
 0xd30   : > { %v13753_v11 = vpop.xlane.xlu1 %7505 }
 0xd31   : > { %v7532_v18 = vsub.f32 %v13683_v37, %v13753_v11 }
 0xd33   : > { %v13793_v19 = vpop.eup %12251 }
 0xd34   : > { %v13757_v35 = vpop.xlane.xlu1 %7511  ;;  %v5787_v5 = vpop.permute.xlu0 %5786  ;;  %v7573_v47 = vsel %vm1166_vm1, %v13793_v19, 0.0 }
 0xd35   : > { %v7534_v40 = vsub.f32 %v13687_v53, %v13757_v35 }
 0xd38   : > { %v13787_v7 = vpop.permute.xlu0 %5792 }
 0xd70   : > { %v13763_v27 = vpop.f32.mrb[64].mxu1 }
 0xd71   : > { %v11675_v43 = vpop.f32.mrb[65].mxu1  ;;  %v7513_v54 = vsel %vm1166_vm1, %v13763_v27, -inf }
 0xd72   : > { %7514 = vmax.xlane.f32.xlu0 %v7513_v54  ;;  %v7476_v49 = vpop.xlane.xlu0 %7475  ;;  %v7488_v43 = vpop.xlane.xlu1 %7487 }
 0xd73   : > { %v7522_v28 = vsub.f32 %v13634_v44, %v7476_v49 }
 0xd74   : > { %v13767_v9 = vpop.f32.mrb[36].mxu0 }
 0xd75   : > { %v11680_v38 = vpop.f32.mrb[37].mxu0  ;;  %v7516_v42 = vsel %vm1166_vm1, %v13767_v9, -inf  ;;  %v7538_v8 = vmul.f32 1.442695, %v7522_v28 }
 0xd76   : > { %7517 = vmax.xlane.f32.xlu1 %v7516_v42  ;;  %v7485_v34 = vpop.xlane.xlu0 %7484  ;;  %v7526_v38 = vsub.f32 %v13709_v4, %v7488_v43 }
 0xd77   : > { %v7525_v22 = vsub.f32 %v13701_v59, %v7485_v34  ;;  %v7524_v59 = vsub.f32 %v13697_v58, %v7482_v45 }
 0xd78   : > { %v13773_v63 = vpop.f32.mrb[66].mxu1  ;;  %v7546_v42 = vmul.f32 1.442695, %v7526_v38 }
 0xd79   : > { %v11685_v62 = vpop.f32.mrb[67].mxu1  ;;  %v7519_v36 = vsel %vm1166_vm1, %v13773_v63, -inf  ;;  %v7544_v12 = vmul.f32 1.442695, %v7525_v22  ;;  %v7542_v54 = vmul.f32 1.442695, %v7524_v59 }
 0xd7a   : > { %7493 = vmax.xlane.f32.xlu1 %v7492_v16  ;;  %7520 = vmax.xlane.f32.xlu0 %v7519_v36  ;;  %v7491_v16 = vpop.xlane.xlu0 %7490 }
 0xd7b   : > { %12253 = vpow2.f32 %v7544_v12  ;;  %v7527_v34 = vsub.f32 %v13716_v61, %v7491_v16 }
 0xd7c   : > { %12255 = vpow2.f32 %v7538_v8 }
 0xd7d   : > { %12257 = vpow2.f32 %v7542_v54 }
 0xd7e   : > { %12259 = vpow2.f32 %v7546_v42  ;;  %v7497_v45 = vpop.xlane.xlu0 %7496 }
 0xd82   : > { %v7503_v49 = vpop.xlane.xlu0 %7502 }
 0xd83   : > { %v7531_v54 = vsub.f32 %v13729_v17, %v7503_v49 }
 0xd85   : > { %v13797_v50 = vpop.eup %12253  ;;  %v7556_v61 = vmul.f32 1.442695, %v7531_v54 }
 0xd86   : > { %v7579_v20 = vsel %vm1166_vm1, %v13797_v50, 0.0  ;;  %v13806_v62 = vpop.eup %12255  ;;  %v7509_v56 = vpop.xlane.xlu0 %7508 }
 0xd87   : > { %v7570_v36 = vsel %vm1166_vm1, %v13806_v62, 0.0  ;;  %v7533_v38 = vsub.f32 %v13731_v2, %v7509_v56 }
 0xd90   : > { %5798 = vrot.lane.b32.xlu0 %v13589_v60, %s12572_s30 }
 0xd94   : > { %5804 = vrot.lane.b32.xlu0 %v13589_v60, %s12571_s26 }
 0xdad   : > { %7906 = vxpose.xlu1.b32.start.end [1/1] (short) (narrow) %v5787_v5, 8  ;;  %v13810_v5 = vpop.eup %12257 }
 0xdae   : > { %v7576_v44 = vsel %vm1166_vm1, %v13810_v5, 0.0  ;;  %v13814_v58 = vpop.eup %12259 }
 0xdaf   : > { %v7582_v4 = vsel %vm1166_vm1, %v13814_v58, 0.0 }
 0xdb3   : > { %7574 = vadd.xlane.f32.xlu0 %v7573_v47  ;;  %v7548_v47 = vmul.f32 1.442695, %v7527_v34 }
 0xdb7   : > { %7580 = vadd.xlane.f32.xlu0 %v7579_v20  ;;  %v7529_v20 = vsub.f32 %v13727_v10, %v7497_v45 }
 0xdb9   : > { %v7552_v43 = vmul.f32 1.442695, %v7529_v20 }
 0xdcb   : > { %5789 = vrot.lane.b32.xlu1 %v13589_v60, %s12568_s13 }
 0xdef   : > { %7571 = vadd.xlane.f32.xlu1 %v7570_v36 }
 0xdf3   : > { %7577 = vadd.xlane.f32.xlu1 %v7576_v44 }
 0xdf7   : > { %7583 = vadd.xlane.f32.xlu1 %v7582_v4 }
 0xdff   : > { %v7515_v48 = vpop.xlane.xlu0 %7514 }
 0xe00   : > { %v7535_v10 = vsub.f32 %v13763_v27, %v7515_v48 }
 0xe02   : > { %v7564_v44 = vmul.f32 1.442695, %v7535_v10 }
 0xe03   : > { %v7518_v22 = vpop.xlane.xlu1 %7517 }
 0xe04   : > { %v7536_v12 = vsub.f32 %v13767_v9, %v7518_v22  ;;  %v7560_v9 = vmul.f32 1.442695, %v7533_v38 }
 0xe06   : > { %v7566_v28 = vmul.f32 1.442695, %v7536_v12 }
 0xe07   : > { %v13821_v59 = vpop.xlane.xlu0 %7520  ;;  %v7494_v12 = vpop.xlane.xlu1 %7493 }
 0xe08   : > { %12261 = vpow2.f32 %v7566_v28  ;;  %v7537_v8 = vsub.f32 %v13773_v63, %v13821_v59 }
 0xe09   : > { %12263 = vpow2.f32 %v7548_v47  ;;  %v7528_v47 = vsub.f32 %v13723_v29, %v7494_v12 }
 0xe0a   : > { %12265 = vpow2.f32 %v7552_v43 }
 0xe0b   : > { %12267 = vpow2.f32 %v7556_v61  ;;  %v13853_v22 = vpop.permute.xlu0 %5798  ;;  %v7550_v28 = vmul.f32 1.442695, %v7528_v47 }
 0xe0c   : > { %12269 = vpow2.f32 %v7560_v9 }
 0xe0d   : > { %12271 = vpow2.f32 %v7564_v44 }
 0xe0f   : > { %v13856_v20 = vpop.permute.xlu0 %5804 }
 0xe12   : > { %v13827_v42 = vpop.eup %12261 }
 0xe13   : > { %v7612_v16 = vsel %vm1166_vm1, %v13827_v42, 0.0  ;;  %v13832_v36 = vpop.eup %12263 }
 0xe14   : > { %7613 = vadd.xlane.f32.xlu0 %v7612_v16  ;;  %v7585_v17 = vsel %vm1166_vm1, %v13832_v36, 0.0  ;;  %v13836_v45 = vpop.eup %12265 }
 0xe15   : > { %v7591_v2 = vsel %vm1166_vm1, %v13836_v45, 0.0  ;;  %v13840_v4 = vpop.eup %12267 }
 0xe16   : > { %v7597_v27 = vsel %vm1166_vm1, %v13840_v4, 0.0  ;;  %v13844_v49 = vpop.eup %12269 }
 0xe17   : > { %v7603_v56 = vsel %vm1166_vm1, %v13844_v49, 0.0  ;;  %v13848_v34 = vpop.eup %12271 }
 0xe18   : > { %7586 = vadd.xlane.f32.xlu0 %v7585_v17  ;;  %v7609_v48 = vsel %vm1166_vm1, %v13848_v34, 0.0 }
 0xe1c   : > { %7592 = vadd.xlane.f32.xlu0 %v7591_v2 }
 0xe20   : > { %7598 = vadd.xlane.f32.xlu0 %v7597_v27 }
 0xe24   : > { %7604 = vadd.xlane.f32.xlu0 %v7603_v56 }
 0xe28   : > { %7610 = vadd.xlane.f32.xlu0 %v7609_v48 }
 0xe2a   : > { %7970 = vxpose.xlu1.b32.start.end [1/1] (short) (narrow) %v13787_v7, 8 }
 0xe2d   : > { %v13861_v10 = vpop.trf.xlu1 }
 0xe40   : > { %v7575_v43 = vpop.xlane.xlu0 %7574 }
 0xe41   : > { %12273 = vrcp.f32 %v7575_v43 }
 0xe42   : > { %12275 = vpow2.f32 %v7550_v28 }
 0xe44   : > { %v7581_v54 = vpop.xlane.xlu0 %7580 }
 0xe45   : > { %12277 = vrcp.f32 %v7581_v54 }
 0xe4b   : > { %v12274_v61 = vpop.eup %12273 }
 0xe4c   : > { %v7635_v38 = vmul.f32 %v12274_v61, %v13793_v19  ;;  %v13859_v9 = vpop.eup %12275  ;;  %v5790_v19 = vpop.permute.xlu1 %5789  ;;  %v7562_v61 = vmul.f32 1.442695, %v7534_v40 }
 0xe4d   : > { %v7588_v16 = vsel %vm1166_vm1, %v13859_v9, 0.0 }
 0xe4e   : > { %11692 = vmatpush3.xpose.msk.msra.mxu1 %vm1166_vm1, %v7635_v38 }
 0xe4f   : > { %v12278_v7 = vpop.eup %12277  ;;  %11701 = vmatprep.subr.mxu1 %v12556_v0 }
 0xe50   : > { %v7637_v29 = vmul.f32 %v12278_v7, %v13797_v50 }
 0xe51   : > { %7589 = vadd.xlane.f32.xlu1 %v7588_v16  ;;  %11694 = vmatmul.mubr.msk.f32.vlgmr.msra.gmra.mrb[68].mxu1 %vm1166_vm1, %v13685_v32  ;;  %v7554_v32 = vmul.f32 1.442695, %v7530_v30 }
 0xe52   : > { %11702 = vmatpush3.xpose.msk.msra.mxu1 %vm1166_vm1, %v7637_v29  ;;  %11703 = vmatprep.mubr.msk.f32.mxu1 %vm12558_vm0, %v12556_v0 }
 0xe53   : > { %11711 = vmatprep.subr.mxu1 %v12556_v0  ;;  %12279 = vpow2.f32 %v7554_v32 }
 0xe55   : > { %7938 = vxpose.xlu0.b32.start.end [1/1] (short) (narrow) %v5790_v19, 8  ;;  %11704 = vmatmul.mubr.msk.f32.vlgmr.msra.gmra.mrb[70].mxu1 %vm1166_vm1, %v13779_v13 }
 0xe56   : > { %11713 = vmatprep.mubr.msk.f32.mxu1 %vm12558_vm0, %v12556_v0 }
 0xe5d   : > { %v13883_v17 = vpop.eup %12279 }
 0xe5e   : > { %v7594_v13 = vsel %vm1166_vm1, %v13883_v17, 0.0 }
 0xe62   : > { %5795 = vrot.lane.b32.xlu1 %v13589_v60, %s12570_s10 }
 0xe7c   : > { %v7572_v50 = vpop.xlane.xlu1 %7571 }
 0xe7d   : > { %12281 = vrcp.f32 %v7572_v50 }
 0xe80   : > { %v7578_v44 = vpop.xlane.xlu1 %7577 }
 0xe81   : > { %12283 = vrcp.f32 %v7578_v44 }
 0xe84   : > { %v7584_v2 = vpop.xlane.xlu1 %7583 }
 0xe85   : > { %12285 = vrcp.f32 %v7584_v2 }
 0xe86   : > { %7595 = vadd.xlane.f32.xlu1 %v7594_v13 }
 0xe87   : > { %v12282_v27 = vpop.eup %12281 }
 0xe88   : > { %v7634_v56 = vmul.f32 %v12282_v27, %v13806_v62 }
 0xe8a   : > { %11687 = vmatpush3.xpose.msk.msra.mxu0 %vm1166_vm1, %v7634_v56 }
 0xe8b   : > { %v12284_v31 = vpop.eup %12283  ;;  %11696 = vmatprep.subr.mxu0 %v12556_v0 }
 0xe8c   : > { %v7636_v24 = vmul.f32 %v12284_v31, %v13810_v5 }
 0xe8d   : > { %11689 = vmatmul.mubr.msk.f32.vlgmr.msra.gmra.mrb[38].mxu0 %vm1166_vm1, %v13761_v21 }
 0xe8e   : > { %11697 = vmatpush3.xpose.msk.msra.mxu0 %vm1166_vm1, %v7636_v24  ;;  %11698 = vmatprep.mubr.msk.f32.mxu0 %vm12558_vm0, %v12556_v0 }
 0xe8f   : > { %v12286_v30 = vpop.eup %12285  ;;  %11706 = vmatprep.subr.mxu0 %v12556_v0 }
 0xe90   : > { %v7638_v62 = vmul.f32 %v12286_v30, %v13814_v58 }
 0xe91   : > { %11699 = vmatmul.mubr.msk.f32.vlgmr.msra.gmra.mrb[40].mxu0 %vm1166_vm1, %v13771_v26  ;;  %v7558_v26 = vmul.f32 1.442695, %v7532_v18 }
 0xe92   : > { %11707 = vmatpush3.xpose.msk.msra.mxu0 %vm1166_vm1, %v7638_v62  ;;  %11708 = vmatprep.mubr.msk.f32.mxu0 %vm12558_vm0, %v12556_v0 }
 0xe93   : > { %11716 = vmatprep.subr.mxu0 %v12556_v0 }
 0xe95   : > { %11709 = vmatmul.mubr.msk.f32.vlgmr.msra.gmra.mrb[42].mxu0 %vm1166_vm1, %v13689_v41 }
 0xe96   : > { %11718 = vmatprep.mubr.msk.f32.mxu0 %vm12558_vm0, %v12556_v0 }
 0xe97   : > { %5801 = vrot.lane.b32.xlu1 %v13589_v60, %s12569_s17 }
 0xea1   : > { %v13910_v21 = vpop.xlane.xlu0 %7613 }
 0xea5   : > { %v7587_v5 = vpop.xlane.xlu0 %7586 }
 0xea6   : > { %12287 = vrcp.f32 %v7587_v5 }
 0xea9   : > { %v7593_v58 = vpop.xlane.xlu0 %7592 }
 0xeaa   : > { %12289 = vrcp.f32 %v7593_v58  ;;  %v7986_v54 = vpop.trf.xlu1 }
 0xeab   : > { %12291 = vpow2.f32 %v7558_v26 }
 0xead   : > { %v7599_v48 = vpop.xlane.xlu0 %7598 }
 0xeae   : > { %12293 = vrcp.f32 %v7599_v48 }
 0xeb0   : > { %v12288_v41 = vpop.eup %12287 }
 0xeb1   : > { %v7639_v12 = vmul.f32 %v12288_v41, %v13832_v36 }
 0xeb3   : > { %11712 = vmatpush3.xpose.msk.msra.mxu1 %vm1166_vm1, %v7639_v12 }
 0xeb4   : > { %v12290_v47 = vpop.eup %12289  ;;  %11721 = vmatprep.subr.mxu1 %v12556_v0 }
 0xeb5   : > { %v7641_v28 = vmul.f32 %v12290_v47, %v13836_v45  ;;  %v13921_v37 = vpop.eup %12291 }
 0xeb6   : > { %11714 = vmatmul.mubr.msk.f32.vlgmr.msra.gmra.mrb[72].mxu1 %vm1166_vm1, %v13781_v3  ;;  %v7600_v36 = vsel %vm1166_vm1, %v13921_v37, 0.0  ;;  %v7605_v3 = vpop.xlane.xlu0 %7604 }
 0xeb7   : > { %11722 = vmatpush3.xpose.msk.msra.mxu1 %vm1166_vm1, %v7641_v28  ;;  %11723 = vmatprep.mubr.msk.f32.mxu1 %vm12558_vm0, %v12556_v0  ;;  %12295 = vrcp.f32 %v7605_v3 }
 0xeb8   : > { %v12294_v11 = vpop.eup %12293  ;;  %11731 = vmatprep.subr.mxu1 %v12556_v0 }
 0xeb9   : > { %v7643_v18 = vmul.f32 %v12294_v11, %v13840_v4 }
 0xeba   : > { %11724 = vmatmul.mubr.msk.f32.vlgmr.msra.gmra.mrb[74].mxu1 %vm1166_vm1, %v13783_v6  ;;  %v7611_v45 = vpop.xlane.xlu0 %7610 }
 0xebb   : > { %7601 = vadd.xlane.f32.xlu1 %v7600_v36  ;;  %11732 = vmatpush3.xpose.msk.msra.mxu1 %vm1166_vm1, %v7643_v18 }
 0xebc   : > { %11733 = vmatprep.mubr.msk.f32.mxu1 %vm12558_vm0, %v12556_v0  ;;  %11741 = vmatprep.subr.mxu1 %v12556_v0 }
 0xec1   : > { %v12296_v4 = vpop.eup %12295 }
 0xec2   : > { %v7645_v6 = vmul.f32 %v12296_v4, %v13844_v49  ;;  %v7568_v49 = vmul.f32 1.442695, %v7537_v8 }
 0xecc   : > { %5807 = vrot.lane.b32.xlu1 %v13589_v60, %s14237_s12 }
 0xed5   : > { %v7954_v43 = vpop.trf.xlu0 }
 0xed6   : > { %11734 = vmatmul.mubr.msk.f32.vlgmr.msra.gmra.mrb[76].mxu1 %vm1166_vm1, %v7954_v43 }
 0xed7   : > { %11742 = vmatpush3.xpose.msk.msra.mxu1 %vm1166_vm1, %v7645_v6  ;;  %11743 = vmatprep.mubr.msk.f32.mxu1 %vm12558_vm0, %v12556_v0 }
 0xed8   : > { %11751 = vmatprep.subr.mxu1 %v12556_v0 }
 0xede   : > { %v7590_v60 = vpop.xlane.xlu1 %7589 }
 0xedf   : > { %12297 = vrcp.f32 %v7590_v60 }
 0xee0   : > { %12299 = vpow2.f32 %v7562_v61 }
 0xee1   : > { %12301 = vpow2.f32 %v7568_v49 }
 0xee2   : > { %v5796_v38 = vpop.permute.xlu1 %5795 }
 0xee3   : > { %8002 = vxpose.xlu0.b32.start.end [1/1] (short) (narrow) %v5796_v38, 8 }
 0xee9   : > { %v12298_v7 = vpop.eup %12297 }
 0xeea   : > { %v7640_v29 = vmul.f32 %v12298_v7, %v13859_v9  ;;  %v12300_v16 = vpop.eup %12299 }
 0xeeb   : > { %v7606_v53 = vsel %vm1166_vm1, %v12300_v16, 0.0  ;;  %v13956_v35 = vpop.eup %12301 }
 0xeec   : > { %11717 = vmatpush3.xpose.msk.msra.mxu0 %vm1166_vm1, %v7640_v29  ;;  %v7615_v40 = vsel %vm1166_vm1, %v13956_v35, 0.0 }
 0xeed   : > { %11726 = vmatprep.subr.mxu0 %v12556_v0 }
 0xeef   : > { %11719 = vmatmul.mubr.msk.f32.vlgmr.msra.gmra.mrb[44].mxu0 %vm1166_vm1, %v13691_v46 }
 0xef0   : > { %7607 = vadd.xlane.f32.xlu1 %v7606_v53  ;;  %11728 = vmatprep.mubr.msk.f32.mxu0 %vm12558_vm0, %v12556_v0 }
 0xef4   : > { %7616 = vadd.xlane.f32.xlu1 %v7615_v40 }
 0xf13   : > { %v7596_v63 = vpop.xlane.xlu1 %7595 }
 0xf14   : > { %12303 = vrcp.f32 %v7596_v63 }
 0xf17   : > { %v5802_v59 = vpop.permute.xlu1 %5801 }
 0xf18   : > { %8066 = vxpose.xlu0.b32.start.end [1/1] (short) (narrow) %v5802_v59, 8 }
 0xf1e   : > { %v12304_v8 = vpop.eup %12303 }
 0xf1f   : > { %v7642_v9 = vmul.f32 %v12304_v8, %v13883_v17 }
 0xf21   : > { %11727 = vmatpush3.xpose.msk.msra.mxu0 %vm1166_vm1, %v7642_v9 }
 0xf22   : > { %11736 = vmatprep.subr.mxu0 %v12556_v0 }
 0xf24   : > { %v8310_v46 = vpop.f32.mrb[68].mxu1  ;;  %11729 = vmatmul.mubr.msk.f32.vlgmr.msra.gmra.mrb[46].mxu0 %vm1166_vm1, %v13861_v10 }
 0xf25   : > { %v11695_v19 = vpop.f32.mrb[69].mxu1  ;;  %11738 = vmatprep.mubr.msk.f32.mxu0 %vm12558_vm0, %v12556_v0 }
 0xf27   : > { %8034 = vxpose.xlu1.b32.start.end [1/1] (short) (narrow) %v13853_v22, 8 }
 0xf28   : > { %v8462_v32 = vpop.f32.mrb[70].mxu1 }
 0xf29   : > { %v11705_v50 = vpop.f32.mrb[71].mxu1 }
 0xf2b   : > { %8098 = vxpose.xlu1.b32.start.end [1/1] (short) (narrow) %v13856_v20, 8 }
 0xf48   : > { %v7602_v44 = vpop.xlane.xlu1 %7601 }
 0xf49   : > { %12305 = vrcp.f32 %v7602_v44 }
 0xf4a   : > { %12307 = vrcp.f32 %v7611_v45 }
 0xf4c   : > { %v5808_v17 = vpop.permute.xlu1 %5807 }
 0xf4d   : > { %8130 = vxpose.xlu0.b32.start.end [1/1] (short) (narrow) %v5808_v17, 8 }
 0xf51   : > { %9410 = vxpose.xlu0.b32.start.end [1/1] (short) (narrow) %v8310_v46, 8 }
 0xf53   : > { %v12306_v2 = vpop.eup %12305 }
 0xf54   : > { %v7644_v13 = vmul.f32 %v12306_v2, %v13921_v37  ;;  %v12308_v22 = vpop.eup %12307 }
 0xf55   : > { %9474 = vxpose.xlu0.b32.start.end [1/1] (short) (narrow) %v8462_v32, 8  ;;  %v7647_v27 = vmul.f32 %v12308_v22, %v13848_v34 }
 0xf56   : > { %11737 = vmatpush3.xpose.msk.msra.mxu0 %vm1166_vm1, %v7644_v13 }
 0xf57   : > { %11746 = vmatprep.subr.mxu0 %v12556_v0 }
 0xf59   : > { %11739 = vmatmul.mubr.msk.f32.vlgmr.msra.gmra.mrb[48].mxu0 %vm1166_vm1, %v7986_v54 }
 0xf5a   : > { %11748 = vmatprep.mubr.msk.f32.mxu0 %vm12558_vm0, %v12556_v0 }
 0xf60   : > { %v8234_v20 = vpop.f32.mrb[38].mxu0 }
 0xf61   : > { %v11690_v10 = vpop.f32.mrb[39].mxu0  ;;  %9378 = vxpose.xlu1.b32.start.end [1/1] (short) (narrow) %v8234_v20, 8 }
 0xf63   : > { %v8018_v56 = vpop.trf.xlu0 }
 0xf64   : > { %v8386_v31 = vpop.f32.mrb[40].mxu0  ;;  %11744 = vmatmul.mubr.msk.f32.vlgmr.msra.gmra.mrb[78].mxu1 %vm1166_vm1, %v8018_v56 }
 0xf65   : > { %11752 = vmatpush3.xpose.msk.msra.mxu1 %vm1166_vm1, %v7647_v27  ;;  %v11700_v24 = vpop.f32.mrb[41].mxu0  ;;  %9442 = vxpose.xlu1.b32.start.end [1/1] (short) (narrow) %v8386_v31, 8 }
 0xf66   : > { %11753 = vmatprep.mubr.msk.f32.mxu1 %vm12558_vm0, %v12556_v0  ;;  %11761 = vmatprep.subr.mxu1 %v12556_v0 }
 0xf68   : > { %v8538_v30 = vpop.f32.mrb[42].mxu0 }
 0xf69   : > { %v11710_v62 = vpop.f32.mrb[43].mxu0  ;;  %9506 = vxpose.xlu1.b32.start.end [1/1] (short) (narrow) %v8538_v30, 8 }
 0xf7d   : > { %v7608_v5 = vpop.xlane.xlu1 %7607 }
 0xf7e   : > { %12309 = vrcp.f32 %v7608_v5 }
 0xf81   : > { %v7617_v34 = vpop.xlane.xlu1 %7616 }
 0xf82   : > { %12311 = vrcp.f32 %v7617_v34 }
 0xf83   : > { %12313 = vrcp.f32 %v13910_v21 }
 0xf88   : > { %v12310_v26 = vpop.eup %12309 }
 0xf89   : > { %v7646_v58 = vmul.f32 %v12310_v26, %v12300_v16  ;;  %v8614_v48 = vpop.f32.mrb[72].mxu1 }
 0xf8a   : > { %9538 = vxpose.xlu0.b32.start.end [1/1] (short) (narrow) %v8614_v48, 8  ;;  %v11715_v41 = vpop.f32.mrb[73].mxu1 }
 0xf8b   : > { %11747 = vmatpush3.xpose.msk.msra.mxu0 %vm1166_vm1, %v7646_v58 }
 0xf8c   : > { %11756 = vmatprep.subr.mxu0 %v12556_v0  ;;  %v12312_v28 = vpop.eup %12311 }
 0xf8d   : > { %v8766_v12 = vpop.f32.mrb[74].mxu1  ;;  %v7649_v37 = vmul.f32 %v12312_v28, %v13956_v35  ;;  %v12314_v18 = vpop.eup %12313 }
 0xf8e   : > { %9602 = vxpose.xlu0.b32.start.end [1/1] (short) (narrow) %v8766_v12, 8  ;;  %v11725_v47 = vpop.f32.mrb[75].mxu1  ;;  %v7648_v36 = vmul.f32 %v12314_v18, %v13827_v42 }
 0xf98   : > { %v8082_v11 = vpop.trf.xlu0 }
 0xf99   : > { %11754 = vmatmul.mubr.msk.f32.vlgmr.msra.gmra.mrb[80].mxu1 %vm1166_vm1, %v8082_v11 }
 0xf9a   : > { %11762 = vmatpush3.xpose.msk.msra.mxu1 %vm1166_vm1, %v7649_v37  ;;  %11763 = vmatprep.mubr.msk.f32.mxu1 %vm12558_vm0, %v12556_v0 }
 0xf9b   : > { %12031 = vmatprep.subr.bf16.mxu1 %v12557_v1 }
 0xfa7   : > { %v8050_v3 = vpop.trf.xlu1 }
 0xfa8   : > { %11749 = vmatmul.mubr.msk.f32.vlgmr.msra.gmra.mrb[50].mxu0 %vm1166_vm1, %v8050_v3 }
 0xfa9   : > { %11757 = vmatpush3.xpose.msk.msra.mxu0 %vm1166_vm1, %v7648_v36  ;;  %11758 = vmatprep.mubr.msk.f32.mxu0 %vm12558_vm0, %v12556_v0  ;;  %v8918_v45 = vpop.f32.mrb[76].mxu1 }
 0xfaa   : > { %12007 = vmatprep.subr.bf16.mxu0 %v12557_v1  ;;  %9666 = vxpose.xlu0.b32.start.end [1/1] (short) (narrow) %v8918_v45, 8  ;;  %v11735_v4 = vpop.f32.mrb[77].mxu1 }
 0xfab   : > { %v8114_v21 = vpop.trf.xlu1 }
 0xfac   : > { %11759 = vmatmul.mubr.msk.f32.vlgmr.msra.gmra.mrb[52].mxu0 %vm1166_vm1, %v8114_v21 }
 0xfad   : > { %11798 = vmatprep.mubr.msk.f32.mxu0 %vm12558_vm0, %v12556_v0 }
 0xfc2   : > { %v8690_v42 = vpop.f32.mrb[44].mxu0 }
 0xfc3   : > { %v11720_v6 = vpop.f32.mrb[45].mxu0  ;;  %9570 = vxpose.xlu1.b32.start.end [1/1] (short) (narrow) %v8690_v42, 8 }
 0xfcd   : > { %v8146_v43 = vpop.trf.xlu0 }
 0xfce   : > { %11764 = vmatmul.mubr.msk.f32.vlgmr.msra.gmra.mrb[82].mxu1 %vm1166_vm1, %v8146_v43 }
 0xfcf   : > { %11833 = vmatprep.mubr.msk.f32.mxu1 %vm12558_vm0, %v12556_v0 }
 0xfd1   : > { %v9426_v53 = vpop.trf.xlu0 }
 0xfd5   : > { %v9490_v40 = vpop.trf.xlu0 }
 0xfd6   : > { %v9906_v46 = vcombine.low %v9426_v53, %v9490_v40  ;;  %v9907_v19 = vcombine.high %v9426_v53, %v9490_v40 }
 0xfd8   : > { %v9914_v13 = vrot.slane %v9906_v46, %v13355_v39  ;;  %v9921_v22 = vrot.slane %v9907_v19, %v13355_v39 }
 0xfe1   : > { %v9394_v35 = vpop.trf.xlu1 }
 0xfe5   : > { %v9458_v63 = vpop.trf.xlu1 }
 0xfe6   : > { %v9890_v8 = vcombine.low %v9394_v35, %v9458_v63  ;;  %v9891_v9 = vcombine.high %v9394_v35, %v9458_v63 }
 0xfe8   : > { %v9898_v17 = vrot.slane %v9890_v8, %v13355_v39  ;;  %v9905_v2 = vrot.slane %v9891_v9, %v13355_v39 }
 0xfe9   : > { %v9522_v32 = vpop.trf.xlu1 }
 0xfea   : > { %v9954_v31 = vcombine.low %v9898_v17, %v9914_v13  ;;  %v9955_v24 = vcombine.high %v9898_v17, %v9914_v13  ;;  %v9970_v30 = vcombine.low %v9905_v2, %v9921_v22  ;;  %v9971_v62 = vcombine.high %v9905_v2, %v9921_v22 }
 0xfec   : > { %v9962_v48 = vrot.slane %v9954_v31, %v13362_v33  ;;  %v9969_v41 = vrot.slane %v9955_v24, %v13362_v33  ;;  %v9978_v12 = vrot.slane %v9970_v30, %v13362_v33  ;;  %v9985_v47 = vrot.slane %v9971_v62, %v13362_v33 }
 0xfee   : > { %v11091_v36 = vcombine.low %v9962_v48, %v9969_v41  ;;  %v11093_v3 = vcombine.high %v9962_v48, %v9969_v41  ;;  %v11095_v21 = vcombine.low %v9978_v12, %v9985_v47  ;;  %v11097_v45 = vcombine.high %v9978_v12, %v9985_v47 }
 0xff7   : > { %v8842_v54 = vpop.f32.mrb[46].mxu0 }
 0xff8   : > { %v11730_v61 = vpop.f32.mrb[47].mxu0  ;;  %9634 = vxpose.xlu1.b32.start.end [1/1] (short) (narrow) %v8842_v54, 8  ;;  %v10170_v54 = vrot.slane %v11091_v36, %v13355_v39 }
 0xff9   : > { %v10186_v61 = vrot.slane %v11093_v3, %v13355_v39 }
 0xffb   : > { %v10226_v53 = vcombine.low %v10170_v54, %v10186_v61  ;;  %v10227_v19 = vcombine.high %v10170_v54, %v10186_v61 }
 0xffd   : > { %v14025_v9 = vrot.slane %v10226_v53, %v13362_v33  ;;  %v10241_v22 = vrot.slane %v10227_v19, %v13362_v33 }
0x100a   : > { %v9554_v59 = vpop.trf.xlu0 }
0x100e   : > { %v9618_v20 = vpop.trf.xlu0 }
0x100f   : > { %v9938_v34 = vcombine.low %v9554_v59, %v9618_v20  ;;  %v9939_v58 = vcombine.high %v9554_v59, %v9618_v20 }
0x1011   : > { %v9946_v11 = vrot.slane %v9938_v34, %v13355_v39  ;;  %v9953_v18 = vrot.slane %v9939_v58, %v13355_v39 }
0x102c   : > { %v8994_v60 = vpop.f32.mrb[48].mxu0 }
0x102d   : > { %v11740_v49 = vpop.f32.mrb[49].mxu0  ;;  %9698 = vxpose.xlu1.b32.start.end [1/1] (short) (narrow) %v8994_v60, 8  ;;  %v10202_v60 = vrot.slane %v11095_v21, %v13355_v39 }
0x102e   : > { %v10218_v49 = vrot.slane %v11097_v45, %v13355_v39 }
0x1030   : > { %v10258_v35 = vcombine.low %v10202_v60, %v10218_v49 }
0x1032   : > { %v14028_v46 = vrot.slane %v10258_v35, %v13362_v33 }
0x1034   : > { %v10291_v13 = vcombine.high %v14025_v9, %v14028_v46 }
0x1037   : > { %v9070_v38 = vpop.f32.mrb[78].mxu1 }
0x1038   : > { %9730 = vxpose.xlu0.b32.start.end [1/1] (short) (narrow) %v9070_v38, 8  ;;  %v11745_v7 = vpop.f32.mrb[79].mxu1 }
0x1043   : > { %v9586_v27 = vpop.trf.xlu1 }
0x1044   : > { %v9922_v5 = vcombine.low %v9522_v32, %v9586_v27  ;;  %v9923_v26 = vcombine.high %v9522_v32, %v9586_v27  ;;  %v10259_v32 = vcombine.high %v10202_v60, %v10218_v49 }
0x1046   : > { %v9930_v28 = vrot.slane %v9922_v5, %v13355_v39  ;;  %v9937_v37 = vrot.slane %v9923_v26, %v13355_v39  ;;  %v10273_v20 = vrot.slane %v10259_v32, %v13362_v33 }
0x1048   : > { %v9986_v4 = vcombine.low %v9930_v28, %v9946_v11  ;;  %v9987_v42 = vcombine.high %v9930_v28, %v9946_v11  ;;  %v10002_v6 = vcombine.low %v9937_v37, %v9953_v18  ;;  %v10003_v43 = vcombine.high %v9937_v37, %v9953_v18  ;;  %v9682_v28 = vpop.trf.xlu0 }
0x104a   : > { %v9994_v38 = vrot.slane %v9986_v4, %v13362_v33  ;;  %v10001_v7 = vrot.slane %v9987_v42, %v13362_v33 }
0x104c   : > { %v11092_v40 = vcombine.low %v9994_v38, %v10001_v7  ;;  %v11094_v63 = vcombine.high %v9994_v38, %v10001_v7 }
0x106c   : > { %v9222_v29 = vpop.f32.mrb[80].mxu1 }
0x106d   : > { %9794 = vxpose.xlu0.b32.start.end [1/1] (short) (narrow) %v9222_v29, 8  ;;  %v11755_v16 = vpop.f32.mrb[81].mxu1  ;;  %v10010_v29 = vrot.slane %v10002_v6, %v13362_v33 }
0x106e   : > { %v10017_v16 = vrot.slane %v10003_v43, %v13362_v33 }
0x1070   : > { %v11096_v59 = vcombine.low %v10010_v29, %v10017_v16  ;;  %v11098_v8 = vcombine.high %v10010_v29, %v10017_v16 }
0x1072   : > { %v10209_v17 = vrot.slane %v11096_v59, %v13355_v39  ;;  %v10225_v2 = vrot.slane %v11098_v8, %v13355_v39 }
0x1074   : > { %v10274_v27 = vcombine.low %v10209_v17, %v10225_v2  ;;  %v10275_v34 = vcombine.high %v10209_v17, %v10225_v2  ;;  %v10292_v2 = vcombine.low %v10241_v22, %v10273_v20 }
0x1076   : > { %v10282_v24 = vrot.slane %v10274_v27, %v13362_v33  ;;  %v10289_v41 = vrot.slane %v10275_v34, %v13362_v33 }
0x1078   : > { %v9650_v47 = vpop.trf.xlu1 }
0x107b   : > { %v9146_v50 = vpop.f32.mrb[50].mxu0 }
0x107c   : > { %9762 = vxpose.xlu1.b32.start.end [1/1] (short) (narrow) %v9146_v50, 8  ;;  %v11750_v44 = vpop.f32.mrb[51].mxu0  ;;  %v10177_v50 = vrot.slane %v11092_v40, %v13355_v39 }
0x107d   : > { %v10193_v44 = vrot.slane %v11094_v63, %v13355_v39 }
0x107f   : > { %v9298_v10 = vpop.f32.mrb[52].mxu0  ;;  %v10243_v26 = vcombine.high %v10177_v50, %v10193_v44 }
0x1080   : > { %9826 = vxpose.xlu1.b32.start.end [1/1] (short) (narrow) %v9298_v10, 8  ;;  %v11760_v56 = vpop.f32.mrb[53].mxu0  ;;  %v10242_v10 = vcombine.low %v10177_v50, %v10193_v44 }
0x1081   : > { %v10293_v56 = vcombine.high %v10241_v22, %v10273_v20  ;;  %v10257_v48 = vrot.slane %v10243_v26, %v13362_v33  ;;  %v10511_v26 = vld [vmem:[#allocation8 + $0xd8] sm:$0xff]  ;;  %v10512_v22 = vld [vmem:[#allocation8 + $0x128] sm:$0xff] }
0x1082   : > { %v10250_v31 = vrot.slane %v10242_v10, %v13362_v33  ;;  %v12011_v20 = vpack.c.bf16 %v10512_v22, %v10511_v26 }
0x1083   : > { %v10297_v12 = vcombine.high %v10257_v48, %v10289_v41 }
0x1084   : > { %v10294_v5 = vcombine.low %v10250_v31, %v10282_v24  ;;  %v10295_v58 = vcombine.high %v10250_v31, %v10282_v24  ;;  %v10296_v24 = vcombine.low %v10257_v48, %v10289_v41 }
0x109e   : > { %10435 = vrot.lane.b32.xlu1 %v10291_v13, %s14237_s12 }
0x10a1   : > { %v9374_v30 = vpop.f32.mrb[82].mxu1 }
0x10a2   : > { %9858 = vxpose.xlu0.b32.start.end [1/1] (short) (narrow) %v9374_v30, 8  ;;  %v11765_v62 = vpop.f32.mrb[83].mxu1  ;;  %10443 = vrot.lane.b32.xlu1 %v10293_v56, %s12569_s17 }
0x10a3   : > { %v10509_v62 = vld [vmem:[#allocation8 + $0x38] sm:$0xff] }
0x10a6   : > { %10447 = vrot.lane.b32.xlu1 %v10294_v5, %s12572_s30  ;;  %v10510_v5 = vld [vmem:[#allocation8 + $0x88] sm:$0xff] }
0x10a7   : > { %v12008_v34 = vpack.c.bf16 %v10510_v5, %v10509_v62 }
0x10a9   : > { %12009 = vmatpush3.bf16.msra.mxu0 %v12008_v34 }
0x10aa   : > { %10451 = vrot.lane.b32.xlu1 %v10295_v58, %s12570_s10  ;;  %12010 = vmatprep.subr.bf16.mxu0 %v12557_v1 }
0x10ad   : > { %v9714_v37 = vpop.trf.xlu1  ;;  %12012 = vmatpush3.bf16.msra.mxu0 %v12011_v20 }
0x10ae   : > { %10459 = vrot.lane.b32.xlu1 %v10297_v12, %s12568_s13  ;;  %v10026_v11 = vcombine.low %v9650_v47, %v9714_v37  ;;  %v10027_v18 = vcombine.high %v9650_v47, %v9714_v37  ;;  %v10513_v12 = vld [vmem:[#allocation8 + $0x178] sm:$0xff]  ;;  %v10514_v47 = vld [vmem:[#allocation8 + $0x1c8] sm:$0xff]  ;;  %12013 = vmatprep.subr.bf16.mxu0 %v12557_v1 }
0x10af   : > { %v12014_v48 = vpack.c.bf16 %v10514_v47, %v10513_v12  ;;  %v10516_v37 = vld [vmem:[#allocation8 + $0x268] sm:$0xff] }
0x10b0   : > { %v10034_v3 = vrot.slane %v10026_v11, %v13355_v39  ;;  %v10041_v21 = vrot.slane %v10027_v18, %v13355_v39  ;;  %v10517_v18 = vld [vmem:[#allocation8 + $0x2b8] sm:$0xff] }
0x10b1   : > { %12015 = vmatpush3.bf16.msra.mxu0 %v12014_v48 }
0x10b2   : > { %12016 = vmatprep.subr.bf16.mxu0 %v12557_v1 }
0x10b8   : > { %v9746_v36 = vpop.trf.xlu0 }
0x10b9   : > { %v10042_v45 = vcombine.low %v9682_v28, %v9746_v36  ;;  %v10043_v4 = vcombine.high %v9682_v28, %v9746_v36  ;;  %v10515_v28 = vld [vmem:[#allocation8 + $0x218] sm:$0xff]  ;;  %v10518_v36 = vld [vmem:[#allocation8 + $0x308] sm:$0xff] }
0x10ba   : > { %v12017_v11 = vpack.c.bf16 %v10516_v37, %v10515_v28 }
0x10bb   : > { %v10050_v42 = vrot.slane %v10042_v45, %v13355_v39  ;;  %v10057_v6 = vrot.slane %v10043_v4, %v13355_v39  ;;  %v10520_v45 = vld [vmem:[#allocation8 + $0x3a8] sm:$0xff] }
0x10bc   : > { %12018 = vmatpush3.bf16.msra.mxu0 %v12017_v11 }
0x10bd   : > { %v10090_v43 = vcombine.low %v10034_v3, %v10050_v42  ;;  %v10091_v54 = vcombine.high %v10034_v3, %v10050_v42  ;;  %v10106_v61 = vcombine.low %v10041_v21, %v10057_v6  ;;  %v10107_v60 = vcombine.high %v10041_v21, %v10057_v6  ;;  %12019 = vmatprep.subr.bf16.mxu0 %v12557_v1  ;;  %v10519_v21 = vld [vmem:[#allocation8 + $0x358] sm:$0xff]  ;;  %v10522_v6 = vld [vmem:[#allocation8 + $0x448] sm:$0xff] }
0x10be   : > { %v12020_v3 = vpack.c.bf16 %v10518_v36, %v10517_v18  ;;  %v12023_v4 = vpack.c.bf16 %v10520_v45, %v10519_v21  ;;  %v10521_v42 = vld [vmem:[#allocation8 + $0x3f8] sm:$0xff]  ;;  %v10290_v21 = vcombine.low %v14025_v9, %v14028_v46 }
0x10bf   : > { %v10098_v49 = vrot.slane %v10090_v43, %v13362_v33  ;;  %v10105_v38 = vrot.slane %v10091_v54, %v13362_v33  ;;  %v10114_v7 = vrot.slane %v10106_v61, %v13362_v33  ;;  %v10121_v29 = vrot.slane %v10107_v60, %v13362_v33 }
0x10c0   : > { %12021 = vmatpush3.bf16.msra.mxu0 %v12020_v3  ;;  %v12026_v43 = vpack.c.bf16 %v10522_v6, %v10521_v42 }
0x10c1   : > { %v11099_v16 = vcombine.low %v10098_v49, %v10105_v38  ;;  %v11101_v53 = vcombine.high %v10098_v49, %v10105_v38  ;;  %v11103_v35 = vcombine.low %v10114_v7, %v10121_v29  ;;  %v11105_v40 = vcombine.high %v10114_v7, %v10121_v29  ;;  %12022 = vmatprep.subr.bf16.mxu0 %v12557_v1 }
0x10c3   : > { %v10306_v63 = vrot.slane %v11099_v16, %v13355_v39  ;;  %v10322_v59 = vrot.slane %v11101_v53, %v13355_v39  ;;  %v10338_v8 = vrot.slane %v11103_v35, %v13355_v39  ;;  %v10354_v19 = vrot.slane %v11105_v40, %v13355_v39 }
0x10c4   : > { %12024 = vmatpush3.bf16.msra.mxu0 %v12023_v4 }
0x10c5   : > { %v10362_v32 = vcombine.low %v10306_v63, %v10322_v59  ;;  %v10394_v50 = vcombine.low %v10338_v8, %v10354_v19  ;;  %v10363_v44 = vcombine.high %v10306_v63, %v10322_v59  ;;  %v10395_v17 = vcombine.high %v10338_v8, %v10354_v19  ;;  %12025 = vmatprep.subr.bf16.mxu0 %v12557_v1 }
0x10c7   : > { %v10370_v13 = vrot.slane %v10362_v32, %v13362_v33  ;;  %v10402_v10 = vrot.slane %v10394_v50, %v13362_v33  ;;  %v10377_v27 = vrot.slane %v10363_v44, %v13362_v33  ;;  %v10409_v56 = vrot.slane %v10395_v17, %v13362_v33  ;;  %v10523_v50 = vld [vmem:[#allocation8 + $0x498] sm:$0xff]  ;;  %v10524_v44 = vld [vmem:[#allocation8 + $0x4e8] sm:$0xff] }
0x10c8   : > { %12027 = vmatpush3.bf16.msra.mxu0 %v12026_v43 }
0x10c9   : > { %v10427_v31 = vcombine.high %v10370_v13, %v10402_v10  ;;  %v10429_v30 = vcombine.high %v10377_v27, %v10409_v56  ;;  %v10426_v58 = vcombine.low %v10370_v13, %v10402_v10  ;;  %v10428_v41 = vcombine.low %v10377_v27, %v10409_v56  ;;  %12028 = vmatprep.subr.bf16.mxu0 %v12557_v1 }
0x10ca   : > { %v12029_v27 = vpack.c.bf16 %v10524_v44, %v10523_v50 }
0x10cb   : > { %10439 = vrot.lane.b32.xlu0 %v10292_v2, %s12571_s26  ;;  %10467 = vrot.lane.b32.xlu1 %v10427_v31, %s12566_s8 }
0x10cc   : > { %12030 = vmatpush3.bf16.msra.mxu0 %v12029_v27 }
0x10cd   : > { %12055 = vmatprep.subr.bf16.mxu0 %v12557_v1 }
0x10cf   : > { %10455 = vrot.lane.b32.xlu0 %v10296_v24, %s12567_s11  ;;  %10475 = vrot.lane.b32.xlu1 %v10429_v30, %s12564_s14  ;;  %s10828_s14 = scalar_lea.sflag [#allocation4], %s12819_s3 }
0x10d3   : > { %10463 = vrot.lane.b32.xlu0 %v10426_v58, %s12565_s2 }
0x10d7   : > { %10471 = vrot.lane.b32.xlu0 %v10428_v41, %s12563_s7  ;;  %s14160_s7 = scalar_lea.hbm %s14209_s5, %s11108_s15 }
0x10ed   : > { %v9810_v61 = vpop.trf.xlu0 }
0x10fc   : > { %v9778_v54 = vpop.trf.xlu1 }
0x1100   : > { %v9842_v60 = vpop.trf.xlu1 }
0x1101   : > { %v10058_v49 = vcombine.low %v9778_v54, %v9842_v60  ;;  %v10059_v38 = vcombine.high %v9778_v54, %v9842_v60 }
0x1103   : > { %v10066_v53 = vrot.slane %v10058_v49, %v13355_v39  ;;  %v10073_v35 = vrot.slane %v10059_v38, %v13355_v39 }
0x1110   : > { %v10436_v36 = vpop.permute.xlu1 %10435 }
0x1111   : > { %v10494_v42 = vsel %vm1166_vm1, %v10290_v21, %v10436_v36  ;;  %vm14238_vm1 = vcmask 982016   ;;  %v10631_v36 = vld [vmem:[#allocation8 + $0x310] sm:$0xff] }
0x1114   : > { %v10444_v3 = vpop.permute.xlu1 %10443 }
0x1118   : > { %v10448_v45 = vpop.permute.xlu1 %10447 }
0x111c   : > { %v10452_v6 = vpop.permute.xlu1 %10451 }
0x1120   : > { %v10460_v60 = vpop.permute.xlu1 %10459 }
0x1122   : > { %v9874_v7 = vpop.trf.xlu0 }
0x1123   : > { %v10074_v29 = vcombine.low %v9810_v61, %v9874_v7  ;;  %v10075_v16 = vcombine.high %v9810_v61, %v9874_v7 }
0x1125   : > { %v10082_v40 = vrot.slane %v10074_v29, %v13355_v39  ;;  %v10089_v63 = vrot.slane %v10075_v16, %v13355_v39 }
0x1127   : > { %v10122_v59 = vcombine.low %v10066_v53, %v10082_v40  ;;  %v10123_v8 = vcombine.high %v10066_v53, %v10082_v40  ;;  %v10138_v19 = vcombine.low %v10073_v35, %v10089_v63  ;;  %v10139_v32 = vcombine.high %v10073_v35, %v10089_v63 }
0x1129   : > { %v10130_v17 = vrot.slane %v10122_v59, %v13362_v33  ;;  %v10137_v2 = vrot.slane %v10123_v8, %v13362_v33  ;;  %v10146_v13 = vrot.slane %v10138_v19, %v13362_v33  ;;  %v10153_v10 = vrot.slane %v10139_v32, %v13362_v33 }
0x112b   : > { %v11100_v56 = vcombine.low %v10130_v17, %v10137_v2  ;;  %v11102_v31 = vcombine.high %v10130_v17, %v10137_v2  ;;  %v11104_v24 = vcombine.low %v10146_v13, %v10153_v10  ;;  %v11106_v30 = vcombine.high %v10146_v13, %v10153_v10  ;;  %v12321_v10 = vld [vmem:[#allocation10] sm:$0xff] }
0x112c   : > { %v10527_v13 = vsub.s32 7, %v12864_v14 }
0x112d   : > { %v10313_v62 = vrot.slane %v11100_v56, %v13355_v39  ;;  %v10329_v5 = vrot.slane %v11102_v31, %v13355_v39  ;;  %v10345_v26 = vrot.slane %v11104_v24, %v13355_v39  ;;  %v10361_v34 = vrot.slane %v11106_v30, %v13355_v39 }
0x112e   : > { %v10528_v27 = vrot.slane %v12321_v10, %v10527_v13 }
0x112f   : > { %v10378_v22 = vcombine.low %v10313_v62, %v10329_v5  ;;  %v10410_v20 = vcombine.low %v10345_v26, %v10361_v34  ;;  %v10379_v58 = vcombine.high %v10313_v62, %v10329_v5  ;;  %v10411_v12 = vcombine.high %v10345_v26, %v10361_v34  ;;  %v10622_v62 = vld [vmem:[#allocation8 + $0x40] sm:$0xff]  ;;  %v10623_v5 = vld [vmem:[#allocation8 + $0x90] sm:$0xff] }
0x1130   : > { %v10624_v26 = vld [vmem:[#allocation8 + $0xe0] sm:$0xff]  ;;  %v12032_v34 = vpack.c.bf16 %v10623_v5, %v10622_v62 }
0x1131   : > { %v10386_v47 = vrot.slane %v10378_v22, %v13362_v33  ;;  %v10418_v48 = vrot.slane %v10410_v20, %v13362_v33  ;;  %v10393_v37 = vrot.slane %v10379_v58, %v13362_v33  ;;  %v10425_v11 = vrot.slane %v10411_v12, %v13362_v33  ;;  %v10625_v22 = vld [vmem:[#allocation8 + $0x130] sm:$0xff] }
0x1132   : > { %12033 = vmatpush3.bf16.msra.mxu1 %v12032_v34  ;;  %v12035_v20 = vpack.c.bf16 %v10625_v22, %v10624_v26  ;;  %v10627_v58 = vld [vmem:[#allocation8 + $0x1d0] sm:$0xff] }
0x1133   : > { %v10431_v41 = vcombine.high %v10386_v47, %v10418_v48  ;;  %v10430_v28 = vcombine.low %v10386_v47, %v10418_v48  ;;  %v10433_v39 = vcombine.high %v10393_v37, %v10425_v11  ;;  %v10432_v18 = vcombine.low %v10393_v37, %v10425_v11  ;;  %12034 = vmatprep.subr.bf16.mxu1 %v12557_v1  ;;  %v10628_v37 = vld [vmem:[#allocation8 + $0x220] sm:$0xff]  ;;  %v10629_v11 = vld [vmem:[#allocation8 + $0x270] sm:$0xff] }
0x1135   : > { %10483 = vrot.lane.b32.xlu1 %v10431_v41, %s12559_s24  ;;  %10479 = vrot.lane.b32.xlu0 %v10430_v28, %s12561_s9  ;;  %s317_s24 = scalar_lea.vmem [#allocation11], %s12822_s28  ;;  %s12471_s28 = sshll.u32 %s12576_s22, 4  ;;  %s12472_s28 = int_to_ptr.vmem [resolvable:$false] %s12471_s28 }
0x1136   : > { %12036 = vmatpush3.bf16.msra.mxu1 %v12035_v20  ;;  %v10727_v20 = vld [vmem:[#allocation8 + $0x4a8] sm:$0xff]  ;;  %s12473_s8 = scalar_lea.vmem %s12472_s28, 256 }
0x1137   : > { %12037 = vmatprep.subr.bf16.mxu1 %v12557_v1 }
0x1139   : > { %10491 = vrot.lane.b32.xlu1 %v10433_v39, %s12560_s23  ;;  %10487 = vrot.lane.b32.xlu0 %v10432_v18, %s12562_s6  ;;  %v12041_v39 = vpack.c.bf16 %v10629_v11, %v10628_v37  ;;  %v10630_v18 = vld [vmem:[#allocation8 + $0x2c0] sm:$0xff]  ;;  %s10841_s23 = sshll.u32 %s317_s24, 4  ;;  %s14162_s23 = int_to_ptr.vmem [resolvable:$true] %s10841_s23 }
0x113a   : > { %v12044_v21 = vpack.c.bf16 %v10631_v36, %v10630_v18  ;;  %s12467_s2 = scalar_lea.vmem %s14162_s23, 128  ;;  %p12474_p5 = scmp.lt.s32.totalorder %s14162_s23, %s12472_s28 }
0x113b   : > { %p12468_p3 = scmp.ne.s32.totalorder %s14162_s23, %s12467_s2  ;;  %p12475_p9 = scmp.lt.s32.totalorder %s12473_s8, %s12467_s2 }
0x113d   : > { %v10440_v4 = vpop.permute.xlu0 %10439  ;;  %v10468_v29 = vpop.permute.xlu1 %10467  ;;  %p12469_p10 = pnand %p12468_p3, %p14239_p7  ;;  %p12476_p1 = por %p12475_p9, %p12474_p5 }
0x113e   : > { %v10495_v33 = vsel %vm5340_vm2, %v10494_v42, %v10440_v4  ;;  %v10634_v42 = vld [vmem:[#allocation8 + $0x400] sm:$0xff] }
0x113f   : > { %v10496_v43 = vsel %vm5342_vm3, %v10495_v33, %v10444_v3  ;;  %v10632_v3 = vld [vmem:[#allocation8 + $0x360] sm:$0xff]  ;;  %v10635_v33 = vld [vmem:[#allocation8 + $0x450] sm:$0xff]  ;;  %p12470_p13 = pneg %p12469_p10 }
0x1140   : > { %v10497_v61 = vsel %vm5344_vm4, %v10496_v43, %v10448_v45  ;;  %v10633_v45 = vld [vmem:[#allocation8 + $0x3b0] sm:$0xff]  ;;  %v10636_v43 = vld [vmem:[#allocation8 + $0x4a0] sm:$0xff] }
0x1141   : > { %v10456_v54 = vpop.permute.xlu0 %10455  ;;  %v10498_v49 = vsel %vm5346_vm5, %v10497_v61, %v10452_v6  ;;  %v10476_v35 = vpop.permute.xlu1 %10475  ;;  %v12047_v4 = vpack.c.bf16 %v10633_v45, %v10632_v3  ;;  %v12050_v6 = vpack.c.bf16 %v10635_v33, %v10634_v42  ;;  %p12477_p2 = pnand %p12476_p1, %p12470_p13 }
0x1142   : > { %v10499_v7 = vsel %vm5348_vm6, %v10498_v49, %v10456_v54  ;;  %v10637_v54 = vld [vmem:[#allocation8 + $0x4f0] sm:$0xff]  ;;  %v10714_v49 = vld [vmem:[#allocation8 + $0x98] sm:$0xff] }
0x1143   : > { %v10500_v9 = vsel %vm5350_vm7, %v10499_v7, %v10460_v60  ;;  %v12053_v61 = vpack.c.bf16 %v10637_v54, %v10636_v43  ;;  %v10713_v60 = vld [vmem:[#allocation8 + $0x48] sm:$0xff] }
0x1144   : > { %v12056_v7 = vpack.c.bf16 %v10714_v49, %v10713_v60 }
0x1145   : > { %v10464_v38 = vpop.permute.xlu0 %10463 }
0x1146   : > { %v10501_v46 = vsel %vm5352_vm8, %v10500_v9, %v10464_v38  ;;  %v10715_v38 = vld [vmem:[#allocation8 + $0xe8] sm:$0xff] }
0x1147   : > { %v10502_v53 = vsel %vm5354_vm9, %v10501_v46, %v10468_v29  ;;  %v10716_v29 = vld [vmem:[#allocation8 + $0x138] sm:$0xff]  ;;  %v10717_v46 = vld [vmem:[#allocation8 + $0x188] sm:$0xff] }
0x1148   : > { %v12059_v9 = vpack.c.bf16 %v10716_v29, %v10715_v38 }
0x1149   : > { %v10472_v16 = vpop.permute.xlu0 %10471 }
0x114a   : > { %v10503_v40 = vsel %vm5356_vm10, %v10502_v53, %v10472_v16  ;;  %v10718_v16 = vld [vmem:[#allocation8 + $0x1d8] sm:$0xff] }
0x114b   : > { %v10504_v63 = vsel %vm5358_vm11, %v10503_v40, %v10476_v35  ;;  %v12062_v53 = vpack.c.bf16 %v10718_v16, %v10717_v46  ;;  %v10719_v35 = vld [vmem:[#allocation8 + $0x228] sm:$0xff]  ;;  %v10720_v40 = vld [vmem:[#allocation8 + $0x278] sm:$0xff] }
0x11a7   : > { %v10484_v59 = vpop.permute.xlu1 %10483  ;;  %v10480_v8 = vpop.permute.xlu0 %10479 }
0x11a8   : > { %v10505_v19 = vsel %vm5360_vm12, %v10504_v63, %v10480_v8  ;;  %v12065_v63 = vpack.c.bf16 %v10720_v40, %v10719_v35  ;;  %v10722_v8 = vld [vmem:[#allocation8 + $0x318] sm:$0xff] }
0x11a9   : > { %v10506_v50 = vsel %vm5362_vm13, %v10505_v19, %v10484_v59  ;;  %v10721_v59 = vld [vmem:[#allocation8 + $0x2c8] sm:$0xff] }
0x11aa   : > { %v12068_v19 = vpack.c.bf16 %v10722_v8, %v10721_v59 }
0x11ab   : > { %v10492_v32 = vpop.permute.xlu1 %10491  ;;  %v10488_v44 = vpop.permute.xlu0 %10487 }
0x11ac   : > { %v10507_v17 = vsel %vm5364_vm14, %v10506_v50, %v10488_v44  ;;  %v10724_v50 = vld [vmem:[#allocation8 + $0x3b8] sm:$0xff] }
0x11ad   : > { %v10508_v2 = vsel %vm14238_vm1, %v10507_v17, %v10492_v32  ;;  %v10723_v32 = vld [vmem:[#allocation8 + $0x368] sm:$0xff] }
0x11ae   : > { %11799 = vmatmul.mubr.f32.vlgmr.msra.gmra.mrb[54].mxu0 %v10508_v2  ;;  %v12071_v44 = vpack.c.bf16 %v10724_v50, %v10723_v32  ;;  %v10725_v17 = vld [vmem:[#allocation8 + $0x408] sm:$0xff]  ;;  %v10726_v2 = vld [vmem:[#allocation8 + $0x458] sm:$0xff] }
0x11af   : > { %11868 = vmatprep.mubr.msk.f32.mxu0 %vm12558_vm0, %v12556_v0  ;;  %v10626_v0 = vld [vmem:[#allocation8 + $0x180] sm:$0xff]  ;;  %12057 = vmatpush3.bf16.msra.mxu0 %v12056_v7  ;;  %v12074_v10 = vpack.c.bf16 %v10726_v2, %v10725_v17 }
0x11b0   : > { %v12038_v12 = vpack.c.bf16 %v10627_v58, %v10626_v0  ;;  %12058 = vmatprep.subr.bf16.mxu0 %v12557_v1  ;;  %v10728_v0 = vld [vmem:[#allocation8 + $0x4f8] sm:$0xff] }
0x11b2   : > { %12039 = vmatpush3.bf16.msra.mxu1 %v12038_v12 }
0x11b3   : > { %12040 = vmatprep.subr.bf16.mxu1 %v12557_v1  ;;  %12060 = vmatpush3.bf16.msra.mxu0 %v12059_v9 }
0x11b4   : > { %12061 = vmatprep.subr.bf16.mxu0 %v12557_v1 }
0x11b6   : > { %12042 = vmatpush3.bf16.msra.mxu1 %v12041_v39 }
0x11b7   : > { %12043 = vmatprep.subr.bf16.mxu1 %v12557_v1  ;;  %12063 = vmatpush3.bf16.msra.mxu0 %v12062_v53 }
0x11b8   : > { %12064 = vmatprep.subr.bf16.mxu0 %v12557_v1 }
0x11ba   : > { %12045 = vmatpush3.bf16.msra.mxu1 %v12044_v21 }
0x11bb   : > { %12046 = vmatprep.subr.bf16.mxu1 %v12557_v1  ;;  %12066 = vmatpush3.bf16.msra.mxu0 %v12065_v63 }
0x11bc   : > { %12067 = vmatprep.subr.bf16.mxu0 %v12557_v1 }
0x11be   : > { %12048 = vmatpush3.bf16.msra.mxu1 %v12047_v4 }
0x11bf   : > { %12049 = vmatprep.subr.bf16.mxu1 %v12557_v1  ;;  %12069 = vmatpush3.bf16.msra.mxu0 %v12068_v19 }
0x11c0   : > { %12070 = vmatprep.subr.bf16.mxu0 %v12557_v1 }
0x11c2   : > { %12051 = vmatpush3.bf16.msra.mxu1 %v12050_v6 }
0x11c3   : > { %12052 = vmatprep.subr.bf16.mxu1 %v12557_v1  ;;  %12072 = vmatpush3.bf16.msra.mxu0 %v12071_v44 }
0x11c4   : > { %12073 = vmatprep.subr.bf16.mxu0 %v12557_v1 }
0x11c6   : > { %12054 = vmatpush3.bf16.msra.mxu1 %v12053_v61 }
0x11c7   : > { %12075 = vmatpush3.bf16.msra.mxu0 %v12074_v10 }
0x11c8   : > { %12076 = vmatprep.subr.bf16.mxu0 %v12557_v1  ;;  %v12077_v1 = vpack.c.bf16 %v10728_v0, %v10727_v20 }
0x11cb   : > { %12078 = vmatpush3.bf16.msra.mxu0 %v12077_v1 }
0x1281   : > { %v10595_v56 = vpop.f32.mrb[54].mxu0 }
0x1282   : > { %v10596_v31 = vadd.f32 %v10595_v56, %v10528_v27  ;;  %v11800_v24 = vpop.f32.mrb[55].mxu0 }
0x1283   : > { %v12322_v24 = vld [vmem:[#allocation10 + $0x8] sm:$0xff] }
0x1284   : > { %v10599_v30 = vadd.f32 %v10596_v31, %v13542_v55  ;;  %v10620_v5 = vrot.slane %v12322_v24, %v5679_v51  ;;  %v10641_v58 = vrot.slane %v12322_v24, %v517_v23  ;;  %v10732_v51 = vrot.slane %v12322_v24, %v523_v15 }
0x1285   : > { %v10819_v15 = vrot.slane %v12322_v24, %v5684_v57  ;;  %v10824_v42 = vrot.slane %v12322_v24, %v10527_v13 }
0x1286   : > { %10600 = vadd.xlane.f32.xlu0 %v10599_v30 }
0x1313   : > { %v10601_v55 = vpop.xlane.xlu0 %10600 }
0x1314   : > { %v10602_v47 = vmul.f32 0.03125, %v10601_v55 }
0x1316   : > { %v10603_v48 = vsub.f32 %v10599_v30, %v10602_v47  ;;  %v10615_v30 = vrot.slane %v12322_v24, %v5501_v52 }
0x1318   : > { %v14125_v41 = vsel %vm325_vm15, %v10603_v48, 0.0 }
0x1319   : > { %v10605_v28 = vmul.f32 %v14125_v41, %v14125_v41 }
0x131b   : > { %10606 = vadd.xlane.f32.xlu1 %v10605_v28 }
0x13a8   : > { %v10607_v27 = vpop.xlane.xlu1 %10606 }
0x13a9   : > { %v10608_v56 = vmul.f32 0.03125, %v10607_v27 }
0x13ab   : > { %v10609_v31 = vadd.f32 1e-05, %v10608_v56 }
0x13ad   : > { %12315 = vrsqrt.f32 %v10609_v31 }
0x13b7   : > { %v12316_v62 = vpop.eup %12315 }
0x13b8   : > { %v10611_v26 = vmul.f32 %v12316_v62, %v14125_v41 }
0x13ba   : > { %v10616_v34 = vmul.f32 %v10615_v30, %v10611_v26 }
0x13bc   : > { %v10621_v22 = vadd.f32 %v10620_v5, %v10616_v34 }
0x13be   : > { %11834 = vmatmul.mubr.f32.vlgmr.msra.gmra.mrb[84].mxu1 %v10621_v22 }
0x1491   : > { %v10708_v12 = vpop.f32.mrb[84].mxu1 }
0x1492   : > { %v10709_v55 = vadd.f32 %v10708_v12, %v10641_v58  ;;  %v11835_v47 = vpop.f32.mrb[85].mxu1 }
0x1494   : > { %v10712_v52 = vmax.f32 %v10709_v55, 0.0 }
0x1496   : > { %11869 = vmatmul.mubr.f32.vlgmr.msra.gmra.mrb[56].mxu0 %v10712_v52 }
0x1569   : > { %v10799_v48 = vpop.f32.mrb[56].mxu0 }
0x156a   : > { %v10800_v41 = vadd.f32 %v10799_v48, %v10732_v51  ;;  %v11870_v28 = vpop.f32.mrb[57].mxu0 }
0x156c   : > { %v10803_v37 = vadd.f32 %v10800_v41, %v10621_v22 }
0x156e   : > { %10804 = vadd.xlane.f32.xlu0 %v10803_v37 }
0x15fb   : > { %v10805_v11 = vpop.xlane.xlu0 %10804 }
0x15fc   : > { %v10806_v39 = vmul.f32 0.03125, %v10805_v11 }
0x15fe   : > { %v10807_v18 = vsub.f32 %v10803_v37, %v10806_v39 }
0x1600   : > { %v10808_v23 = vsel %vm325_vm15, %v10807_v18, 0.0 }
0x1601   : > { %v10809_v36 = vmul.f32 %v10808_v23, %v10808_v23 }
0x1603   : > { %10810 = vadd.xlane.f32.xlu0 %v10809_v36 }
0x1690   : > { %v10811_v3 = vpop.xlane.xlu0 %10810 }
0x1691   : > { %v10812_v21 = vmul.f32 0.03125, %v10811_v3 }
0x1693   : > { %v10813_v45 = vadd.f32 1e-05, %v10812_v21 }
0x1695   : > { %12317 = vrsqrt.f32 %v10813_v45 }
0x169f   : > { %v12318_v4 = vpop.eup %12317 }
0x16a0   : > { %v10815_v33 = vmul.f32 %v12318_v4, %v10808_v23 }
0x16a2   : > { %v10820_v25 = vmul.f32 %v10819_v15, %v10815_v33 }
0x16a4   : > { %v10825_v6 = vadd.f32 %v10824_v42, %v10820_v25 }
0x16a6   : > { %10826 = vst [vmem:[%s317_s24] sm:$0xff] %v10825_v6 }
0x16a7   : > { %12480 = shalt.err (!%p12477_p2)
}
0x16a8   : > { %s12481_s3 = scalar_lea.hbm %s14160_s7, 128  ;;  %s12485_s17 = scalar_lea.hbm %s14209_s5, 256 }
0x16a9   : > { %p12482_p12 = scmp.ne.s32.totalorder %s14160_s7, %s12481_s3  ;;  %p12486_p0 = scmp.lt.u32.totalorder %s14160_s7, %s14209_s5 }
0x16aa   : > { %p12487_p4 = scmp.lt.u32.totalorder %s12485_s17, %s12481_s3  ;;  %p12489_p3 = scmp.lt.u32.totalorder %s12481_s3, %s14160_s7 }
0x16ab   : > { %p12483_p6 = pnand %p12482_p12, %p14239_p7 }
0x16ac   : > { %p12488_p8 = por %p12487_p4, %p12486_p0 }
0x16ad   : > { %p12484_p11 = pneg %p12483_p6 }
0x16ae   : > { %p12490_p10 = por %p12489_p3, %p12488_p8 }
0x16b0   : > { %p12491_p13 = pnand %p12490_p10, %p12484_p11 }
0x16b2   : > { %12494 = shalt.err (!%p12491_p13)
}
0x16b3   : > { %12095 = dma.vmem_to_hbm [thread:$0]  (%p14239_p7), %s14162_s23, 128, %s14160_s7, %s10828_s14  }
0x16b4 PF: > { %s10853_s30 = sand.u32 1, %s12533_s18   ;;  %p14240_p5 = scmp.ne.s32.totalorder %s14221_s25, 0 }
0x16b5   : > { %p14241_p9 = scmp.ge.s32.totalorder %s12545_s21, 2  ;;  %s10854_s12 = scalar_lea.sflag [#allocation4], %s10853_s30 }
0x16b7   : > { %p12115_p1 = pnand %p14241_p9, %p14240_p5 }
0x16b9   : > { %12528 = dma.done.wait (!%p12115_p1), %s10854_s12, 128  }
0x16ba   : > { %12530 = vsyncadd (!%p12115_p1), %s10854_s12, 4294967168  ;;  %p22_p2 = scmp.ge.s32.totalorder %s12731_s16, 4   ;;  %s14242_s18 = smov %s12537_s19 }
0x16bb   : > { %s14243_s19 = smov %s12541_s20  ;;  %s14244_s20 = smov %s12741_s27 }
0x16bc   : > { %s14245_s21 = smov %s12731_s16  ;;  %24 = sbr.rel (!%p22_p2) target bundleno = 11 (0xb), region = 110 }
0x16c3   :  { %10859 = vsyncpa [#allocation3], 1 }
0x16c4   :  { %10861 = vsyncpa [#allocation3 + $0x1], 1 }
0x16c5   :  { %10862 = vsyncpa [#allocation6], 1 }
0x16c6   :  { %10864 = vsyncpa [#allocation6 + $0x1], 1 }
0x16c7   :  { %10865 = vsyncpa [#allocation9], 1 }
0x16c8   :  { %10866 = vsyncpa [#allocation4], 1 }
0x16c9   :  { %10868 = vsyncpa [#allocation4 + $0x1], 1 }

</bundles_post_ra>
